<compile_context>
chip_gen: v5e
topology: v5e:2x2
jax: 0.10.0
libtpu: 0.0.40
codegen_flags: <defaults>
</compile_context>

<pallas_src>
import functools

import jax
import jax.numpy as jnp
from jax import lax
from jax.experimental import pallas as pl
from jax.experimental.pallas import tpu as pltpu


def _attention_kernel(x_ref, gamma_ref, beta_ref, wqkv_ref, wout_ref, bout_ref,
                      mask_ref, o_ref, *, heads, dim_head, pack, eps):
    TBP, N, D = x_ref.shape
    T = TBP * N
    inner = heads * dim_head
    SUPER = pack * N            # tokens per packed attention super-block (~128)
    G2 = TBP // pack            # super-blocks per grid step
    mm_dtype = wqkv_ref.dtype   # bf16 matmul operands, f32 accumulation

    # ---- LayerNorm (f32) on the flattened (T, D) slab ------------------------
    x = x_ref[...].reshape(T, D).astype(jnp.float32)      # leading-dim merge: free
    mean = jnp.mean(x, axis=-1, keepdims=True)
    var = jnp.mean((x - mean) ** 2, axis=-1, keepdims=True)
    xn = (x - mean) * lax.rsqrt(var + eps)
    xn = xn * gamma_ref[...] + beta_ref[...]               # (1, D) broadcasts
    xn_b = xn.astype(mm_dtype)

    # ---- Fused QKV projection: one lane-dense (T, 3*inner) matmul ------------
    # (scale is pre-folded into the Q columns of wqkv in the wrapper)
    qkv = jnp.dot(xn_b, wqkv_ref[...], preferred_element_type=jnp.float32)
    qkv_b = qkv.astype(mm_dtype)                           # cast once, sliced per head

    # Block-diagonal mask (resident input), hoisted out of the head loop.
    mask = mask_ref[...]                                   # (SUPER, SUPER) f32

    acc = jnp.zeros((T, D), jnp.float32)

    # Short static unroll over heads (heads is small; per-head temporaries are
    # VMEM-sized streams, not vreg-resident, so unrolling does not blow regs).
    for h in range(heads):
        q = qkv_b[:, h * dim_head:(h + 1) * dim_head]                      # (T, dh)
        k = qkv_b[:, inner + h * dim_head:inner + (h + 1) * dim_head]
        v = qkv_b[:, 2 * inner + h * dim_head:2 * inner + (h + 1) * dim_head]

        # (T, dh) -> (G2, SUPER, dh): leading-dim split, layout-preserving.
        q3 = q.reshape(G2, SUPER, dim_head)
        k3 = k.reshape(G2, SUPER, dim_head)
        v3 = v.reshape(G2, SUPER, dim_head)

        # Packed scores: lane-dense (SUPER x SUPER) MXU matmuls per super-block.
        dots = jnp.einsum('gnd,gmd->gnm', q3, k3,
                          preferred_element_type=jnp.float32)              # (G2,S,S)
        dots = dots + mask                                  # block-diagonal masking

        m = jnp.max(dots, axis=-1, keepdims=True)
        p = jnp.exp(dots - m)
        s = jnp.sum(p, axis=-1, keepdims=True)
        attn = p * pl.reciprocal(s, approx=True)            # EUP rcp, not VPU div
        # dropout(p=0.0) is the identity in the forward pass — nothing to do.

        oh = jnp.einsum('gnm,gmd->gnd', attn.astype(mm_dtype), v3,
                        preferred_element_type=jnp.float32)               # (G2,S,dh)

        # Per-head slice of the output projection, accumulated in f32:
        # sum_h (oh_h @ Wout[h*dh:(h+1)*dh, :])  ==  concat_h(oh_h) @ Wout
        acc = acc + jnp.dot(oh.reshape(T, dim_head).astype(mm_dtype),
                            wout_ref[h], preferred_element_type=jnp.float32)

    out = acc + bout_ref[...]                               # bias (1, D) broadcast
    o_ref[...] = out.reshape(TBP, N, D).astype(o_ref.dtype)


def attention_pallas(x, gamma, beta, w_qkv, w_out, b_out, *, heads, dim_head,
                     block_patches=128):
    B, P, N, D = x.shape
    inner = heads * dim_head
    assert w_qkv.shape == (D, 3 * inner)
    assert w_out.shape == (inner, D)

    # Patches per 128-token super-block (block-diagonal attention packing).
    PACK = max(1, 128 // N) if N <= 128 else 1
    SUPER = PACK * N

    # Flatten (B, P) -> G, pad to whole super-blocks, then tile with TBP patches
    # per grid step.  TBP is a multiple of PACK; when there is more than one
    # super-block we cap TBP so the grid has >= 2 steps (v7x megacore).
    G = B * P
    G_super = ((G + PACK - 1) // PACK) * PACK
    n_super = G_super // PACK
    tbp_super = max(1, min(block_patches // PACK, n_super))
    if n_super >= 2:
        tbp_super = min(tbp_super, (n_super + 1) // 2)
    TBP = tbp_super * PACK
    G_pad = ((G_super + TBP - 1) // TBP) * TBP
    assert TBP % PACK == 0 and G_pad % TBP == 0

    x_flat = x.reshape(G, N, D)
    if G_pad != G:
        x_flat = jnp.concatenate(
            [x_flat, jnp.zeros((G_pad - G, N, D), x.dtype)], axis=0)

    # ---- Parameter prep (done once, outside the kernel) ----------------------
    mm_dtype = jnp.bfloat16
    scale = dim_head ** (-0.5)
    # Fold the attention scale into the Q columns (x @ (Wq*s) == s*(x @ Wq)).
    w_qkv_scaled = jnp.asarray(w_qkv).at[:, :inner].multiply(scale)
    wqkv_b = w_qkv_scaled.astype(mm_dtype)                  # (D, 3*inner), q|k|v head-major
    wout_h = jnp.asarray(w_out).reshape(heads, dim_head, D).astype(mm_dtype)

    gamma2 = jnp.asarray(gamma).reshape(1, D).astype(jnp.float32)
    beta2 = jnp.asarray(beta).reshape(1, D).astype(jnp.float32)
    bout2 = jnp.asarray(b_out).reshape(1, D).astype(jnp.float32)

    # Block-diagonal additive mask: token i may attend token j iff they belong
    # to the same original patch (i//N == j//N) inside the packed super-block.
    blk = jnp.arange(SUPER, dtype=jnp.int32) // N
    mask_mat = jnp.where(blk[:, None] == blk[None, :], 0.0, -1e30).astype(jnp.float32)

    kernel = functools.partial(_attention_kernel, heads=heads,
                               dim_head=dim_head, pack=PACK, eps=1e-5)

    # Constant index_maps keep the (small) parameter blocks resident in VMEM —
    # they are DMA'd once, not once per grid step.
    def resident(shape):
        n = len(shape)
        return pl.BlockSpec(shape, lambda g, _n=n: (0,) * _n)

    steps = G_pad // TBP
    T = TBP * N
    G2 = TBP // PACK
    flops_per_step = (2 * T * D * 3 * inner                     # fused QKV
                      + heads * 2 * (2 * G2 * SUPER * SUPER * dim_head)  # scores + PV
                      + heads * 2 * T * dim_head * D)            # out projection
    cost = pl.CostEstimate(
        flops=int(steps * flops_per_step),
        transcendentals=int(steps * heads * G2 * SUPER * SUPER),
        bytes_accessed=int(2 * G_pad * N * D * 4                 # x + out (f32)
                           + D * 3 * inner * 2 + inner * D * 2   # bf16 weights
                           + 3 * D * 4 + SUPER * SUPER * 4))     # ln/bias + mask

    out_flat = pl.pallas_call(
        kernel,
        out_shape=jax.ShapeDtypeStruct((G_pad, N, D), x.dtype),
        grid=(steps,),
        in_specs=[
            pl.BlockSpec((TBP, N, D), lambda g: (g, 0, 0)),   # x
            resident((1, D)),                                 # gamma
            resident((1, D)),                                 # beta
            resident((D, 3 * inner)),                         # fused Wqkv (Q pre-scaled)
            resident((heads, dim_head, D)),                   # Wout (head-major)
            resident((1, D)),                                 # b_out
            resident((SUPER, SUPER)),                         # block-diagonal mask
        ],
        out_specs=pl.BlockSpec((TBP, N, D), lambda g: (g, 0, 0)),
        compiler_params=pltpu.CompilerParams(
            dimension_semantics=("parallel",),                # shards across TCs on v7x
            vmem_limit_bytes=48 * 1024 * 1024),
        cost_estimate=cost,
    )(x_flat, gamma2, beta2, wqkv_b, wout_h, bout2, mask_mat)

    return out_flat[:G].reshape(B, P, N, D)


def attention_reference(x, gamma, beta, w_qkv, w_out, b_out, *, heads, dim_head):
    """Pure-JAX f32 reference mirroring the PyTorch forward."""
    mean = jnp.mean(x, axis=-1, keepdims=True)
    var = jnp.mean((x - mean) ** 2, axis=-1, keepdims=True)
    xn = (x - mean) / jnp.sqrt(var + 1e-5) * gamma + beta
    qkv = xn @ w_qkv
    q, k, v = jnp.split(qkv, 3, axis=-1)

    def to_heads(t):  # b p n (h d) -> b p h n d
        B, P, N, _ = t.shape
        return t.reshape(B, P, N, heads, dim_head).transpose(0, 1, 3, 2, 4)

    q, k, v = map(to_heads, (q, k, v))
    dots = jnp.einsum('bphnd,bphmd->bphnm', q, k) * (dim_head ** -0.5)
    attn = jax.nn.softmax(dots, axis=-1)
    out = jnp.einsum('bphnm,bphmd->bphnd', attn, v)
    B, P, H, N, Dh = out.shape
    out = out.transpose(0, 1, 3, 2, 4).reshape(B, P, N, H * Dh)
    return out @ w_out + b_out


if __name__ == "__main__":
    # Small shapes consistent with the module's forward (b, p, n, dim).
    B, P, N, DIM = 2, 4, 8, 32
    HEADS, DIM_HEAD = 4, 16
    INNER = HEADS * DIM_HEAD

    key = jax.random.PRNGKey(0)
    kx, kq, ko, kb, kg, kbt = jax.random.split(key, 6)

    x = jax.random.normal(kx, (B, P, N, DIM), dtype=jnp.float32)

    # Deterministic synthetic parameters (not a checkpoint load).
    gamma = 1.0 + 0.1 * jax.random.normal(kg, (DIM,), jnp.float32)
    beta = 0.05 * jax.random.normal(kbt, (DIM,), jnp.float32)
    w_qkv = jax.random.normal(kq, (DIM, 3 * INNER), jnp.float32) * (DIM ** -0.5)
    w_out = jax.random.normal(ko, (INNER, DIM), jnp.float32) * (INNER ** -0.5)
    b_out = jax.random.normal(kb, (DIM,), jnp.float32) * 0.01

    out = attention_pallas(x, gamma, beta, w_qkv, w_out, b_out,
                           heads=HEADS, dim_head=DIM_HEAD)
    out = jax.block_until_ready(out)

    ref = attention_reference(x, gamma, beta, w_qkv, w_out, b_out,
                              heads=HEADS, dim_head=DIM_HEAD)
    assert out.shape == (B, P, N, DIM)
    # bf16 matmul operands (f32 accumulation) + approx reciprocal -> ~1e-2 level.
    assert jnp.allclose(out, ref, atol=5e-2, rtol=5e-2), "mismatch vs reference"
    print("KERNEL_OK")
</pallas_src>

<mosaic_0001>
module attributes {stable_mosaic.version = 11 : i64} {
  func.func @_attention_kernel(%arg0: i32, %arg1: memref<16x8x32xf32, #tpu.memory_space<vmem>>, %arg2: memref<1x32xf32, #tpu.memory_space<vmem>>, %arg3: memref<1x32xf32, #tpu.memory_space<vmem>>, %arg4: memref<32x192xbf16, #tpu.memory_space<vmem>>, %arg5: memref<4x16x32xbf16, #tpu.memory_space<vmem>>, %arg6: memref<1x32xf32, #tpu.memory_space<vmem>>, %arg7: memref<128x128xf32, #tpu.memory_space<vmem>>, %arg8: memref<16x8x32xf32, #tpu.memory_space<vmem>>) attributes {dimension_semantics = [#tpu.dimension_semantics<parallel>], iteration_bounds = array<i64: 1>, scalar_prefetch = 0 : i64, scratch_operands = 0 : i64, tpu.core_type = #tpu.core_type<tc>, window_params = [{transform_indices = @transform_0, window_bounds = array<i64: 16, 8, 32>}, {pipeline_mode = #tpu.pipeline_mode<synchronous>, transform_indices = @transform_1, window_bounds = array<i64: 1, 32>}, {pipeline_mode = #tpu.pipeline_mode<synchronous>, transform_indices = @transform_2, window_bounds = array<i64: 1, 32>}, {pipeline_mode = #tpu.pipeline_mode<synchronous>, transform_indices = @transform_3, window_bounds = array<i64: 32, 192>}, {pipeline_mode = #tpu.pipeline_mode<synchronous>, transform_indices = @transform_4, window_bounds = array<i64: 4, 16, 32>}, {pipeline_mode = #tpu.pipeline_mode<synchronous>, transform_indices = @transform_5, window_bounds = array<i64: 1, 32>}, {pipeline_mode = #tpu.pipeline_mode<synchronous>, transform_indices = @transform_6, window_bounds = array<i64: 128, 128>}, {transform_indices = @transform_7, window_bounds = array<i64: 16, 8, 32>}]} {
    %c0 = arith.constant 0 : index
    %c0_0 = arith.constant 0 : index
    %c0_1 = arith.constant 0 : index
    %0 = vector.load %arg1[%c0, %c0_0, %c0_1] : memref<16x8x32xf32, #tpu.memory_space<vmem>>, vector<16x8x32xf32>
    %1 = vector.shape_cast %0 : vector<16x8x32xf32> to vector<128x32xf32>
    %cst = arith.constant dense<0.000000e+00> : vector<128xf32>
    %2 = vector.multi_reduction <add>, %1, %cst [1] : vector<128x32xf32> to vector<128xf32>
    %3 = vector.shape_cast %2 : vector<128xf32> to vector<128x1xf32>
    %cst_2 = arith.constant 3.200000e+01 : f32
    %4 = vector.broadcast %cst_2 : f32 to vector<128x1xf32>
    %5 = arith.divf %3, %4 : vector<128x1xf32>
    %6 = vector.broadcast %5 : vector<128x1xf32> to vector<128x32xf32>
    %7 = arith.subf %1, %6 : vector<128x32xf32>
    %8 = arith.mulf %7, %7 : vector<128x32xf32>
    %cst_3 = arith.constant dense<0.000000e+00> : vector<128xf32>
    %9 = vector.multi_reduction <add>, %8, %cst_3 [1] : vector<128x32xf32> to vector<128xf32>
    %10 = vector.shape_cast %9 : vector<128xf32> to vector<128x1xf32>
    %cst_4 = arith.constant 3.200000e+01 : f32
    %11 = vector.broadcast %cst_4 : f32 to vector<128x1xf32>
    %12 = arith.divf %10, %11 : vector<128x1xf32>
    %13 = vector.broadcast %5 : vector<128x1xf32> to vector<128x32xf32>
    %14 = arith.subf %1, %13 : vector<128x32xf32>
    %cst_5 = arith.constant 9.99999974E-6 : f32
    %15 = vector.broadcast %cst_5 : f32 to vector<128x1xf32>
    %16 = arith.addf %12, %15 : vector<128x1xf32>
    %17 = math.rsqrt %16 : vector<128x1xf32>
    %18 = vector.broadcast %17 : vector<128x1xf32> to vector<128x32xf32>
    %19 = arith.mulf %14, %18 : vector<128x32xf32>
    %c0_6 = arith.constant 0 : index
    %c0_7 = arith.constant 0 : index
    %20 = vector.load %arg2[%c0_6, %c0_7] : memref<1x32xf32, #tpu.memory_space<vmem>>, vector<1x32xf32>
    %21 = vector.broadcast %20 : vector<1x32xf32> to vector<128x32xf32>
    %22 = arith.mulf %19, %21 : vector<128x32xf32>
    %c0_8 = arith.constant 0 : index
    %c0_9 = arith.constant 0 : index
    %23 = vector.load %arg3[%c0_8, %c0_9] : memref<1x32xf32, #tpu.memory_space<vmem>>, vector<1x32xf32>
    %24 = vector.broadcast %23 : vector<1x32xf32> to vector<128x32xf32>
    %25 = arith.addf %22, %24 : vector<128x32xf32>
    %26 = arith.truncf %25 : vector<128x32xf32> to vector<128x32xbf16>
    %c0_10 = arith.constant 0 : index
    %c0_11 = arith.constant 0 : index
    %27 = vector.load %arg4[%c0_10, %c0_11] : memref<32x192xbf16, #tpu.memory_space<vmem>>, vector<32x192xbf16>
    %cst_12 = arith.constant dense<0.000000e+00> : vector<128x192xf32>
    %28 = tpu.matmul %26, %27, %cst_12 {dimension_numbers = #tpu.dot_dimension_numbers<[1], [0], [0], [1], [0, 0, 1, 1], [], []>} : vector<128x32xbf16>, vector<32x192xbf16>, vector<128x192xf32> -> vector<128x192xf32>
    %29 = arith.truncf %28 : vector<128x192xf32> to vector<128x192xbf16>
    %c0_13 = arith.constant 0 : index
    %c0_14 = arith.constant 0 : index
    %30 = vector.load %arg7[%c0_13, %c0_14] : memref<128x128xf32, #tpu.memory_space<vmem>>, vector<128x128xf32>
    %cst_15 = arith.constant 0.000000e+00 : f32
    %31 = vector.broadcast %cst_15 : f32 to vector<128x32xf32>
    %32 = vector.extract_strided_slice %29 {offsets = [0, 0], sizes = [128, 16], strides = [1, 1]} : vector<128x192xbf16> to vector<128x16xbf16>
    %33 = vector.extract_strided_slice %29 {offsets = [0, 64], sizes = [128, 16], strides = [1, 1]} : vector<128x192xbf16> to vector<128x16xbf16>
    %34 = vector.extract_strided_slice %29 {offsets = [0, 128], sizes = [128, 16], strides = [1, 1]} : vector<128x192xbf16> to vector<128x16xbf16>
    %35 = vector.shape_cast %32 : vector<128x16xbf16> to vector<1x128x16xbf16>
    %36 = vector.shape_cast %33 : vector<128x16xbf16> to vector<1x128x16xbf16>
    %37 = vector.shape_cast %34 : vector<128x16xbf16> to vector<1x128x16xbf16>
    "tpu.trace_start"() <{level = 10 : i32, message = "gnd,gmd->gnm"}> : () -> ()
    %cst_16 = arith.constant dense<0.000000e+00> : vector<1x128x128xf32>
    %38 = tpu.matmul %35, %36, %cst_16 {dimension_numbers = #tpu.dot_dimension_numbers<[2], [2], [1], [1], [0, 0, 0, 1, 1, 1], [0], [0]>} : vector<1x128x16xbf16>, vector<1x128x16xbf16>, vector<1x128x128xf32> -> vector<1x128x128xf32>
    "tpu.trace_stop"() : () -> ()
    %39 = vector.shape_cast %30 : vector<128x128xf32> to vector<1x128x128xf32>
    %40 = arith.addf %38, %39 : vector<1x128x128xf32>
    %cst_17 = arith.constant dense<0xFF800000> : vector<1x128xf32>
    %41 = vector.multi_reduction <maximumf>, %40, %cst_17 [2] : vector<1x128x128xf32> to vector<1x128xf32>
    %42 = vector.shape_cast %41 : vector<1x128xf32> to vector<1x128x1xf32>
    %43 = vector.broadcast %42 : vector<1x128x1xf32> to vector<1x128x128xf32>
    %44 = arith.subf %40, %43 : vector<1x128x128xf32>
    %45 = math.exp %44 : vector<1x128x128xf32>
    %cst_18 = arith.constant dense<0.000000e+00> : vector<1x128xf32>
    %46 = vector.multi_reduction <add>, %45, %cst_18 [2] : vector<1x128x128xf32> to vector<1x128xf32>
    %47 = vector.shape_cast %46 : vector<1x128xf32> to vector<1x128x1xf32>
    %48 = tpu.reciprocal %47 {approx = true} : vector<1x128x1xf32> -> vector<1x128x1xf32>
    %49 = vector.broadcast %48 : vector<1x128x1xf32> to vector<1x128x128xf32>
    %50 = arith.mulf %45, %49 : vector<1x128x128xf32>
    %51 = arith.truncf %50 : vector<1x128x128xf32> to vector<1x128x128xbf16>
    "tpu.trace_start"() <{level = 10 : i32, message = "gnm,gmd->gnd"}> : () -> ()
    %cst_19 = arith.constant dense<0.000000e+00> : vector<1x128x16xf32>
    %52 = tpu.matmul %51, %37, %cst_19 {dimension_numbers = #tpu.dot_dimension_numbers<[2], [1], [1], [2], [0, 0, 0, 1, 1, 2], [0], [0]>} : vector<1x128x128xbf16>, vector<1x128x16xbf16>, vector<1x128x16xf32> -> vector<1x128x16xf32>
    "tpu.trace_stop"() : () -> ()
    %53 = vector.shape_cast %52 : vector<1x128x16xf32> to vector<128x16xf32>
    %54 = arith.truncf %53 : vector<128x16xf32> to vector<128x16xbf16>
    %c0_20 = arith.constant 0 : index
    %c0_21 = arith.constant 0 : index
    %c0_22 = arith.constant 0 : index
    %55 = vector.load %arg5[%c0_20, %c0_21, %c0_22] : memref<4x16x32xbf16, #tpu.memory_space<vmem>>, vector<1x16x32xbf16>
    %56 = vector.shape_cast %55 : vector<1x16x32xbf16> to vector<16x32xbf16>
    %cst_23 = arith.constant dense<0.000000e+00> : vector<128x32xf32>
    %57 = tpu.matmul %54, %56, %cst_23 {dimension_numbers = #tpu.dot_dimension_numbers<[1], [0], [0], [1], [0, 0, 1, 1], [], []>} : vector<128x16xbf16>, vector<16x32xbf16>, vector<128x32xf32> -> vector<128x32xf32>
    %58 = arith.addf %31, %57 : vector<128x32xf32>
    %59 = vector.extract_strided_slice %29 {offsets = [0, 16], sizes = [128, 16], strides = [1, 1]} : vector<128x192xbf16> to vector<128x16xbf16>
    %60 = vector.extract_strided_slice %29 {offsets = [0, 80], sizes = [128, 16], strides = [1, 1]} : vector<128x192xbf16> to vector<128x16xbf16>
    %61 = vector.extract_strided_slice %29 {offsets = [0, 144], sizes = [128, 16], strides = [1, 1]} : vector<128x192xbf16> to vector<128x16xbf16>
    %62 = vector.shape_cast %59 : vector<128x16xbf16> to vector<1x128x16xbf16>
    %63 = vector.shape_cast %60 : vector<128x16xbf16> to vector<1x128x16xbf16>
    %64 = vector.shape_cast %61 : vector<128x16xbf16> to vector<1x128x16xbf16>
    "tpu.trace_start"() <{level = 10 : i32, message = "gnd,gmd->gnm"}> : () -> ()
    %cst_24 = arith.constant dense<0.000000e+00> : vector<1x128x128xf32>
    %65 = tpu.matmul %62, %63, %cst_24 {dimension_numbers = #tpu.dot_dimension_numbers<[2], [2], [1], [1], [0, 0, 0, 1, 1, 1], [0], [0]>} : vector<1x128x16xbf16>, vector<1x128x16xbf16>, vector<1x128x128xf32> -> vector<1x128x128xf32>
    "tpu.trace_stop"() : () -> ()
    %66 = vector.shape_cast %30 : vector<128x128xf32> to vector<1x128x128xf32>
    %67 = arith.addf %65, %66 : vector<1x128x128xf32>
    %cst_25 = arith.constant dense<0xFF800000> : vector<1x128xf32>
    %68 = vector.multi_reduction <maximumf>, %67, %cst_25 [2] : vector<1x128x128xf32> to vector<1x128xf32>
    %69 = vector.shape_cast %68 : vector<1x128xf32> to vector<1x128x1xf32>
    %70 = vector.broadcast %69 : vector<1x128x1xf32> to vector<1x128x128xf32>
    %71 = arith.subf %67, %70 : vector<1x128x128xf32>
    %72 = math.exp %71 : vector<1x128x128xf32>
    %cst_26 = arith.constant dense<0.000000e+00> : vector<1x128xf32>
    %73 = vector.multi_reduction <add>, %72, %cst_26 [2] : vector<1x128x128xf32> to vector<1x128xf32>
    %74 = vector.shape_cast %73 : vector<1x128xf32> to vector<1x128x1xf32>
    %75 = tpu.reciprocal %74 {approx = true} : vector<1x128x1xf32> -> vector<1x128x1xf32>
    %76 = vector.broadcast %75 : vector<1x128x1xf32> to vector<1x128x128xf32>
    %77 = arith.mulf %72, %76 : vector<1x128x128xf32>
    %78 = arith.truncf %77 : vector<1x128x128xf32> to vector<1x128x128xbf16>
    "tpu.trace_start"() <{level = 10 : i32, message = "gnm,gmd->gnd"}> : () -> ()
    %cst_27 = arith.constant dense<0.000000e+00> : vector<1x128x16xf32>
    %79 = tpu.matmul %78, %64, %cst_27 {dimension_numbers = #tpu.dot_dimension_numbers<[2], [1], [1], [2], [0, 0, 0, 1, 1, 2], [0], [0]>} : vector<1x128x128xbf16>, vector<1x128x16xbf16>, vector<1x128x16xf32> -> vector<1x128x16xf32>
    "tpu.trace_stop"() : () -> ()
    %80 = vector.shape_cast %79 : vector<1x128x16xf32> to vector<128x16xf32>
    %81 = arith.truncf %80 : vector<128x16xf32> to vector<128x16xbf16>
    %c1 = arith.constant 1 : index
    %c0_28 = arith.constant 0 : index
    %c0_29 = arith.constant 0 : index
    %82 = vector.load %arg5[%c1, %c0_28, %c0_29] : memref<4x16x32xbf16, #tpu.memory_space<vmem>>, vector<1x16x32xbf16>
    %83 = vector.shape_cast %82 : vector<1x16x32xbf16> to vector<16x32xbf16>
    %cst_30 = arith.constant dense<0.000000e+00> : vector<128x32xf32>
    %84 = tpu.matmul %81, %83, %cst_30 {dimension_numbers = #tpu.dot_dimension_numbers<[1], [0], [0], [1], [0, 0, 1, 1], [], []>} : vector<128x16xbf16>, vector<16x32xbf16>, vector<128x32xf32> -> vector<128x32xf32>
    %85 = arith.addf %58, %84 : vector<128x32xf32>
    %86 = vector.extract_strided_slice %29 {offsets = [0, 32], sizes = [128, 16], strides = [1, 1]} : vector<128x192xbf16> to vector<128x16xbf16>
    %87 = vector.extract_strided_slice %29 {offsets = [0, 96], sizes = [128, 16], strides = [1, 1]} : vector<128x192xbf16> to vector<128x16xbf16>
    %88 = vector.extract_strided_slice %29 {offsets = [0, 160], sizes = [128, 16], strides = [1, 1]} : vector<128x192xbf16> to vector<128x16xbf16>
    %89 = vector.shape_cast %86 : vector<128x16xbf16> to vector<1x128x16xbf16>
    %90 = vector.shape_cast %87 : vector<128x16xbf16> to vector<1x128x16xbf16>
    %91 = vector.shape_cast %88 : vector<128x16xbf16> to vector<1x128x16xbf16>
    "tpu.trace_start"() <{level = 10 : i32, message = "gnd,gmd->gnm"}> : () -> ()
    %cst_31 = arith.constant dense<0.000000e+00> : vector<1x128x128xf32>
    %92 = tpu.matmul %89, %90, %cst_31 {dimension_numbers = #tpu.dot_dimension_numbers<[2], [2], [1], [1], [0, 0, 0, 1, 1, 1], [0], [0]>} : vector<1x128x16xbf16>, vector<1x128x16xbf16>, vector<1x128x128xf32> -> vector<1x128x128xf32>
    "tpu.trace_stop"() : () -> ()
    %93 = vector.shape_cast %30 : vector<128x128xf32> to vector<1x128x128xf32>
    %94 = arith.addf %92, %93 : vector<1x128x128xf32>
    %cst_32 = arith.constant dense<0xFF800000> : vector<1x128xf32>
    %95 = vector.multi_reduction <maximumf>, %94, %cst_32 [2] : vector<1x128x128xf32> to vector<1x128xf32>
    %96 = vector.shape_cast %95 : vector<1x128xf32> to vector<1x128x1xf32>
    %97 = vector.broadcast %96 : vector<1x128x1xf32> to vector<1x128x128xf32>
    %98 = arith.subf %94, %97 : vector<1x128x128xf32>
    %99 = math.exp %98 : vector<1x128x128xf32>
    %cst_33 = arith.constant dense<0.000000e+00> : vector<1x128xf32>
    %100 = vector.multi_reduction <add>, %99, %cst_33 [2] : vector<1x128x128xf32> to vector<1x128xf32>
    %101 = vector.shape_cast %100 : vector<1x128xf32> to vector<1x128x1xf32>
    %102 = tpu.reciprocal %101 {approx = true} : vector<1x128x1xf32> -> vector<1x128x1xf32>
    %103 = vector.broadcast %102 : vector<1x128x1xf32> to vector<1x128x128xf32>
    %104 = arith.mulf %99, %103 : vector<1x128x128xf32>
    %105 = arith.truncf %104 : vector<1x128x128xf32> to vector<1x128x128xbf16>
    "tpu.trace_start"() <{level = 10 : i32, message = "gnm,gmd->gnd"}> : () -> ()
    %cst_34 = arith.constant dense<0.000000e+00> : vector<1x128x16xf32>
    %106 = tpu.matmul %105, %91, %cst_34 {dimension_numbers = #tpu.dot_dimension_numbers<[2], [1], [1], [2], [0, 0, 0, 1, 1, 2], [0], [0]>} : vector<1x128x128xbf16>, vector<1x128x16xbf16>, vector<1x128x16xf32> -> vector<1x128x16xf32>
    "tpu.trace_stop"() : () -> ()
    %107 = vector.shape_cast %106 : vector<1x128x16xf32> to vector<128x16xf32>
    %108 = arith.truncf %107 : vector<128x16xf32> to vector<128x16xbf16>
    %c2 = arith.constant 2 : index
    %c0_35 = arith.constant 0 : index
    %c0_36 = arith.constant 0 : index
    %109 = vector.load %arg5[%c2, %c0_35, %c0_36] : memref<4x16x32xbf16, #tpu.memory_space<vmem>>, vector<1x16x32xbf16>
    %110 = vector.shape_cast %109 : vector<1x16x32xbf16> to vector<16x32xbf16>
    %cst_37 = arith.constant dense<0.000000e+00> : vector<128x32xf32>
    %111 = tpu.matmul %108, %110, %cst_37 {dimension_numbers = #tpu.dot_dimension_numbers<[1], [0], [0], [1], [0, 0, 1, 1], [], []>} : vector<128x16xbf16>, vector<16x32xbf16>, vector<128x32xf32> -> vector<128x32xf32>
    %112 = arith.addf %85, %111 : vector<128x32xf32>
    %113 = vector.extract_strided_slice %29 {offsets = [0, 48], sizes = [128, 16], strides = [1, 1]} : vector<128x192xbf16> to vector<128x16xbf16>
    %114 = vector.extract_strided_slice %29 {offsets = [0, 112], sizes = [128, 16], strides = [1, 1]} : vector<128x192xbf16> to vector<128x16xbf16>
    %115 = vector.extract_strided_slice %29 {offsets = [0, 176], sizes = [128, 16], strides = [1, 1]} : vector<128x192xbf16> to vector<128x16xbf16>
    %116 = vector.shape_cast %113 : vector<128x16xbf16> to vector<1x128x16xbf16>
    %117 = vector.shape_cast %114 : vector<128x16xbf16> to vector<1x128x16xbf16>
    %118 = vector.shape_cast %115 : vector<128x16xbf16> to vector<1x128x16xbf16>
    "tpu.trace_start"() <{level = 10 : i32, message = "gnd,gmd->gnm"}> : () -> ()
    %cst_38 = arith.constant dense<0.000000e+00> : vector<1x128x128xf32>
    %119 = tpu.matmul %116, %117, %cst_38 {dimension_numbers = #tpu.dot_dimension_numbers<[2], [2], [1], [1], [0, 0, 0, 1, 1, 1], [0], [0]>} : vector<1x128x16xbf16>, vector<1x128x16xbf16>, vector<1x128x128xf32> -> vector<1x128x128xf32>
    "tpu.trace_stop"() : () -> ()
    %120 = vector.shape_cast %30 : vector<128x128xf32> to vector<1x128x128xf32>
    %121 = arith.addf %119, %120 : vector<1x128x128xf32>
    %cst_39 = arith.constant dense<0xFF800000> : vector<1x128xf32>
    %122 = vector.multi_reduction <maximumf>, %121, %cst_39 [2] : vector<1x128x128xf32> to vector<1x128xf32>
    %123 = vector.shape_cast %122 : vector<1x128xf32> to vector<1x128x1xf32>
    %124 = vector.broadcast %123 : vector<1x128x1xf32> to vector<1x128x128xf32>
    %125 = arith.subf %121, %124 : vector<1x128x128xf32>
    %126 = math.exp %125 : vector<1x128x128xf32>
    %cst_40 = arith.constant dense<0.000000e+00> : vector<1x128xf32>
    %127 = vector.multi_reduction <add>, %126, %cst_40 [2] : vector<1x128x128xf32> to vector<1x128xf32>
    %128 = vector.shape_cast %127 : vector<1x128xf32> to vector<1x128x1xf32>
    %129 = tpu.reciprocal %128 {approx = true} : vector<1x128x1xf32> -> vector<1x128x1xf32>
    %130 = vector.broadcast %129 : vector<1x128x1xf32> to vector<1x128x128xf32>
    %131 = arith.mulf %126, %130 : vector<1x128x128xf32>
    %132 = arith.truncf %131 : vector<1x128x128xf32> to vector<1x128x128xbf16>
    "tpu.trace_start"() <{level = 10 : i32, message = "gnm,gmd->gnd"}> : () -> ()
    %cst_41 = arith.constant dense<0.000000e+00> : vector<1x128x16xf32>
    %133 = tpu.matmul %132, %118, %cst_41 {dimension_numbers = #tpu.dot_dimension_numbers<[2], [1], [1], [2], [0, 0, 0, 1, 1, 2], [0], [0]>} : vector<1x128x128xbf16>, vector<1x128x16xbf16>, vector<1x128x16xf32> -> vector<1x128x16xf32>
    "tpu.trace_stop"() : () -> ()
    %134 = vector.shape_cast %133 : vector<1x128x16xf32> to vector<128x16xf32>
    %135 = arith.truncf %134 : vector<128x16xf32> to vector<128x16xbf16>
    %c3 = arith.constant 3 : index
    %c0_42 = arith.constant 0 : index
    %c0_43 = arith.constant 0 : index
    %136 = vector.load %arg5[%c3, %c0_42, %c0_43] : memref<4x16x32xbf16, #tpu.memory_space<vmem>>, vector<1x16x32xbf16>
    %137 = vector.shape_cast %136 : vector<1x16x32xbf16> to vector<16x32xbf16>
    %cst_44 = arith.constant dense<0.000000e+00> : vector<128x32xf32>
    %138 = tpu.matmul %135, %137, %cst_44 {dimension_numbers = #tpu.dot_dimension_numbers<[1], [0], [0], [1], [0, 0, 1, 1], [], []>} : vector<128x16xbf16>, vector<16x32xbf16>, vector<128x32xf32> -> vector<128x32xf32>
    %139 = arith.addf %112, %138 : vector<128x32xf32>
    %c0_45 = arith.constant 0 : index
    %c0_46 = arith.constant 0 : index
    %140 = vector.load %arg6[%c0_45, %c0_46] : memref<1x32xf32, #tpu.memory_space<vmem>>, vector<1x32xf32>
    %141 = vector.broadcast %140 : vector<1x32xf32> to vector<128x32xf32>
    %142 = arith.addf %139, %141 : vector<128x32xf32>
    %143 = vector.shape_cast %142 : vector<128x32xf32> to vector<16x8x32xf32>
    %c0_47 = arith.constant 0 : index
    %c0_48 = arith.constant 0 : index
    %c0_49 = arith.constant 0 : index
    %144 = vector.load %arg8[%c0_47, %c0_48, %c0_49] : memref<16x8x32xf32, #tpu.memory_space<vmem>>, vector<16x8x32xf32>
    tpu.vector_store %arg8[%c0_47, %c0_48, %c0_49], %143 {strides = array<i32>} : memref<16x8x32xf32, #tpu.memory_space<vmem>>, vector<16x8x32xf32>,
    return
  }
  func.func @transform_0(%arg0: i32) -> (i32, i32, i32) {
    %c0_i32 = arith.constant 0 : i32
    %c0_i32_0 = arith.constant 0 : i32
    %c0_i32_1 = arith.constant 0 : i32
    return %arg0, %c0_i32, %c0_i32_0 : i32, i32, i32
  }
  func.func @transform_1(%arg0: i32) -> (i32, i32) {
    %c0_i32 = arith.constant 0 : i32
    %c0_i32_0 = arith.constant 0 : i32
    %c0_i32_1 = arith.constant 0 : i32
    return %c0_i32, %c0_i32_0 : i32, i32
  }
  func.func @transform_2(%arg0: i32) -> (i32, i32) {
    %c0_i32 = arith.constant 0 : i32
    %c0_i32_0 = arith.constant 0 : i32
    %c0_i32_1 = arith.constant 0 : i32
    return %c0_i32, %c0_i32_0 : i32, i32
  }
  func.func @transform_3(%arg0: i32) -> (i32, i32) {
    %c0_i32 = arith.constant 0 : i32
    %c0_i32_0 = arith.constant 0 : i32
    %c0_i32_1 = arith.constant 0 : i32
    return %c0_i32, %c0_i32_0 : i32, i32
  }
  func.func @transform_4(%arg0: i32) -> (i32, i32, i32) {
    %c0_i32 = arith.constant 0 : i32
    %c0_i32_0 = arith.constant 0 : i32
    %c0_i32_1 = arith.constant 0 : i32
    %c0_i32_2 = arith.constant 0 : i32
    return %c0_i32, %c0_i32_0, %c0_i32_1 : i32, i32, i32
  }
  func.func @transform_5(%arg0: i32) -> (i32, i32) {
    %c0_i32 = arith.constant 0 : i32
    %c0_i32_0 = arith.constant 0 : i32
    %c0_i32_1 = arith.constant 0 : i32
    return %c0_i32, %c0_i32_0 : i32, i32
  }
  func.func @transform_6(%arg0: i32) -> (i32, i32) {
    %c0_i32 = arith.constant 0 : i32
    %c0_i32_0 = arith.constant 0 : i32
    %c0_i32_1 = arith.constant 0 : i32
    return %c0_i32, %c0_i32_0 : i32, i32
  }
  func.func @transform_7(%arg0: i32) -> (i32, i32, i32) {
    %c0_i32 = arith.constant 0 : i32
    %c0_i32_0 = arith.constant 0 : i32
    %c0_i32_1 = arith.constant 0 : i32
    return %arg0, %c0_i32, %c0_i32_0 : i32, i32, i32
  }
}

</mosaic_0001>

<bundles_post_ra>
// kernel: tpu_custom_call.1
= control target key start
LH: loop header
LB: loop body
LE: loop exit
PB: predicated region body
PF: predicated region fallthrough
CT: control target
= control target key end

     0   :  { %12 = vsyncpa [#allocation3], 0  ;;  %s5408_s0 = inlined_call_operand.hbm [shape: f32[16,8,32], index: 0, kind: input, shape index: {}]   ;;  %s5409_s1 = inlined_call_operand.hbm [shape: f32[1,32], index: 1, kind: input, shape index: {}]   ;;  %s5410_s2 = inlined_call_operand.vmem [shape: f32[1,32], index: 2, kind: input, shape index: {}]   ;;  %s5411_s3 = inlined_call_operand.hbm [shape: bf16[32,192], index: 3, kind: input, shape index: {}]   ;;  %s5412_s4 = inlined_call_operand.hbm [shape: bf16[4,16,32], index: 4, kind: input, shape index: {}]   ;;  %s5413_s5 = inlined_call_operand.vmem [shape: f32[1,32], index: 5, kind: input, shape index: {}]   ;;  %s5414_s6 = inlined_call_operand.hbm [shape: f32[128,128], index: 6, kind: input, shape index: {}]   ;;  %s5415_s7 = inlined_call_operand.hbm [shape: f32[16,8,32], index: 7, kind: output, shape index: {}]  }
   0x1   :  { %13 = vsyncpa [#allocation6], 0 }
   0x2   :  { %14 = vsyncpa [#allocation9], 0  ;;  %s34_s26 = sshll.u32 %s5409_s1, 4  ;;  %s35_s26 = int_to_ptr.hbm [resolvable:$true] %s34_s26 }
   0x3   :  { %15 = vsyncpa [#allocation4], 0  ;;  %s3613_s27 = smov [#allocation5]   ;;  %s59_s8 = sshll.u32 %s5412_s4, 4  ;;  %s60_s8 = int_to_ptr.hbm [resolvable:$true] %s59_s8 }
   0x4   :  { %s36_s28 = sshll.u32 %s3613_s27, 4  ;;  %s3614_s9 = smov [#allocation8]   ;;  %s37_s28 = int_to_ptr.vmem [resolvable:$true] %s36_s28 }
   0x5   :  { %39 = dma.hbm_to_vmem [thread:$0]  %s35_s26, 16, %s37_s28, [#allocation6]  }
   0x6   :  { %s61_s10 = sshll.u32 %s3614_s9, 4  ;;  %s3615_s11 = smov 64   ;;  %s62_s10 = int_to_ptr.vmem [resolvable:$true] %s61_s10 }
   0x7   :  { %s3616_s12 = smov 4   ;;  %s20_s14 = sshll.u32 %s5408_s0, 4  ;;  %s21_s14 = int_to_ptr.hbm [resolvable:$true] %s20_s14 }
   0x8   :  { %67 = dma.hbm_to_vmem [thread:$0]  %s60_s8, 512, %s62_s10, [#allocation9], %s3615_s11, %s3615_s11, %s3616_s12  }
   0x9   :  { %s3617_s15 = smov [#allocation2]   ;;  %s46_s18 = sshll.u32 %s5411_s3, 4  ;;  %s47_s18 = int_to_ptr.hbm [resolvable:$true] %s46_s18 }
   0xa   :  { %s22_s16 = sshll.u32 %s3617_s15, 4  ;;  %s3618_s19 = smov 128   ;;  %s23_s16 = int_to_ptr.vmem [resolvable:$true] %s22_s16 }
   0xb   :  { %s3619_s20 = smov 8   ;;  %s3620_s21 = smov [#allocation7]  }
   0xc   :  { %28 = dma.hbm_to_vmem [thread:$0]  %s21_s14, 2048, %s23_s16, [#allocation3], %s3618_s19, %s3618_s19, %s3619_s20  }
   0xd   :  { %s48_s22 = sshll.u32 %s3620_s21, 4  ;;  %s74_s0 = sshll.u32 %s5414_s6, 4  ;;  %s49_s22 = int_to_ptr.vmem [resolvable:$true] %s48_s22  ;;  %s75_s0 = int_to_ptr.hbm [resolvable:$true] %s74_s0 }
   0xe   :  { %54 = dma.hbm_to_vmem [thread:$0]  %s47_s18, 512, %s49_s22, [#allocation6], %s3618_s19, %s3618_s19, %s3619_s20  }
   0xf   :  { %s3621_s3 = smov [#allocation10]  }
  0x10   :  { %s76_s25 = sshll.u32 %s3621_s3, 4  ;;  %s77_s25 = int_to_ptr.vmem [resolvable:$true] %s76_s25 }
  0x11   :  { %82 = dma.hbm_to_vmem [thread:$0]  %s75_s0, 2048, %s77_s25, [#allocation9], %s3618_s19, %s3618_s19, %s3619_s20  }
  0x12   :  { %3605 = dma.done.wait [#allocation3], 2048  }
  0x13   :  { %3606 = vsyncadd [#allocation3], 4294965248 }
  0x14   :  { %3607 = dma.done.wait [#allocation6], 528  }
  0x15   :  { %3608 = vsyncadd [#allocation6], 4294966768 }
  0x16   :  { %3609 = dma.done.wait [#allocation9], 2560  }
  0x17   :  { %3610 = vsyncadd [#allocation9], 4294964736  ;;  %vm120_vm0 = vcmask 261120   ;;  %v3696_v0 = vld [vmem:[#allocation2 + $0x60] sm:$0xff]  ;;  %v114_v4 = vld [vmem:[#allocation2 + $0x50] sm:$0xff]  ;;  %v3622_v20 = vmov 32.0  }
  0x18   :  { %v112_v1 = vld [vmem:[#allocation2 + $0x40] sm:$0xff]  ;;  %v157_v2 = vsel %vm120_vm0, %v3696_v0, 0.0  ;;  %v151_v5 = vsel %vm120_vm0, %v114_v4, 0.0  ;;  %v117_v6 = vld [vmem:[#allocation2 + $0x68] sm:$0xff]  ;;  %v3702_v8 = vld [vmem:[#allocation2 + $0x58] sm:$0xff]  ;;  %3155 = vrcp.f32 %v3622_v20  ;;  %s3624_s27 = smov 112  }
  0x19   :  { %v145_v3 = vsel %vm120_vm0, %v112_v1, 0.0  ;;  %158 = vadd.xlane.f32.xlu2 %v157_v2  ;;  %152 = vadd.xlane.f32.xlu1 %v151_v5  ;;  %v113_v7 = vld [vmem:[#allocation2 + $0x48] sm:$0xff]  ;;  %v160_v9 = vsel %vm120_vm0, %v117_v6, 0.0  ;;  %v154_v11 = vsel %vm120_vm0, %v3702_v8, 0.0  ;;  %v3708_v12 = vld [vmem:[#allocation2] sm:$0xff]  ;;  %v3716_v16 = vld [vmem:[#allocation2 + $0x70] sm:$0xff] }
  0x1a   :  { %146 = vadd.xlane.f32.xlu0 %v145_v3  ;;  %v148_v10 = vsel %vm120_vm0, %v113_v7, 0.0  ;;  %v3710_v13 = vld [vmem:[#allocation2 + $0x8] sm:$0xff]  ;;  %v121_v14 = vsel %vm120_vm0, %v3708_v12, 0.0  ;;  %v163_v17 = vsel %vm120_vm0, %v3716_v16, 0.0  ;;  %v3720_v18 = vld [vmem:[#allocation2 + $0x18] sm:$0xff]  ;;  %v3724_v21 = vld [vmem:[#allocation2 + $0x20] sm:$0xff] }
  0x1b   :  { %v124_v15 = vsel %vm120_vm0, %v3710_v13, 0.0  ;;  %v130_v19 = vsel %vm120_vm0, %v3720_v18, 0.0  ;;  %v133_v22 = vsel %vm120_vm0, %v3724_v21, 0.0  ;;  %v3739_v41 = vld [vmem:[#allocation2 + $0x78] sm:$0xff]  ;;  %v3758_v53 = vld [vmem:[#allocation2 + $0x30] sm:$0xff]  ;;  %v3772_v62 = vld [vmem:[#allocation2 + $0x28] sm:$0xff] }
  0x1c   :  { %v166_v45 = vsel %vm120_vm0, %v3739_v41, 0.0  ;;  %v3760_v54 = vld [vmem:[#allocation2 + $0x10] sm:$0xff]  ;;  %v139_v56 = vsel %vm120_vm0, %v3758_v53, 0.0  ;;  %v136_v2 = vsel %vm120_vm0, %v3772_v62, 0.0  ;;  %s3625_s28 = smov 32   ;;  %s3626_s29 = smov 16  }
  0x1d   :  { %v127_v58 = vsel %vm120_vm0, %v3760_v54, 0.0  ;;  %s3627_s30 = smov 80   ;;  %s3628_s8 = smov 96  }
  0x1e   :  { %v3156_v23 = vpop.eup %3155  ;;  %s2996_s13 = sshll.u32 %s5415_s7, 4  ;;  %s2997_s13 = int_to_ptr.hbm [resolvable:$true] %s2996_s13 }
  0x1f   :  { %v170_v24 = vmul.f32 32.0, %v3156_v23  ;;  %vm174_vm1 = vweird.f32 %v3156_v23 }
  0x21   :  { %161 = vadd.xlane.f32.xlu2 %v160_v9  ;;  %155 = vadd.xlane.f32.xlu1 %v154_v11  ;;  %v171_v25 = vsub.f32 1.0, %v170_v24 }
  0x22   :  { %149 = vadd.xlane.f32.xlu0 %v148_v10 }
  0x23   :  { %v172_v26 = vmul.f32 %v3156_v23, %v171_v25 }
  0x25   :  { %v173_v27 = vadd.f32 %v3156_v23, %v172_v26 }
  0x27   :  { %v3728_v28 = vsel %vm174_vm1, %v3156_v23, %v173_v27 }
  0x29   :  { %125 = vadd.xlane.f32.xlu1 %v124_v15  ;;  %v3798_v15 = vld [vmem:[#allocation2 + $0x38] sm:$0xff] }
  0x2a   :  { %122 = vadd.xlane.f32.xlu0 %v121_v14 }
  0x31   :  { %164 = vadd.xlane.f32.xlu1 %v163_v17  ;;  %v142_v17 = vsel %vm120_vm0, %v3798_v15, 0.0 }
  0x39   :  { %131 = vadd.xlane.f32.xlu1 %v130_v19 }
  0x41   :  { %134 = vadd.xlane.f32.xlu1 %v133_v22 }
  0x8c   :  { %v159_v29 = vpop.xlane.xlu2 %158  ;;  %v153_v34 = vpop.xlane.xlu1 %152 }
  0x8d   :  { %v147_v30 = vpop.xlane.xlu0 %146  ;;  %v186_v40 = vmul.f32 %v3728_v28, %v153_v34  ;;  %v188_v61 = vmul.f32 %v3728_v28, %v159_v29  ;;  %v3021_v29 = vld [vmem:[#allocation7 + $0x10] sm:$0xf]  ;;  %v3023_v34 = vld [vmem:[#allocation7 + $0x18] sm:$0xf0] }
  0x8e   :  { %v184_v31 = vmul.f32 %v3728_v28, %v147_v30  ;;  %v3126_v30 = vld [vmem:[#allocation7 + $0x14] sm:$0xf0] }
  0x8f   :  { %v3745_v44 = vsub.f32 %v114_v4, %v186_v40  ;;  %v3782_v4 = vsub.f32 %v3696_v0, %v188_v61 }
  0x90   :  { %v3731_v32 = vsub.f32 %v112_v1, %v184_v31  ;;  %v3125_v31 = vld [vmem:[#allocation7 + $0x14] sm:$0xf] }
  0x91   :  { %v218_v51 = vmul.f32 %v3745_v44, %v3745_v44 }
  0x92   :  { %v216_v33 = vmul.f32 %v3731_v32, %v3731_v32 }
  0x93   :  { %v254_v55 = vsel %vm120_vm0, %v218_v51, 0.0 }
  0x94   :  { %v248_v35 = vsel %vm120_vm0, %v216_v33, 0.0  ;;  %v162_v36 = vpop.xlane.xlu2 %161  ;;  %v156_v50 = vpop.xlane.xlu1 %155  ;;  %v3022_v33 = vor.u32 %v3126_v30, %v3021_v29 }
  0x95   :  { %249 = vadd.xlane.f32.xlu2 %v248_v35  ;;  %v150_v37 = vpop.xlane.xlu0 %149  ;;  %v189_v38 = vmul.f32 %v3728_v28, %v162_v36  ;;  %v187_v52 = vmul.f32 %v3728_v28, %v156_v50  ;;  %v3026_v36 = vor.u32 %v3125_v31, %v3023_v34 }
  0x96   :  { %v185_v39 = vmul.f32 %v3728_v28, %v150_v37  ;;  %3131 = vmatpush.bf16.msra.mxu3 %v3022_v33  ;;  %582 = vmatpush.bf16.msra.mxu0 %v3022_v33  ;;  %v3013_v37 = vld [vmem:[#allocation7] sm:$0xf] }
  0x97   :  { %v3741_v42 = vsub.f32 %v117_v6, %v189_v38  ;;  %v3766_v57 = vsub.f32 %v3702_v8, %v187_v52  ;;  %v220_v8 = vmul.f32 %v3782_v4, %v3782_v4  ;;  %3133 = vmatpush.bf16.msra.mxu2 %v3026_v36  ;;  %v3124_v38 = vld [vmem:[#allocation7 + $0x4] sm:$0xf0]  ;;  %631 = vmatpush.bf16.msra.mxu1 %v3026_v36 }
  0x98   :  { %v3743_v43 = vsub.f32 %v113_v7, %v185_v39  ;;  %v3123_v39 = vld [vmem:[#allocation7 + $0x4] sm:$0xf] }
  0x99   :  { %v221_v46 = vmul.f32 %v3741_v42, %v3741_v42  ;;  %v219_v63 = vmul.f32 %v3766_v57, %v3766_v57  ;;  %v260_v0 = vsel %vm120_vm0, %v220_v8, 0.0 }
  0x9a   :  { %v217_v47 = vmul.f32 %v3743_v43, %v3743_v43 }
  0x9b   :  { %v263_v48 = vsel %vm120_vm0, %v221_v46, 0.0  ;;  %v257_v5 = vsel %vm120_vm0, %v219_v63, 0.0  ;;  %v3015_v46 = vld [vmem:[#allocation7 + $0x8] sm:$0xf0] }
  0x9c   :  { %v251_v49 = vsel %vm120_vm0, %v217_v47, 0.0  ;;  %264 = vadd.xlane.f32.xlu1 %v263_v48  ;;  %v126_v1 = vpop.xlane.xlu1 %125  ;;  %v3018_v47 = vor.u32 %v3123_v39, %v3015_v46 }
  0x9d   :  { %167 = vadd.xlane.f32.xlu2 %v166_v45  ;;  %252 = vadd.xlane.f32.xlu0 %v251_v49  ;;  %v123_v59 = vpop.xlane.xlu0 %122  ;;  %v177_v7 = vmul.f32 %v3728_v28, %v126_v1  ;;  %v3014_v45 = vor.u32 %v3124_v38, %v3013_v37 }
  0x9e   :  { %v176_v60 = vmul.f32 %v3728_v28, %v123_v59  ;;  %3134 = vmatpush.bf16.msra.mxu2 %v3018_v47  ;;  %632 = vmatpush.bf16.msra.mxu1 %v3018_v47  ;;  %v3870_v47 = vld [vmem:[#allocation5] ss:$0 sm:$0xff] }
  0x9f   :  { %v3792_v11 = vsub.f32 %v3710_v13, %v177_v7  ;;  %3132 = vmatpush.bf16.msra.mxu3 %v3014_v45  ;;  %583 = vmatpush.bf16.msra.mxu0 %v3014_v45 }
  0xa0   :  { %v3779_v3 = vsub.f32 %v3708_v12, %v176_v60 }
  0xa1   :  { %v209_v14 = vmul.f32 %v3792_v11, %v3792_v11 }
  0xa2   :  { %v208_v6 = vmul.f32 %v3779_v3, %v3779_v3 }
  0xa3   :  { %v227_v13 = vsel %vm120_vm0, %v209_v14, 0.0 }
  0xa4   :  { %140 = vadd.xlane.f32.xlu1 %v139_v56  ;;  %v224_v9 = vsel %vm120_vm0, %v208_v6, 0.0  ;;  %v165_v10 = vpop.xlane.xlu1 %164 }
  0xa5   :  { %255 = vadd.xlane.f32.xlu2 %v254_v55  ;;  %128 = vadd.xlane.f32.xlu0 %v127_v58  ;;  %v190_v12 = vmul.f32 %v3728_v28, %v165_v10 }
  0xa7   :  { %v3803_v19 = vsub.f32 %v3716_v16, %v190_v12 }
  0xa9   :  { %v222_v23 = vmul.f32 %v3803_v19, %v3803_v19 }
  0xab   :  { %v266_v25 = vsel %vm120_vm0, %v222_v23, 0.0 }
  0xac   :  { %v132_v20 = vpop.xlane.xlu1 %131 }
  0xad   :  { %137 = vadd.xlane.f32.xlu2 %v136_v2  ;;  %258 = vadd.xlane.f32.xlu0 %v257_v5  ;;  %v179_v22 = vmul.f32 %v3728_v28, %v132_v20 }
  0xaf   :  { %v3810_v24 = vsub.f32 %v3720_v18, %v179_v22 }
  0xb1   :  { %v211_v16 = vmul.f32 %v3810_v24, %v3810_v24 }
  0xb3   :  { %v233_v26 = vsel %vm120_vm0, %v211_v16, 0.0 }
  0xb4   :  { %v135_v27 = vpop.xlane.xlu1 %134 }
  0xb5   :  { %225 = vadd.xlane.f32.xlu2 %v224_v9  ;;  %261 = vadd.xlane.f32.xlu0 %v260_v0  ;;  %v180_v48 = vmul.f32 %v3728_v28, %v135_v27 }
  0xb7   :  { %v3824_v60 = vsub.f32 %v3724_v21, %v180_v48 }
  0xbd   :  { %143 = vadd.xlane.f32.xlu2 %v142_v17  ;;  %228 = vadd.xlane.f32.xlu0 %v227_v13 }
  0xc5   :  { %267 = vadd.xlane.f32.xlu0 %v266_v25 }
  0xcd   :  { %234 = vadd.xlane.f32.xlu0 %v233_v26 }
 0x108   :  { %v250_v35 = vpop.xlane.xlu2 %249 }
 0x109   :  { %v280_v18 = vmul.f32 %v250_v35, %v3728_v28 }
 0x10b   :  { %v296_v40 = vadd.f32 1e-05, %v280_v18 }
 0x10d   :  { %3157 = vrsqrt.f32 %v296_v40  ;;  %vm390_vm3 = vweird.f32 %v296_v40 }
 0x10f   :  { %v265_v50 = vpop.xlane.xlu1 %264 }
 0x110   :  { %v168_v49 = vpop.xlane.xlu2 %167  ;;  %v253_v52 = vpop.xlane.xlu0 %252  ;;  %v285_v12 = vmul.f32 %v265_v50, %v3728_v28 }
 0x111   :  { %v191_v51 = vmul.f32 %v3728_v28, %v168_v49  ;;  %v281_v55 = vmul.f32 %v253_v52, %v3728_v28 }
 0x113   :  { %v3158_v56 = vpop.eup %3157  ;;  %v3821_v58 = vsub.f32 %v3739_v41, %v191_v51  ;;  %v297_v61 = vadd.f32 1e-05, %v281_v55  ;;  %v212_v41 = vmul.f32 %v3824_v60, %v3824_v60 }
 0x114   :  { %v385_v59 = vmul.f32 %v3158_v56, %v296_v40  ;;  %vm391_vm2 = vweird.f32 %v3158_v56 }
 0x115   :  { %v223_v63 = vmul.f32 %v3821_v58, %v3821_v58  ;;  %3159 = vrsqrt.f32 %v297_v61  ;;  %v236_v22 = vsel %vm120_vm0, %v212_v41, 0.0  ;;  %vm3851_vm4 = vmor %vm390_vm3, %vm391_vm2  ;;  %vm400_vm6 = vweird.f32 %v297_v61 }
 0x116   :  { %v386_v1 = vmul.f32 %v3158_v56, %v385_v59  ;;  %v3881_v59 = vld [vmem:[%s5410_s2] ss:$0 sm:$0xff]  ;;  %s3623_s2 = smov 48  }
 0x117   :  { %v269_v2 = vsel %vm120_vm0, %v223_v63, 0.0  ;;  %v141_v7 = vpop.xlane.xlu1 %140 }
 0x118   :  { %v387_v5 = vmul.f32 0.5, %v386_v1  ;;  %v256_v6 = vpop.xlane.xlu2 %255  ;;  %270 = vadd.xlane.f32.xlu1 %v269_v2  ;;  %v182_v21 = vmul.f32 %v3728_v28, %v141_v7  ;;  %v129_v9 = vpop.xlane.xlu0 %128 }
 0x119   :  { %v282_v8 = vmul.f32 %v256_v6, %v3728_v28  ;;  %v178_v0 = vmul.f32 %v3728_v28, %v129_v9 }
 0x11a   :  { %v388_v10 = vsub.f32 1.5, %v387_v5  ;;  %v3838_v17 = vsub.f32 %v3758_v53, %v182_v21  ;;  %v3849_v53 = vadd.f32 1e-05, %v285_v12 }
 0x11b   :  { %v3835_v14 = vadd.f32 1e-05, %v282_v8  ;;  %v3160_v13 = vpop.eup %3159  ;;  %v3841_v20 = vsub.f32 %v3760_v54, %v178_v0 }
 0x11c   :  { %v389_v23 = vmul.f32 %v3158_v56, %v388_v10  ;;  %v395_v25 = vmul.f32 %v3160_v13, %v297_v61  ;;  %v214_v16 = vmul.f32 %v3838_v17, %v3838_v17  ;;  %vm401_vm5 = vweird.f32 %v3160_v13 }
 0x11d   :  { %3161 = vrsqrt.f32 %v3835_v14  ;;  %v210_v26 = vmul.f32 %v3841_v20, %v3841_v20  ;;  %vm402_vm7 = vmor %vm400_vm6, %vm401_vm5  ;;  %vm410_vm8 = vweird.f32 %v3835_v14  ;;  %vm440_vm1 = vweird.f32 %v3849_v53 }
 0x11e   :  { %v396_v27 = vmul.f32 %v3160_v13, %v395_v25  ;;  %v242_v30 = vsel %vm120_vm0, %v214_v16, 0.0  ;;  %v393_v33 = vsel %vm3851_vm4, %v3158_v56, %v389_v23  ;;  %3163 = vrsqrt.f32 %v3849_v53 }
 0x11f   :  { %v230_v31 = vsel %vm120_vm0, %v210_v26, 0.0  ;;  %243 = vadd.xlane.f32.xlu0 %v242_v30  ;;  %v472_v46 = vmul.f32 %v393_v33, %v3731_v32 }
 0x120   :  { %v138_v29 = vpop.xlane.xlu2 %137  ;;  %237 = vadd.xlane.f32.xlu1 %v236_v22  ;;  %v397_v34 = vmul.f32 0.5, %v396_v27  ;;  %231 = vadd.xlane.f32.xlu2 %v230_v31  ;;  %v259_v36 = vpop.xlane.xlu0 %258 }
 0x121   :  { %v181_v35 = vmul.f32 %v3728_v28, %v138_v29  ;;  %v283_v18 = vmul.f32 %v259_v36, %v3728_v28  ;;  %v492_v32 = vmul.f32 %v3870_v47, %v472_v46 }
 0x122   :  { %v398_v38 = vsub.f32 1.5, %v397_v34 }
 0x123   :  { %v3861_v37 = vpop.eup %3161  ;;  %v3865_v39 = vsub.f32 %v3772_v62, %v181_v35  ;;  %v299_v45 = vadd.f32 1e-05, %v283_v18  ;;  %v512_v21 = vadd.f32 %v3881_v59, %v492_v32 }
 0x124   :  { %v405_v40 = vmul.f32 %v3861_v37, %v3835_v14  ;;  %v399_v48 = vmul.f32 %v3160_v13, %v398_v38  ;;  %v3883_v61 = vpop.eup %3163  ;;  %vm411_vm9 = vweird.f32 %v3861_v37 }
 0x125   :  { %v213_v49 = vmul.f32 %v3865_v39, %v3865_v39  ;;  %3165 = vrsqrt.f32 %v299_v45  ;;  %v435_v41 = vmul.f32 %v3883_v61, %v3849_v53  ;;  %vm3898_vm10 = vmor %vm410_vm8, %vm411_vm9  ;;  %vm420_vm11 = vweird.f32 %v299_v45 }
 0x126   :  { %v406_v50 = vmul.f32 %v3861_v37, %v405_v40  ;;  %v403_v51 = vsel %vm402_vm7, %v3160_v13, %v399_v48  ;;  %vm441_vm2 = vweird.f32 %v3883_v61 }
 0x127   :  { %v239_v62 = vsel %vm120_vm0, %v213_v49, 0.0  ;;  %v473_v56 = vmul.f32 %v403_v51, %v3743_v43  ;;  %v436_v22 = vmul.f32 %v3883_v61, %v435_v41  ;;  %vm3932_vm6 = vmor %vm440_vm1, %vm441_vm2 }
 0x128   :  { %v407_v52 = vmul.f32 0.5, %v406_v50  ;;  %v226_v55 = vpop.xlane.xlu2 %225  ;;  %240 = vadd.xlane.f32.xlu2 %v239_v62  ;;  %v262_v1 = vpop.xlane.xlu0 %261 }
 0x129   :  { %v272_v63 = vmul.f32 %v226_v55, %v3728_v28  ;;  %v284_v5 = vmul.f32 %v262_v1, %v3728_v28  ;;  %v493_v6 = vmul.f32 %v3870_v47, %v473_v56  ;;  %v437_v34 = vmul.f32 0.5, %v436_v22 }
 0x12a   :  { %v408_v2 = vsub.f32 1.5, %v407_v52 }
 0x12b   :  { %v3890_v43 = vadd.f32 1e-05, %v272_v63  ;;  %v3166_v7 = vpop.eup %3165  ;;  %v300_v8 = vadd.f32 1e-05, %v284_v5  ;;  %v513_v9 = vadd.f32 %v3881_v59, %v493_v6  ;;  %v438_v50 = vsub.f32 1.5, %v437_v34 }
 0x12c   :  { %v409_v10 = vmul.f32 %v3861_v37, %v408_v2  ;;  %v415_v0 = vmul.f32 %v3166_v7, %v299_v45  ;;  %vm421_vm12 = vweird.f32 %v3166_v7 }
 0x12d   :  { %3167 = vrsqrt.f32 %v3890_v43  ;;  %v524_v14 = vpack.c.bf16 %v513_v9, %v512_v21  ;;  %vm422_vm13 = vmor %vm420_vm11, %vm421_vm12  ;;  %vm430_vm14 = vweird.f32 %v300_v8  ;;  %vm310_vm3 = vweird.f32 %v3890_v43 }
 0x12e   :  { %3169 = vrsqrt.f32 %v300_v8  ;;  %v416_v13 = vmul.f32 %v3166_v7, %v415_v0  ;;  %v413_v25 = vsel %vm3898_vm10, %v3861_v37, %v409_v10  ;;  %v439_v63 = vmul.f32 %v3883_v61, %v438_v50 }
 0x12f   :  { %3031 = vmatmul.msk.bf16.vlgmr.msra.gmra.mxu3 %vm120_vm0, %v524_v14  ;;  %3039 = vmatmul.msk.bf16.vlgmr.msra.gmra.mxu2 %vm120_vm0, %v524_v14  ;;  %v474_v18 = vmul.f32 %v413_v25, %v3745_v44 }
 0x130   :  { %v144_v23 = vpop.xlane.xlu2 %143  ;;  %v417_v16 = vmul.f32 0.5, %v416_v13  ;;  %v229_v27 = vpop.xlane.xlu0 %228  ;;  %v443_v21 = vsel %vm3932_vm6, %v3883_v61, %v439_v63 }
 0x131   :  { %v183_v26 = vmul.f32 %v3728_v28, %v144_v23  ;;  %v273_v54 = vmul.f32 %v229_v27, %v3728_v28  ;;  %v494_v62 = vmul.f32 %v3870_v47, %v474_v18  ;;  %v477_v13 = vmul.f32 %v443_v21, %v3741_v42 }
 0x132   :  { %v418_v30 = vsub.f32 1.5, %v417_v16 }
 0x133   :  { %v3168_v29 = vpop.eup %3167  ;;  %v3911_v31 = vsub.f32 %v3798_v15, %v183_v26  ;;  %v289_v36 = vadd.f32 1e-05, %v273_v54  ;;  %v514_v1 = vadd.f32 %v3881_v59, %v494_v62  ;;  %v497_v26 = vmul.f32 %v3870_v47, %v477_v13 }
 0x134   :  { %v3170_v33 = vpop.eup %3169  ;;  %v305_v35 = vmul.f32 %v3168_v29, %v3890_v43  ;;  %v419_v37 = vmul.f32 %v3166_v7, %v418_v30  ;;  %vm311_vm4 = vweird.f32 %v3168_v29 }
 0x135   :  { %v425_v38 = vmul.f32 %v3170_v33, %v300_v8  ;;  %v215_v40 = vmul.f32 %v3911_v31, %v3911_v31  ;;  %3171 = vrsqrt.f32 %v289_v36  ;;  %vm431_vm15 = vweird.f32 %v3170_v33  ;;  %vm312_vm7 = vmor %vm310_vm3, %vm311_vm4 }
 0x136   :  { %v306_v46 = vmul.f32 %v3168_v29, %v305_v35  ;;  %v423_v48 = vsel %vm422_vm13, %v3166_v7, %v419_v37  ;;  %vm3926_vm5 = vmor %vm430_vm14, %vm431_vm15  ;;  %vm320_vm8 = vweird.f32 %v289_v36  ;;  %v517_v42 = vadd.f32 %v3881_v59, %v497_v26 }
 0x137   :  { %v426_v49 = vmul.f32 %v3170_v33, %v425_v38  ;;  %v245_v15 = vsel %vm120_vm0, %v215_v40, 0.0  ;;  %v475_v45 = vmul.f32 %v423_v48, %v3766_v57 }
 0x138   :  { %v307_v51 = vmul.f32 0.5, %v306_v46  ;;  %246 = vadd.xlane.f32.xlu1 %v245_v15 }
 0x139   :  { %v427_v52 = vmul.f32 0.5, %v426_v49  ;;  %v495_v55 = vmul.f32 %v3870_v47, %v475_v45 }
 0x13a   :  { %v308_v44 = vsub.f32 1.5, %v307_v51 }
 0x13b   :  { %v428_v56 = vsub.f32 1.5, %v427_v52  ;;  %v3172_v32 = vpop.eup %3171  ;;  %v515_v53 = vadd.f32 %v3881_v59, %v495_v55 }
 0x13c   :  { %v309_v5 = vmul.f32 %v3168_v29, %v308_v44  ;;  %v315_v43 = vmul.f32 %v3172_v32, %v289_v36  ;;  %vm321_vm9 = vweird.f32 %v3172_v32 }
 0x13d   :  { %v429_v6 = vmul.f32 %v3170_v33, %v428_v56  ;;  %v525_v7 = vpack.c.bf16 %v515_v53, %v514_v1  ;;  %vm322_vm10 = vmor %vm320_vm8, %vm321_vm9 }
 0x13e   :  { %v316_v8 = vmul.f32 %v3172_v32, %v315_v43  ;;  %v313_v9 = vsel %vm312_vm7, %v3168_v29, %v309_v5 }
 0x13f   :  { %v433_v41 = vsel %vm3926_vm5, %v3170_v33, %v429_v6  ;;  %3032 = vmatmul.msk.bf16.gmra.mxu3 %vm120_vm0, %v525_v7  ;;  %3040 = vmatmul.msk.bf16.gmra.mxu2 %vm120_vm0, %v525_v7  ;;  %v464_v14 = vmul.f32 %v313_v9, %v3779_v3 }
 0x140   :  { %v317_v10 = vmul.f32 0.5, %v316_v8  ;;  %v476_v0 = vmul.f32 %v433_v41, %v3782_v4 }
 0x141   :  { %v484_v16 = vmul.f32 %v3870_v47, %v464_v14 }
 0x142   :  { %v318_v12 = vsub.f32 1.5, %v317_v10  ;;  %v496_v23 = vmul.f32 %v3870_v47, %v476_v0 }
 0x143   :  { %v504_v54 = vadd.f32 %v3881_v59, %v484_v16 }
 0x144   :  { %v319_v22 = vmul.f32 %v3172_v32, %v318_v12  ;;  %v516_v4 = vadd.f32 %v3881_v59, %v496_v23 }
 0x146   :  { %v323_v61 = vsel %vm322_vm10, %v3172_v32, %v319_v22  ;;  %v526_v30 = vpack.c.bf16 %v517_v42, %v516_v4 }
 0x147   :  { %v465_v25 = vmul.f32 %v323_v61, %v3792_v11  ;;  %v268_v11 = vpop.xlane.xlu0 %267 }
 0x148   :  { %v286_v33 = vmul.f32 %v268_v11, %v3728_v28 }
 0x149   :  { %v485_v27 = vmul.f32 %v3870_v47, %v465_v25 }
 0x14a   :  { %v302_v34 = vadd.f32 1e-05, %v286_v33 }
 0x14b   :  { %v505_v3 = vadd.f32 %v3881_v59, %v485_v27 }
 0x14c   :  { %3173 = vrsqrt.f32 %v302_v34  ;;  %vm450_vm11 = vweird.f32 %v302_v34 }
 0x14d   :  { %v520_v29 = vpack.c.bf16 %v505_v3, %v504_v54 }
 0x14f   :  { %3027 = vmatmul.msk.bf16.vlgmr.msra.gmra.mxu0 %vm120_vm0, %v520_v29  ;;  %3033 = vmatmul.msk.bf16.gmra.mxu3 %vm120_vm0, %v526_v30  ;;  %v235_v35 = vpop.xlane.xlu0 %234 }
 0x150   :  { %3035 = vmatmul.msk.bf16.vlgmr.msra.gmra.mxu1 %vm120_vm0, %v520_v29  ;;  %3041 = vmatmul.msk.bf16.gmra.mxu2 %vm120_vm0, %v526_v30  ;;  %v275_v36 = vmul.f32 %v235_v35, %v3728_v28 }
 0x152   :  { %v291_v18 = vadd.f32 1e-05, %v275_v36  ;;  %v3174_v37 = vpop.eup %3173 }
 0x153   :  { %v445_v38 = vmul.f32 %v3174_v37, %v302_v34  ;;  %vm451_vm12 = vweird.f32 %v3174_v37 }
 0x154   :  { %3175 = vrsqrt.f32 %v291_v18  ;;  %vm3966_vm13 = vmor %vm450_vm11, %vm451_vm12  ;;  %vm340_vm1 = vweird.f32 %v291_v18 }
 0x155   :  { %v446_v40 = vmul.f32 %v3174_v37, %v445_v38 }
 0x157   :  { %v447_v50 = vmul.f32 0.5, %v446_v40 }
 0x159   :  { %v448_v45 = vsub.f32 1.5, %v447_v50 }
 0x15a   :  { %v3176_v49 = vpop.eup %3175 }
 0x15b   :  { %v335_v51 = vmul.f32 %v3176_v49, %v291_v18  ;;  %v449_v57 = vmul.f32 %v3174_v37, %v448_v45  ;;  %vm341_vm2 = vweird.f32 %v3176_v49 }
 0x15c   :  { %vm3980_vm4 = vmor %vm340_vm1, %vm341_vm2 }
 0x15d   :  { %v336_v52 = vmul.f32 %v3176_v49, %v335_v51  ;;  %v453_v43 = vsel %vm3966_vm13, %v3174_v37, %v449_v57 }
 0x15e   :  { %v478_v12 = vmul.f32 %v453_v43, %v3803_v19 }
 0x15f   :  { %v337_v5 = vmul.f32 0.5, %v336_v52 }
 0x160   :  { %v498_v19 = vmul.f32 %v3870_v47, %v478_v12 }
 0x161   :  { %v338_v41 = vsub.f32 1.5, %v337_v5 }
 0x162   :  { %v518_v34 = vadd.f32 %v3881_v59, %v498_v19 }
 0x163   :  { %v339_v61 = vmul.f32 %v3176_v49, %v338_v41 }
 0x165   :  { %v343_v42 = vsel %vm3980_vm4, %v3176_v49, %v339_v61 }
 0x18b   :  { %v271_v46 = vpop.xlane.xlu1 %270 }
 0x18c   :  { %v287_v48 = vmul.f32 %v271_v46, %v3728_v28 }
 0x18e   :  { %v303_v15 = vadd.f32 1e-05, %v287_v48 }
 0x190   :  { %3177 = vrsqrt.f32 %v303_v15  ;;  %vm460_vm14 = vweird.f32 %v303_v15 }
 0x192   :  { %v244_v8 = vpop.xlane.xlu0 %243 }
 0x193   :  { %v238_v62 = vpop.xlane.xlu1 %237  ;;  %v232_v55 = vpop.xlane.xlu2 %231  ;;  %v278_v22 = vmul.f32 %v244_v8, %v3728_v28 }
 0x194   :  { %v276_v44 = vmul.f32 %v238_v62, %v3728_v28  ;;  %v274_v56 = vmul.f32 %v232_v55, %v3728_v28 }
 0x195   :  { %v3986_v3 = vadd.f32 1e-05, %v278_v22 }
 0x196   :  { %v3178_v32 = vpop.eup %3177  ;;  %v3964_v63 = vadd.f32 1e-05, %v276_v44  ;;  %v290_v53 = vadd.f32 1e-05, %v274_v56 }
 0x197   :  { %v455_v1 = vmul.f32 %v3178_v32, %v303_v15  ;;  %vm461_vm15 = vweird.f32 %v3178_v32  ;;  %vm370_vm1 = vweird.f32 %v3986_v3 }
 0x198   :  { %3179 = vrsqrt.f32 %v3964_v63  ;;  %vm462_vm3 = vmor %vm460_vm14, %vm461_vm15  ;;  %vm330_vm6 = vweird.f32 %v290_v53  ;;  %vm350_vm10 = vweird.f32 %v3964_v63 }
 0x199   :  { %v456_v6 = vmul.f32 %v3178_v32, %v455_v1  ;;  %3181 = vrsqrt.f32 %v290_v53 }
 0x19b   :  { %v457_v7 = vmul.f32 0.5, %v456_v6  ;;  %v241_v21 = vpop.xlane.xlu2 %240 }
 0x19c   :  { %v277_v10 = vmul.f32 %v241_v21, %v3728_v28 }
 0x19d   :  { %v458_v9 = vsub.f32 1.5, %v457_v7 }
 0x19e   :  { %v3974_v0 = vpop.eup %3179  ;;  %v293_v23 = vadd.f32 1e-05, %v277_v10 }
 0x19f   :  { %v3182_v14 = vpop.eup %3181  ;;  %v459_v13 = vmul.f32 %v3178_v32, %v458_v9  ;;  %v345_v25 = vmul.f32 %v3974_v0, %v3964_v63  ;;  %vm351_vm11 = vweird.f32 %v3974_v0 }
 0x1a0   :  { %v325_v16 = vmul.f32 %v3182_v14, %v290_v53  ;;  %3183 = vrsqrt.f32 %v293_v23  ;;  %vm331_vm5 = vweird.f32 %v3182_v14  ;;  %vm360_vm8 = vweird.f32 %v293_v23  ;;  %vm352_vm13 = vmor %vm350_vm10, %vm351_vm11 }
 0x1a1   :  { %v463_v27 = vsel %vm462_vm3, %v3178_v32, %v459_v13  ;;  %v346_v29 = vmul.f32 %v3974_v0, %v345_v25  ;;  %3185 = vrsqrt.f32 %v3986_v3  ;;  %vm332_vm7 = vmor %vm330_vm6, %vm331_vm5  ;;  %vm778_vm5 = vcmask 130048  }
 0x1a2   :  { %v326_v4 = vmul.f32 %v3182_v14, %v325_v16  ;;  %v479_v54 = vmul.f32 %v463_v27, %v3821_v58  ;;  %v467_v58 = vmul.f32 %v343_v42, %v3810_v24 }
 0x1a3   :  { %v347_v18 = vmul.f32 0.5, %v346_v29 }
 0x1a4   :  { %v327_v30 = vmul.f32 0.5, %v326_v4  ;;  %v499_v11 = vmul.f32 %v3870_v47, %v479_v54  ;;  %v487_v50 = vmul.f32 %v3870_v47, %v467_v58 }
 0x1a5   :  { %v348_v51 = vsub.f32 1.5, %v347_v18 }
 0x1a6   :  { %v328_v33 = vsub.f32 1.5, %v327_v30  ;;  %v519_v35 = vadd.f32 %v3881_v59, %v499_v11  ;;  %v3184_v36 = vpop.eup %3183 }
 0x1a7   :  { %v355_v40 = vmul.f32 %v3184_v36, %v293_v23  ;;  %v3186_v45 = vpop.eup %3185  ;;  %vm361_vm9 = vweird.f32 %v3184_v36  ;;  %v349_v32 = vmul.f32 %v3974_v0, %v348_v51 }
 0x1a8   :  { %v329_v37 = vmul.f32 %v3182_v14, %v328_v33  ;;  %v527_v38 = vpack.c.bf16 %v519_v35, %v518_v34  ;;  %vm362_vm12 = vmor %vm360_vm8, %vm361_vm9  ;;  %vm371_vm2 = vweird.f32 %v3186_v45 }
 0x1a9   :  { %v356_v48 = vmul.f32 %v3184_v36, %v355_v40  ;;  %v353_v5 = vsel %vm352_vm13, %v3974_v0, %v349_v32  ;;  %vm372_vm4 = vmor %vm370_vm1, %vm371_vm2 }
 0x1aa   :  { %v333_v46 = vsel %vm332_vm7, %v3182_v14, %v329_v37  ;;  %3034 = vmatmul.msk.bf16.gmra.mxu3 %vm120_vm0, %v527_v38  ;;  %3042 = vmatmul.msk.bf16.gmra.mxu2 %vm120_vm0, %v527_v38  ;;  %v468_v21 = vmul.f32 %v353_v5, %v3824_v60 }
 0x1ab   :  { %v247_v49 = vpop.xlane.xlu1 %246  ;;  %v466_v15 = vmul.f32 %v333_v46, %v3841_v20  ;;  %v357_v62 = vmul.f32 0.5, %v356_v48  ;;  %v507_v20 = vadd.f32 %v3881_v59, %v487_v50 }
 0x1ac   :  { %v279_v24 = vmul.f32 %v247_v49, %v3728_v28  ;;  %v365_v28 = vmul.f32 %v3186_v45, %v3986_v3  ;;  %v488_v0 = vmul.f32 %v3870_v47, %v468_v21 }
 0x1ad   :  { %v486_v52 = vmul.f32 %v3870_v47, %v466_v15  ;;  %v358_v55 = vsub.f32 1.5, %v357_v62 }
 0x1ae   :  { %v295_v44 = vadd.f32 1e-05, %v279_v24  ;;  %v366_v6 = vmul.f32 %v3186_v45, %v365_v28  ;;  %v508_v25 = vadd.f32 %v3881_v59, %v488_v0 }
 0x1af   :  { %v506_v56 = vadd.f32 %v3881_v59, %v486_v52  ;;  %v359_v57 = vmul.f32 %v3184_v36, %v358_v55 }
 0x1b0   :  { %3187 = vrsqrt.f32 %v295_v44  ;;  %v367_v9 = vmul.f32 0.5, %v366_v6  ;;  %vm380_vm14 = vweird.f32 %v295_v44 }
 0x1b1   :  { %v521_v1 = vpack.c.bf16 %v507_v20, %v506_v56  ;;  %v363_v53 = vsel %vm362_vm12, %v3184_v36, %v359_v57 }
 0x1b2   :  { %v605_v63 = vpop.f32.mrf.mxu3  ;;  %v654_v2 = vpop.f32.mrf.mxu2  ;;  %v469_v7 = vmul.f32 %v363_v53, %v3865_v39  ;;  %v368_v23 = vsub.f32 1.5, %v367_v9 }
 0x1b3   :  { %3028 = vmatmul.msk.bf16.gmra.mxu0 %vm120_vm0, %v521_v1  ;;  %3036 = vmatmul.msk.bf16.gmra.mxu1 %vm120_vm0, %v521_v1  ;;  %v4011_v43 = vpack.c.bf16 %v654_v2, %v605_v63 }
 0x1b4   :  { %v489_v12 = vmul.f32 %v3870_v47, %v469_v7  ;;  %v369_v16 = vmul.f32 %v3186_v45, %v368_v23 }
 0x1b5   :  { %5455 = vst [vmem:[#allocation16_spill] sm:$0xff] %v4011_v43 }
 0x1b6   :  { %v3188_v41 = vpop.eup %3187  ;;  %v509_v39 = vadd.f32 %v3881_v59, %v489_v12  ;;  %v373_v19 = vsel %vm372_vm4, %v3186_v45, %v369_v16 }
 0x1b7   :  { %v375_v8 = vmul.f32 %v3188_v41, %v295_v44  ;;  %vm381_vm15 = vweird.f32 %v3188_v41  ;;  %v470_v3 = vmul.f32 %v373_v19, %v3838_v17 }
 0x1b8   :  { %vm382_vm3 = vmor %vm380_vm14, %vm381_vm15  ;;  %v522_v26 = vpack.c.bf16 %v509_v39, %v508_v25 }
 0x1b9   :  { %v376_v10 = vmul.f32 %v3188_v41, %v375_v8  ;;  %v490_v34 = vmul.f32 %v3870_v47, %v470_v3 }
 0x1ba   :  { %v4016_v13 = vpop.f32.mrf.mxu3  ;;  %v4018_v22 = vpop.f32.mrf.mxu2 }
 0x1bb   :  { %v377_v14 = vmul.f32 0.5, %v376_v10  ;;  %v4067_v8 = vpack.c.bf16 %v4018_v22, %v4016_v13 }
 0x1bd   :  { %v378_v61 = vsub.f32 1.5, %v377_v14  ;;  %5461 = vst [vmem:[#allocation22_spill] sm:$0xff] %v4067_v8  ;;  %v747_v25 = vunpack.c.l.b16 %v4067_v8 }
 0x1bf   :  { %v379_v60 = vmul.f32 %v3188_v41, %v378_v61 }
 0x1c1   :  { %v383_v27 = vsel %vm382_vm3, %v3188_v41, %v379_v60 }
 0x1c2   :  { %v610_v4 = vpop.f32.mrf.mxu3  ;;  %v659_v54 = vpop.f32.mrf.mxu2  ;;  %v471_v42 = vmul.f32 %v383_v27, %v3911_v31  ;;  %v510_v31 = vadd.f32 %v3881_v59, %v490_v34 }
 0x1c3   :  { %3029 = vmatmul.msk.bf16.gmra.mxu0 %vm120_vm0, %v522_v26  ;;  %3037 = vmatmul.msk.bf16.gmra.mxu1 %vm120_vm0, %v522_v26  ;;  %v4029_v30 = vpack.c.bf16 %v659_v54, %v610_v4  ;;  %v746_v4 = vunpack.c.l.b16 %v4011_v43 }
 0x1c4   :  { %v491_v29 = vmul.f32 %v3870_v47, %v471_v42 }
 0x1c5   :  { %5456 = vst [vmem:[#allocation17_spill] sm:$0xff] %v4029_v30  ;;  %v748_v36 = vunpack.c.l.b16 %v4029_v30  ;;  %v732_v26 = vrot.slane %v4029_v30, 4 }
 0x1c6   :  { %v511_v58 = vadd.f32 %v3881_v59, %v491_v29  ;;  %v731_v29 = vrot.slane %v4067_v8, 4 }
 0x1c7   :  { %v1094_v34 = vunpack.c.l.b16 %v732_v26 }
 0x1c8   :  { %v523_v17 = vpack.c.bf16 %v511_v58, %v510_v31  ;;  %v730_v58 = vrot.slane %v4011_v43, 4  ;;  %v1093_v31 = vunpack.c.l.b16 %v731_v29 }
 0x1ca   :  { %v612_v11 = vpop.f32.mrf.mxu3  ;;  %v661_v33 = vpop.f32.mrf.mxu2 }
 0x1cb   :  { %v4032_v35 = vpack.c.bf16 %v661_v33, %v612_v11  ;;  %v4092_v33 = vpack.c.b16 %v747_v25, %v746_v4 }
 0x1cc   :  { %v585_v51 = vpop.f32.mrf.mxu0 }
 0x1cd   :  { %5457 = vst [vmem:[#allocation18_spill] sm:$0xff] %v4032_v35  ;;  %v749_v18 = vunpack.c.l.b16 %v4032_v35  ;;  %v634_v24 = vpop.f32.mrf.mxu1  ;;  %v733_v13 = vrot.slane %v4032_v35, 4 }
 0x1ce   :  { %v4085_v27 = vpack.c.bf16 %v634_v24, %v585_v51 }
 0x1cf   :  { %v4038_v37 = vpack.c.b16 %v749_v18, %v748_v36  ;;  %v1095_v3 = vunpack.c.l.b16 %v733_v13 }
 0x1d0   :  { %5464 = vst [vmem:[#allocation25_spill] sm:$0xff] %v4085_v27  ;;  %v738_v36 = vunpack.c.l.b16 %v4085_v27  ;;  %v722_v26 = vrot.slane %v4085_v27, 4 }
 0x1d1   :  { %772 = vrot.lane.b32.xlu1 %v4038_v37, %s3615_s11  ;;  %v1105_v18 = vpack.c.b16 %v1095_v3, %v1094_v34 }
 0x1d2   :  { %v615_v38 = vpop.f32.mrf.mxu3 }
 0x1d3   :  { %3030 = vmatmul.msk.bf16.gmra.mxu0 %vm120_vm0, %v523_v17  ;;  %3038 = vmatmul.msk.bf16.gmra.mxu1 %vm120_vm0, %v523_v17  ;;  %v664_v47 = vpop.f32.mrf.mxu2 }
 0x1d4   :  { %v4044_v40 = vpack.c.bf16 %v664_v47, %v615_v38  ;;  %v587_v45 = vpop.f32.mrf.mxu0  ;;  %v1092_v38 = vunpack.c.l.b16 %v730_v58 }
 0x1d5   :  { %v636_v62 = vpop.f32.mrf.mxu1 }
 0x1d6   :  { %5458 = vst [vmem:[#allocation19_spill] sm:$0xff] %v4044_v40  ;;  %v750_v59 = vunpack.c.l.b16 %v4044_v40  ;;  %v734_v14 = vrot.slane %v4044_v40, 4  ;;  %v4079_v22 = vpack.c.bf16 %v636_v62, %v587_v45 }
 0x1d8   :  { %5463 = vst [vmem:[#allocation24_spill] sm:$0xff] %v4079_v22  ;;  %v1096_v16 = vunpack.c.l.b16 %v734_v14  ;;  %v739_v11 = vunpack.c.l.b16 %v4079_v22  ;;  %v723_v25 = vrot.slane %v4079_v22, 4 }
 0x1da   :  { %v617_v46 = vpop.f32.mrf.mxu3  ;;  %v4098_v17 = vpack.c.b16 %v739_v11, %v738_v36 }
 0x1db   :  { %v666_v48 = vpop.f32.mrf.mxu2 }
 0x1dc   :  { %v4046_v49 = vpack.c.bf16 %v666_v48, %v617_v46 }
 0x1de   :  { %v751_v15 = vunpack.c.l.b16 %v4046_v49  ;;  %v735_v41 = vrot.slane %v4046_v49, 4 }
 0x1e0   :  { %v4050_v50 = vpack.c.b16 %v751_v15, %v750_v59  ;;  %v1097_v39 = vunpack.c.l.b16 %v735_v41  ;;  %v1104_v59 = vpack.c.b16 %v1093_v31, %v1092_v38 }
 0x1e2   :  { %774 = vrot.lane.b32.xlu0 %v4050_v50, %s3615_s11  ;;  %v1106_v42 = vpack.c.b16 %v1097_v39, %v1096_v16 }
 0x22d   :  { %v620_v52 = vpop.f32.mrf.mxu3  ;;  %v669_v44 = vpop.f32.mrf.mxu2 }
 0x22e   :  { %v4054_v20 = vpack.c.bf16 %v669_v44, %v620_v52 }
 0x230   :  { %v590_v55 = vpop.f32.mrf.mxu0  ;;  %v639_v56 = vpop.f32.mrf.mxu1  ;;  %5459 = vst [vmem:[#allocation20_spill] sm:$0xff] %v4054_v20  ;;  %v736_v1 = vrot.slane %v4054_v20, 4  ;;  %v752_v63 = vunpack.c.l.b16 %v4054_v20 }
 0x231   :  { %v4059_v53 = vpack.c.bf16 %v639_v56, %v590_v55 }
 0x232   :  { %v1098_v10 = vunpack.c.l.b16 %v736_v1 }
 0x233   :  { %5460 = vst [vmem:[#allocation21_spill] sm:$0xff] %v4059_v53  ;;  %v740_v0 = vunpack.c.l.b16 %v4059_v53 }
 0x235   :  { %v622_v32 = vpop.f32.mrf.mxu3  ;;  %v671_v28 = vpop.f32.mrf.mxu2 }
 0x236   :  { %v4056_v57 = vpack.c.bf16 %v671_v28, %v622_v32 }
 0x238   :  { %v753_v2 = vunpack.c.l.b16 %v4056_v57  ;;  %v592_v5 = vpop.f32.mrf.mxu0  ;;  %v641_v6 = vpop.f32.mrf.mxu1  ;;  %v737_v7 = vrot.slane %v4056_v57, 4 }
 0x239   :  { %v4069_v21 = vpack.c.bf16 %v641_v6, %v592_v5 }
 0x23a   :  { %v4071_v9 = vpack.c.b16 %v753_v2, %v752_v63  ;;  %v1099_v12 = vunpack.c.l.b16 %v737_v7 }
 0x23b   :  { %5462 = vst [vmem:[#allocation23_spill] sm:$0xff] %v4069_v21  ;;  %v741_v23 = vunpack.c.l.b16 %v4069_v21 }
 0x23c   :  { %776 = vrot.lane.b32.xlu2 %v4071_v9, %s3615_s11  ;;  %v1107_v61 = vpack.c.b16 %v1099_v12, %v1098_v10 }
 0x23d   :  { %v4081_v60 = vpack.c.b16 %v741_v23, %v740_v0  ;;  %v725_v0 = vrot.slane %v4069_v21, 4 }
 0x23e   :  { %1116 = vmatpush.bf16.msrb.mxu3 %v1107_v61  ;;  %v724_v61 = vrot.slane %v4059_v53, 4 }
 0x23f   :  { %764 = vrot.lane.b32.xlu1 %v4081_v60, %s3615_s11  ;;  %v1087_v13 = vunpack.c.l.b16 %v725_v0 }
 0x240   :  { %v595_v54 = vpop.f32.mrf.mxu0  ;;  %v644_v19 = vpop.f32.mrf.mxu1  ;;  %v1086_v16 = vunpack.c.l.b16 %v724_v61 }
 0x241   :  { %v4100_v47 = vpack.c.bf16 %v644_v19, %v595_v54  ;;  %v1085_v54 = vunpack.c.l.b16 %v723_v25  ;;  %v1084_v19 = vunpack.c.l.b16 %v722_v26 }
 0x242   :  { %1117 = vmatpush.bf16.msrb.mxu3 %v1106_v42  ;;  %v1101_v4 = vpack.c.b16 %v1087_v13, %v1086_v16 }
 0x243   :  { %v742_v51 = vunpack.c.l.b16 %v4100_v47  ;;  %v726_v10 = vrot.slane %v4100_v47, 4  ;;  %v1100_v42 = vpack.c.b16 %v1085_v54, %v1084_v19  ;;  %v773_v36 = vpop.permute.xlu1 %772 }
 0x244   :  { %770 = vrot.lane.b32.xlu2 %v4092_v33, %s3615_s11 }
 0x245   :  { %v1088_v23 = vunpack.c.l.b16 %v726_v10 }
 0x246   :  { %1118 = vmatpush.bf16.msrb.mxu3 %v1105_v18  ;;  %v819_v18 = vsel %vm778_vm5, %v773_v36, 0 }
 0x247   :  { %1239 = vrot.lane.b32.xlu1 %v4098_v17, %s3623_s2 }
 0x248   :  { %v597_v46 = vpop.f32.mrf.mxu0  ;;  %v646_v48 = vpop.f32.mrf.mxu1 }
 0x249   :  { %v4104_v15 = vpack.c.bf16 %v646_v48, %v597_v46 }
 0x24a   :  { %1119 = vmatpush.bf16.msrb.mxu3 %v1104_v59 }
 0x24b   :  { %5465 = vst [vmem:[#allocation26_spill] sm:$0xff] %v4104_v15  ;;  %v743_v24 = vunpack.c.l.b16 %v4104_v15  ;;  %v727_v5 = vrot.slane %v4104_v15, 4 }
 0x24d   :  { %v4108_v45 = vpack.c.b16 %v743_v24, %v742_v51  ;;  %v1089_v14 = vunpack.c.l.b16 %v727_v5 }
 0x24f   :  { %1231 = vrot.lane.b32.xlu1 %v4092_v33, %s3624_s27  ;;  %766 = vrot.lane.b32.xlu2 %v4108_v45, %s3615_s11  ;;  %v1102_v39 = vpack.c.b16 %v1089_v14, %v1088_v23 }
 0x250   :  { %v600_v62 = vpop.f32.mrf.mxu0  ;;  %v649_v52 = vpop.f32.mrf.mxu1 }
 0x251   :  { %v4114_v44 = vpack.c.bf16 %v649_v52, %v600_v62 }
 0x253   :  { %5466 = vst [vmem:[#allocation27_spill] sm:$0xff] %v4114_v44  ;;  %v728_v28 = vrot.slane %v4114_v44, 4  ;;  %v744_v1 = vunpack.c.l.b16 %v4114_v44 }
 0x254   :  { %v775_v11 = vpop.permute.xlu0 %774 }
 0x255   :  { %v1090_v7 = vunpack.c.l.b16 %v728_v28  ;;  %v822_v34 = vsel %vm778_vm5, %v775_v11, 0 }
 0x257   :  { %1886 = vrot.lane.b32.xlu1 %v4050_v50, %s3625_s28  ;;  %1249 = vrot.lane.b32.xlu2 %v4038_v37, %s3623_s2 }
 0x258   :  { %v602_v55 = vpop.f32.mrf.mxu0  ;;  %v651_v56 = vpop.f32.mrf.mxu1 }
 0x259   :  { %v4120_v32 = vpack.c.bf16 %v651_v56, %v602_v55 }
 0x25b   :  { %5467 = vst [vmem:[#allocation28_spill] sm:$0xff] %v4120_v32  ;;  %v745_v63 = vunpack.c.l.b16 %v4120_v32  ;;  %v729_v2 = vrot.slane %v4120_v32, 4 }
 0x25d   :  { %v4127_v6 = vpack.c.b16 %v745_v63, %v744_v1  ;;  %v1091_v41 = vunpack.c.l.b16 %v729_v2 }
 0x25f   :  { %1884 = vrot.lane.b32.xlu1 %v4038_v37, %s3625_s28  ;;  %1247 = vrot.lane.b32.xlu2 %v4092_v33, %s3623_s2  ;;  %v1103_v12 = vpack.c.b16 %v1091_v41, %v1090_v7 }
 0x260   :  { %768 = vrot.lane.b32.xlu0 %v4127_v6, %s3615_s11 }
 0x261   :  { %1120 = vmatpush.bf16.msrb.mxu3 %v1103_v12 }
 0x265   :  { %1121 = vmatpush.bf16.msrb.mxu3 %v1102_v39 }
 0x267   :  { %2454 = vrot.lane.b32.xlu1 %v4092_v33, %s3626_s29  ;;  %1245 = vrot.lane.b32.xlu2 %v4127_v6, %s3623_s2 }
 0x268   :  { %762 = vrot.lane.b32.xlu0 %v4098_v17, %s3615_s11 }
 0x269   :  { %1122 = vmatpush.bf16.msrb.mxu3 %v1101_v4 }
 0x26d   :  { %1123 = vmatpush.bf16.msrb.mxu3 %v1100_v42 }
 0x26f   :  { %2452 = vrot.lane.b32.xlu1 %v4127_v6, %s3626_s29  ;;  %1243 = vrot.lane.b32.xlu2 %v4108_v45, %s3623_s2 }
 0x270   :  { %1251 = vrot.lane.b32.xlu0 %v4050_v50, %s3623_s2 }
 0x277   :  { %1874 = vrot.lane.b32.xlu1 %v4098_v17, %s3625_s28  ;;  %1241 = vrot.lane.b32.xlu2 %v4081_v60, %s3623_s2 }
 0x278   :  { %1225 = vrot.lane.b32.xlu0 %v4081_v60, %s3624_s27 }
 0x27f   :  { %2430 = vrot.lane.b32.xlu1 %v4098_v17, %s3627_s30  ;;  %1223 = vrot.lane.b32.xlu2 %v4098_v17, %s3624_s27 }
 0x280   :  { %2458 = vrot.lane.b32.xlu0 %v4050_v50, %s3626_s29 }
 0x287   :  { %1862 = vrot.lane.b32.xlu1 %v4108_v45, %s3628_s8  ;;  %1227 = vrot.lane.b32.xlu2 %v4108_v45, %s3624_s27 }
 0x288   :  { %2456 = vrot.lane.b32.xlu0 %v4038_v37, %s3626_s29 }
 0x28f   :  { %1866 = vrot.lane.b32.xlu1 %v4092_v33, %s3628_s8  ;;  %1229 = vrot.lane.b32.xlu2 %v4127_v6, %s3624_s27 }
 0x290   :  { %1235 = vrot.lane.b32.xlu0 %v4050_v50, %s3624_s27 }
 0x296   :  { %v777_v3 = vpop.permute.xlu2 %776 }
 0x297   :  { %1205 = vrot.lane.b32.xlu1 %v4056_v57, %s3624_s27  ;;  %1233 = vrot.lane.b32.xlu2 %v4038_v37, %s3624_s27  ;;  %v825_v29 = vsel %vm778_vm5, %v777_v3, 0 }
 0x298   :  { %1878 = vrot.lane.b32.xlu0 %v4108_v45, %s3625_s28  ;;  %827 = vmatpush.bf16.xpose.msrb.mxu2 %v825_v29 }
 0x29e   :  { %v771_v58 = vpop.permute.xlu2 %770 }
 0x29f   :  { %1191 = vrot.lane.b32.xlu1 %v4011_v43, %s3624_s27  ;;  %1882 = vrot.lane.b32.xlu2 %v4092_v33, %s3625_s28  ;;  %v816_v38 = vsel %vm778_vm5, %v771_v58, 0 }
 0x2a0   :  { %1876 = vrot.lane.b32.xlu0 %v4081_v60, %s3625_s28  ;;  %828 = vmatpush.bf16.xpose.msrb.mxu2 %v822_v34 }
 0x2a7   :  { %1253 = vrot.lane.b32.xlu1 %v4071_v9, %s3623_s2  ;;  %1880 = vrot.lane.b32.xlu2 %v4127_v6, %s3625_s28 }
 0x2a8   :  { %2446 = vrot.lane.b32.xlu0 %v4098_v17, %s3626_s29  ;;  %829 = vmatpush.bf16.xpose.msrb.mxu2 %v819_v18 }
 0x2a9   :  { %v767_v31 = vpop.permute.xlu2 %766 }
 0x2aa   :  { %v810_v41 = vsel %vm778_vm5, %v767_v31, 0 }
 0x2af   :  { %1237 = vrot.lane.b32.xlu1 %v4071_v9, %s3624_s27  ;;  %2450 = vrot.lane.b32.xlu2 %v4108_v45, %s3626_s29 }
 0x2b0   :  { %1860 = vrot.lane.b32.xlu0 %v4081_v60, %s3628_s8  ;;  %830 = vmatpush.bf16.xpose.msrb.mxu2 %v816_v38  ;;  %v3127_v38 = vld [vmem:[#allocation8] sm:$0xff] }
 0x2b1   :  { %v765_v46 = vpop.permute.xlu1 %764  ;;  %v4204_v48 = vpop.permute.xlu2 %1249 }
 0x2b2   :  { %v807_v0 = vsel %vm778_vm5, %v765_v46, 0 }
 0x2b7   :  { %2448 = vrot.lane.b32.xlu2 %v4081_v60, %s3626_s29 }
 0x2b8   :  { %2434 = vrot.lane.b32.xlu0 %v4108_v45, %s3627_s30 }
 0x2b9   :  { %v4210_v59 = vpop.permute.xlu1 %1239  ;;  %v4212_v51 = vpop.permute.xlu2 %1247 }
 0x2bf   :  { %1858 = vrot.lane.b32.xlu2 %v4098_v17, %s3628_s8 }
 0x2c0   :  { %1864 = vrot.lane.b32.xlu0 %v4127_v6, %s3628_s8 }
 0x2c1   :  { %v4218_v24 = vpop.permute.xlu1 %1231  ;;  %v4220_v62 = vpop.permute.xlu2 %1245 }
 0x2c7   :  { %2432 = vrot.lane.b32.xlu2 %v4081_v60, %s3627_s30 }
 0x2c8   :  { %2436 = vrot.lane.b32.xlu0 %v4127_v6, %s3627_s30 }
 0x2c9   :  { %v4226_v52 = vpop.permute.xlu1 %1886  ;;  %v4228_v55 = vpop.permute.xlu2 %1243 }
 0x2cf   :  { %2438 = vrot.lane.b32.xlu2 %v4092_v33, %s3627_s30 }
 0x2d0   :  { %1203 = vrot.lane.b32.xlu0 %v4054_v20, %s3624_s27 }
 0x2d1   :  { %v4234_v56 = vpop.permute.xlu1 %1884  ;;  %v4236_v28 = vpop.permute.xlu2 %1241 }
 0x2d2   :  { %v769_v1 = vpop.permute.xlu0 %768 }
 0x2d3   :  { %v813_v63 = vsel %vm778_vm5, %v769_v1, 0 }
 0x2d4   :  { %831 = vmatpush.bf16.xpose.msrb.mxu2 %v813_v63 }
 0x2d7   :  { %1195 = vrot.lane.b32.xlu2 %v4029_v30, %s3624_s27 }
 0x2d8   :  { %1868 = vrot.lane.b32.xlu0 %v4038_v37, %s3628_s8 }
 0x2d9   :  { %v4243_v2 = vpop.permute.xlu1 %2454  ;;  %v4245_v5 = vpop.permute.xlu2 %1223 }
 0x2da   :  { %v763_v7 = vpop.permute.xlu0 %762 }
 0x2db   :  { %v804_v13 = vsel %vm778_vm5, %v763_v7, 0 }
 0x2dc   :  { %832 = vmatpush.bf16.xpose.msrb.mxu2 %v810_v41 }
 0x2df   :  { %2460 = vrot.lane.b32.xlu2 %v4071_v9, %s3626_s29 }
 0x2e0   :  { %1199 = vrot.lane.b32.xlu0 %v4044_v40, %s3624_s27 }
 0x2e1   :  { %v4252_v10 = vpop.permute.xlu1 %2452  ;;  %v4254_v12 = vpop.permute.xlu2 %1227 }
 0x2e2   :  { %v1252_v14 = vpop.permute.xlu0 %1251 }
 0x2e3   :  { %v1298_v41 = vsel %vm778_vm5, %v1252_v14, 0 }
 0x2e4   :  { %833 = vmatpush.bf16.xpose.msrb.mxu2 %v807_v0 }
 0x2e8   :  { %1201 = vrot.lane.b32.xlu0 %v4046_v49, %s3624_s27 }
 0x2e9   :  { %v4259_v23 = vpop.permute.xlu1 %1874  ;;  %v4261_v61 = vpop.permute.xlu2 %1229 }
 0x2ea   :  { %v4263_v39 = vpop.permute.xlu0 %1225 }
 0x2ec   :  { %834 = vmatpush.bf16.xpose.msrb.mxu2 %v804_v13  ;;  %v1295_v13 = vsel %vm778_vm5, %v4204_v48, 0 }
 0x2f0   :  { %2440 = vrot.lane.b32.xlu0 %v4038_v37, %s3627_s30 }
 0x2f1   :  { %v4268_v25 = vpop.permute.xlu1 %2430  ;;  %v4270_v16 = vpop.permute.xlu2 %1233 }
 0x2f2   :  { %5468 = vst [vmem:[#allocation29_spill] sm:$0xff] %v4268_v25  ;;  %v2459_v26 = vpop.permute.xlu0 %2458 }
 0x2f3   :  { %3043 = vmatmul.msk.bf16.vlgmr.msrb.gmra.mxu2 %vm778_vm5, %v4098_v17 }
 0x2f4   :  { %1768 = vmatpush.bf16.msra.mxu2 %v3127_v38 }
 0x2f8   :  { %1197 = vrot.lane.b32.xlu0 %v4032_v35, %s3624_s27 }
 0x2f9   :  { %v4276_v4 = vpop.permute.xlu1 %1862  ;;  %v4278_v54 = vpop.permute.xlu2 %1882 }
 0x2fa   :  { %v2457_v19 = vpop.permute.xlu0 %2456 }
 0x300   :  { %1193 = vrot.lane.b32.xlu0 %v4067_v8, %s3624_s27 }
 0x301   :  { %v4282_v42 = vpop.permute.xlu1 %1866  ;;  %v4284_v3 = vpop.permute.xlu2 %1880 }
 0x302   :  { %v4286_v29 = vpop.permute.xlu0 %1235 }
 0x303   :  { %3044 = vmatmul.msk.bf16.gmra.mxu2 %vm778_vm5, %v4081_v60 }
 0x308   :  { %1187 = vrot.lane.b32.xlu0 %v4114_v44, %s3624_s27 }
 0x309   :  { %v1206_v17 = vpop.permute.xlu1 %1205  ;;  %v4292_v11 = vpop.permute.xlu2 %2450 }
 0x30a   :  { %v4294_v34 = vpop.permute.xlu0 %1878  ;;  %v1222_v48 = vrot.slane %v1206_v17, 4  ;;  %v1283_v17 = vsel %vm778_vm5, %v4236_v28, 0 }
 0x310   :  { %1888 = vrot.lane.b32.xlu0 %v4071_v9, %s3625_s28 }
 0x311   :  { %v4298_v58 = vpop.permute.xlu1 %1191  ;;  %v4300_v36 = vpop.permute.xlu2 %2448 }
 0x312   :  { %v4302_v18 = vpop.permute.xlu0 %1876 }
 0x313   :  { %3045 = vmatmul.msk.bf16.gmra.mxu2 %vm778_vm5, %v4108_v45 }
 0x319   :  { %v1254_v60 = vpop.permute.xlu1 %1253  ;;  %v4306_v31 = vpop.permute.xlu2 %1858 }
 0x31a   :  { %v4308_v46 = vpop.permute.xlu0 %2446  ;;  %v1301_v1 = vsel %vm778_vm5, %v1254_v60, 0 }
 0x31b   :  { %1303 = vmatpush.bf16.xpose.msrb.mxu0 %v1301_v1  ;;  %v1292_v1 = vsel %vm778_vm5, %v4212_v51, 0 }
 0x321   :  { %v4311_v63 = vpop.permute.xlu2 %2432 }
 0x322   :  { %5469 = vst [vmem:[#allocation30_spill] sm:$0xff] %v4311_v63  ;;  %v4313_v7 = vpop.permute.xlu0 %1860 }
 0x323   :  { %3046 = vmatmul.msk.bf16.gmra.mxu2 %vm778_vm5, %v4127_v6  ;;  %1304 = vmatpush.bf16.xpose.msrb.mxu0 %v1298_v41 }
 0x329   :  { %v4318_v45 = vpop.permute.xlu2 %2438 }
 0x32a   :  { %5470 = vst [vmem:[#allocation31_spill] sm:$0xff] %v4318_v45  ;;  %v4320_v0 = vpop.permute.xlu0 %2434  ;;  %v1289_v45 = vsel %vm778_vm5, %v4220_v62, 0 }
 0x32b   :  { %5471 = vst [vmem:[#allocation32_spill] sm:$0xff] %v4320_v0  ;;  %1305 = vmatpush.bf16.xpose.msrb.mxu0 %v1295_v13  ;;  %v1286_v0 = vsel %vm778_vm5, %v4228_v55, 0  ;;  %v2502_v55 = vsel %vm778_vm5, %v2457_v19, 0  ;;  %v2496_v19 = vsel %vm778_vm5, %v4252_v10, 0 }
 0x331   :  { %v1196_v60 = vpop.permute.xlu2 %1195 }
 0x332   :  { %v4324_v38 = vpop.permute.xlu0 %1864 }
 0x333   :  { %3047 = vmatmul.msk.bf16.gmra.mxu2 %vm778_vm5, %v4092_v33  ;;  %1306 = vmatpush.bf16.xpose.msrb.mxu0 %v1292_v1  ;;  %v2505_v33 = vsel %vm778_vm5, %v2459_v26, 0  ;;  %v1575_v1 = vunpack.c.l.b16 %v1222_v48  ;;  %v2499_v26 = vsel %vm778_vm5, %v4243_v2, 0  ;;  %v2493_v2 = vsel %vm778_vm5, %v4292_v11, 0 }
 0x334   :  { %v2487_v11 = vsel %vm778_vm5, %v4308_v46, 0  ;;  %v1933_v46 = vsel %vm778_vm5, %v4226_v52, 0 }
 0x339   :  { %v2461_v6 = vpop.permute.xlu2 %2460 }
 0x33a   :  { %v2508_v14 = vsel %vm778_vm5, %v2461_v6, 0  ;;  %v4331_v41 = vpop.permute.xlu0 %2436 }
 0x33b   :  { %5472 = vst [vmem:[#allocation33_spill] sm:$0xff] %v4331_v41  ;;  %1307 = vmatpush.bf16.xpose.msrb.mxu0 %v1289_v45  ;;  %2510 = vmatpush.bf16.xpose.msrb.mxu2 %v2508_v14 }
 0x342   :  { %v1204_v13 = vpop.permute.xlu0 %1203 }
 0x343   :  { %v1221_v51 = vrot.slane %v1204_v13, 4  ;;  %3048 = vmatmul.msk.bf16.gmra.mxu2 %vm778_vm5, %v4038_v37  ;;  %1308 = vmatpush.bf16.xpose.msrb.mxu0 %v1286_v0  ;;  %v1280_v37 = vsel %vm778_vm5, %v4210_v59, 0 }
 0x344   :  { %2511 = vmatpush.bf16.xpose.msrb.mxu2 %v2505_v33  ;;  %v2490_v33 = vsel %vm778_vm5, %v4300_v36, 0 }
 0x345   :  { %v1574_v6 = vunpack.c.l.b16 %v1221_v51  ;;  %v1217_v51 = vrot.slane %v1196_v60, 4 }
 0x347   :  { %v1583_v41 = vpack.c.b16 %v1575_v1, %v1574_v6  ;;  %v1570_v1 = vunpack.c.l.b16 %v1217_v51 }
 0x349   :  { %1592 = vmatpush.bf16.msrb.mxu1 %v1583_v41 }
 0x34a   :  { %v4340_v62 = vpop.permute.xlu0 %1868 }
 0x34b   :  { %1309 = vmatpush.bf16.xpose.msrb.mxu0 %v1283_v17 }
 0x34c   :  { %2512 = vmatpush.bf16.xpose.msrb.mxu2 %v2502_v55  ;;  %v1215_v55 = vrot.slane %v4298_v58, 4 }
 0x34e   :  { %v1568_v60 = vunpack.c.l.b16 %v1215_v55  ;;  %v4416_v55 = vld [vmem:[#allocation10 + $0x10] sm:$0xff] }
 0x34f   :  { %5474 = vst [vmem:[#allocation35_spill] sm:$0xff] %v4416_v55 }
 0x352   :  { %v1200_v45 = vpop.permute.xlu0 %1199 }
 0x353   :  { %3049 = vmatmul.msk.bf16.gmra.mxu2 %vm778_vm5, %v4050_v50  ;;  %1310 = vmatpush.bf16.xpose.msrb.mxu0 %v1280_v37  ;;  %v1219_v0 = vrot.slane %v1200_v45, 4 }
 0x354   :  { %2513 = vmatpush.bf16.xpose.msrb.mxu2 %v2499_v26 }
 0x355   :  { %v1572_v41 = vunpack.c.l.b16 %v1219_v0 }
 0x35a   :  { %v1202_v14 = vpop.permute.xlu0 %1201  ;;  %3051 = vmatmul.msk.bf16.vlgmr.msrb.gmra.mxu0 %vm778_vm5, %v4245_v5 }
 0x35b   :  { %v1220_v28 = vrot.slane %v1202_v14, 4 }
 0x35c   :  { %2514 = vmatpush.bf16.xpose.msrb.mxu2 %v2496_v19 }
 0x35d   :  { %v1573_v59 = vunpack.c.l.b16 %v1220_v28 }
 0x35f   :  { %v1582_v48 = vpack.c.b16 %v1573_v59, %v1572_v41  ;;  %v1930_v41 = vsel %vm778_vm5, %v4234_v56, 0  ;;  %v1921_v56 = vsel %vm778_vm5, %v4294_v34, 0 }
 0x361   :  { %1593 = vmatpush.bf16.msrb.mxu1 %v1582_v48 }
 0x362   :  { %v4355_v13 = vpop.permute.xlu0 %2440 }
 0x363   :  { %5473 = vst [vmem:[#allocation34_spill] sm:$0xff] %v4355_v13  ;;  %3050 = vmatmul.msk.bf16.gmra.mxu2 %vm778_vm5, %v4071_v9 }
 0x364   :  { %2515 = vmatpush.bf16.xpose.msrb.mxu2 %v2493_v2 }
 0x36a   :  { %v1198_v5 = vpop.permute.xlu0 %1197  ;;  %3052 = vmatmul.msk.bf16.gmra.mxu0 %vm778_vm5, %v4263_v39 }
 0x36b   :  { %v1218_v10 = vrot.slane %v1198_v5, 4  ;;  %v4398_v5 = vld [vmem:[#allocation10] sm:$0xff] }
 0x36c   :  { %2516 = vmatpush.bf16.xpose.msrb.mxu2 %v2490_v33  ;;  %v4406_v33 = vld [vmem:[#allocation10 + $0x8] sm:$0xff] }
 0x36d   :  { %v1571_v6 = vunpack.c.l.b16 %v1218_v10 }
 0x36f   :  { %v1581_v17 = vpack.c.b16 %v1571_v6, %v1570_v1 }
 0x371   :  { %1594 = vmatpush.bf16.msrb.mxu1 %v1581_v17 }
 0x372   :  { %v1194_v45 = vpop.permute.xlu0 %1193 }
 0x373   :  { %v1216_v37 = vrot.slane %v1194_v45, 4 }
 0x374   :  { %2517 = vmatpush.bf16.xpose.msrb.mxu2 %v2487_v11  ;;  %v694_v11 = vld [vmem:[#allocation10 + $0x20] sm:$0xff] }
 0x375   :  { %v1569_v26 = vunpack.c.l.b16 %v1216_v37 }
 0x376   :  { %v836_v0 = vpop.f32.mrf.mxu2 }
 0x377   :  { %v1580_v39 = vpack.c.b16 %v1569_v26, %v1568_v60  ;;  %v4409_v1 = vadd.f32 %v836_v0, %v4398_v5  ;;  %v4428_v26 = vld [vmem:[#allocation10 + $0x18] sm:$0xff] }
 0x379   :  { %1595 = vmatpush.bf16.msrb.mxu1 %v1580_v39 }
 0x37a   :  { %v4368_v14 = vpop.permute.xlu0 %1187  ;;  %3053 = vmatmul.msk.bf16.gmra.mxu0 %vm778_vm5, %v4254_v12  ;;  %v1927_v12 = vsel %vm778_vm5, %v4278_v54, 0  ;;  %v1915_v54 = vsel %vm778_vm5, %v4259_v23, 0 }
 0x37e   :  { %v838_v36 = vpop.f32.mrf.mxu2 }
 0x37f   :  { %v4422_v37 = vadd.f32 %v838_v36, %v4406_v33 }
 0x382   :  { %v1889_v28 = vpop.permute.xlu0 %1888 }
 0x383   :  { %v1936_v58 = vsel %vm778_vm5, %v1889_v28, 0 }
 0x384   :  { %1938 = vmatpush.bf16.xpose.msra.mxu0 %v1936_v58 }
 0x386   :  { %v841_v19 = vpop.f32.mrf.mxu2 }
 0x387   :  { %v4436_v36 = vadd.f32 %v841_v19, %v4416_v55  ;;  %v4450_v19 = vld [vmem:[#allocation10 + $0x48] sm:$0xff] }
 0x38a   :  { %3054 = vmatmul.msk.bf16.gmra.mxu0 %vm778_vm5, %v4261_v61  ;;  %v1924_v61 = vsel %vm778_vm5, %v4284_v3, 0 }
 0x38c   :  { %1939 = vmatpush.bf16.xpose.msra.mxu0 %v1933_v46 }
 0x38e   :  { %v843_v59 = vpop.f32.mrf.mxu2 }
 0x38f   :  { %v4442_v46 = vadd.f32 %v843_v59, %v4428_v26 }
 0x394   :  { %1940 = vmatpush.bf16.xpose.msra.mxu0 %v1930_v41 }
 0x396   :  { %v846_v48 = vpop.f32.mrf.mxu2 }
 0x397   :  { %v4430_v39 = vadd.f32 %v846_v48, %v694_v11 }
 0x39a   :  { %3055 = vmatmul.msk.bf16.gmra.mxu0 %vm778_vm5, %v4218_v24  ;;  %v1918_v24 = vsel %vm778_vm5, %v4302_v18, 0 }
 0x39c   :  { %1941 = vmatpush.bf16.xpose.msra.mxu0 %v1927_v12 }
 0x39e   :  { %v848_v52 = vpop.f32.mrf.mxu2 }
 0x3a4   :  { %1942 = vmatpush.bf16.xpose.msra.mxu0 %v1924_v61 }
 0x3a6   :  { %v851_v2 = vpop.f32.mrf.mxu2 }
 0x3aa   :  { %3056 = vmatmul.msk.bf16.gmra.mxu0 %vm778_vm5, %v4270_v16  ;;  %v1238_v16 = vpop.permute.xlu1 %1237 }
 0x3ac   :  { %1943 = vmatpush.bf16.xpose.msra.mxu0 %v1921_v56 }
 0x3ae   :  { %v853_v3 = vpop.f32.mrf.mxu2 }
 0x3b4   :  { %1944 = vmatpush.bf16.xpose.msra.mxu0 %v1918_v24  ;;  %v4462_v24 = vld [vmem:[#allocation10 + $0x30] sm:$0xff] }
 0x3b6   :  { %v4395_v51 = vpop.f32.mrf.mxu2 }
 0x3ba   :  { %3057 = vmatmul.msk.bf16.gmra.mxu0 %vm778_vm5, %v4286_v29 }
 0x3bc   :  { %1945 = vmatpush.bf16.xpose.msra.mxu0 %v1915_v54  ;;  %v4466_v54 = vld [vmem:[#allocation10 + $0x50] sm:$0xff] }
 0x3be   :  { %v858_v34 = vpop.f32.mrf.mxu2 }
 0x3bf   :  { %v4457_v59 = vadd.f32 %v858_v34, %v4450_v19 }
 0x3c6   :  { %v861_v23 = vpop.f32.mrf.mxu2 }
 0x3c7   :  { %v4475_v34 = vadd.f32 %v861_v23, %v4466_v54 }
 0x3ca   :  { %3058 = vmatmul.msk.bf16.gmra.mxu0 %vm778_vm5, %v1238_v16  ;;  %v4469_v16 = vadd.f32 %v851_v2, %v4462_v24 }
 0x3ce   :  { %v863_v17 = vpop.f32.mrf.mxu2 }
 0x3d6   :  { %v866_v0 = vpop.f32.mrf.mxu2 }
 0x3d7   :  { %v1312_v10 = vpop.f32.mrf.mxu0 }
 0x3d8   :  { %v4401_v18 = vadd.f32 %v1312_v10, %v4398_v5 }
 0x3da   :  { %1352 = vmax.xlane.f32.xlu2 %v4401_v18  ;;  %3083 = vmatmul.msk.bf16.vlgmr.msra.gmra.mxu0 %vm778_vm5, %v4306_v31 }
 0x3de   :  { %v868_v12 = vpop.f32.mrf.mxu2 }
 0x3df   :  { %v1314_v29 = vpop.f32.mrf.mxu0 }
 0x3e0   :  { %v4412_v6 = vadd.f32 %v1314_v29, %v4406_v33  ;;  %v4482_v29 = vld [vmem:[#allocation10 + $0x40] sm:$0xff] }
 0x3e2   :  { %1354 = vmax.xlane.f32.xlu1 %v4412_v6  ;;  %876 = vmax.xlane.f32.xlu2 %v4409_v1 }
 0x3e7   :  { %v1317_v45 = vpop.f32.mrf.mxu0 }
 0x3e8   :  { %v4419_v31 = vadd.f32 %v1317_v45, %v4416_v55  ;;  %v4484_v45 = vld [vmem:[#allocation10 + $0x58] sm:$0xff] }
 0x3e9   :  { %v4493_v23 = vadd.f32 %v863_v17, %v4484_v45  ;;  %v4515_v17 = vld [vmem:[#allocation10 + $0x70] sm:$0xff] }
 0x3ea   :  { %878 = vmax.xlane.f32.xlu1 %v4422_v37  ;;  %1356 = vmax.xlane.f32.xlu0 %v4419_v31 }
 0x3eb   :  { %3084 = vmatmul.msk.bf16.gmra.mxu0 %vm778_vm5, %v4313_v7  ;;  %v695_v7 = vld [vmem:[#allocation10 + $0x28] sm:$0xff] }
 0x3ec   :  { %v4444_v41 = vadd.f32 %v848_v52, %v695_v7  ;;  %v871_v52 = vpop.f32.mrf.mxu2 }
 0x3ef   :  { %v1319_v60 = vpop.f32.mrf.mxu0 }
 0x3f0   :  { %v4433_v28 = vadd.f32 %v1319_v60, %v4428_v26 }
 0x3f2   :  { %884 = vmax.xlane.f32.xlu1 %v4430_v39  ;;  %1358 = vmax.xlane.f32.xlu2 %v4433_v28 }
 0x3f3   :  { %880 = vmax.xlane.f32.xlu0 %v4436_v36 }
 0x3f4   :  { %v873_v2 = vpop.f32.mrf.mxu2 }
 0x3f7   :  { %v1322_v58 = vpop.f32.mrf.mxu0 }
 0x3f8   :  { %v4452_v61 = vadd.f32 %v1322_v58, %v694_v11  ;;  %v4486_v11 = vld [vmem:[#allocation10 + $0x78] sm:$0xff] }
 0x3f9   :  { %v4496_v60 = vadd.f32 %v873_v2, %v4486_v11 }
 0x3fa   :  { %882 = vmax.xlane.f32.xlu2 %v4442_v46 }
 0x3fb   :  { %886 = vmax.xlane.f32.xlu0 %v4444_v41  ;;  %3085 = vmatmul.msk.bf16.gmra.mxu0 %vm778_vm5, %v4276_v4  ;;  %v4464_v4 = vld [vmem:[#allocation10 + $0x38] sm:$0xff] }
 0x3fc   :  { %v4472_v10 = vadd.f32 %v853_v3, %v4464_v4  ;;  %v4490_v3 = vadd.f32 %v4395_v51, %v4482_v29 }
 0x3ff   :  { %v1324_v48 = vpop.f32.mrf.mxu0 }
 0x400   :  { %v4454_v56 = vadd.f32 %v1324_v48, %v695_v7  ;;  %v4503_v7 = vld [vmem:[#allocation10 + $0x68] sm:$0xff]  ;;  %v4518_v48 = vadd.f32 %v871_v52, %v4515_v17 }
 0x401   :  { %v4509_v51 = vadd.f32 %v868_v12, %v4503_v7 }
 0x402   :  { %1362 = vmax.xlane.f32.xlu1 %v4454_v56  ;;  %1360 = vmax.xlane.f32.xlu2 %v4452_v61 }
 0x403   :  { %894 = vmax.xlane.f32.xlu0 %v4457_v59 }
 0x40a   :  { %890 = vmax.xlane.f32.xlu1 %v4472_v10  ;;  %888 = vmax.xlane.f32.xlu2 %v4469_v16 }
 0x40b   :  { %896 = vmax.xlane.f32.xlu0 %v4475_v34  ;;  %3086 = vmatmul.msk.bf16.gmra.mxu0 %vm778_vm5, %v4324_v38  ;;  %v4501_v38 = vld [vmem:[#allocation10 + $0x60] sm:$0xff] }
 0x40c   :  { %v4506_v58 = vadd.f32 %v866_v0, %v4501_v38 }
 0x412   :  { %892 = vmax.xlane.f32.xlu1 %v4490_v3  ;;  %898 = vmax.xlane.f32.xlu2 %v4493_v23 }
 0x413   :  { %906 = vmax.xlane.f32.xlu0 %v4496_v60 }
 0x41a   :  { %902 = vmax.xlane.f32.xlu1 %v4509_v51  ;;  %900 = vmax.xlane.f32.xlu2 %v4506_v58 }
 0x41b   :  { %3087 = vmatmul.msk.bf16.gmra.mxu0 %vm778_vm5, %v4282_v42 }
 0x422   :  { %904 = vmax.xlane.f32.xlu1 %v4518_v48 }
 0x42b   :  { %3088 = vmatmul.msk.bf16.gmra.mxu0 %vm778_vm5, %v4340_v62 }
 0x44d   :  { %v4523_v0 = vpop.xlane.xlu2 %1352 }
 0x455   :  { %v4525_v12 = vpop.xlane.xlu1 %1354  ;;  %v877_v2 = vpop.xlane.xlu2 %876 }
 0x456   :  { %v908_v13 = vsub.f32 %v4409_v1, %v877_v2 }
 0x458   :  { %v924_v63 = vmul.f32 1.442695, %v908_v13 }
 0x45a   :  { %3189 = vpow2.f32 %v924_v63 }
 0x45d   :  { %v879_v42 = vpop.xlane.xlu1 %878  ;;  %v4528_v25 = vpop.xlane.xlu0 %1356 }
 0x45e   :  { %v909_v52 = vsub.f32 %v4422_v37, %v879_v42 }
 0x460   :  { %v926_v8 = vmul.f32 1.442695, %v909_v52  ;;  %v4531_v30 = vpop.eup %3189 }
 0x461   :  { %956 = vadd.xlane.f32.xlu0 %v4531_v30 }
 0x462   :  { %3191 = vpow2.f32 %v926_v8 }
 0x465   :  { %v4534_v62 = vpop.xlane.xlu2 %1358  ;;  %v885_v63 = vpop.xlane.xlu1 %884 }
 0x466   :  { %v881_v35 = vpop.xlane.xlu0 %880  ;;  %v912_v20 = vsub.f32 %v4430_v39, %v885_v63 }
 0x467   :  { %v910_v44 = vsub.f32 %v4436_v36, %v881_v35 }
 0x468   :  { %v4537_v40 = vpop.eup %3191  ;;  %v932_v36 = vmul.f32 1.442695, %v912_v20 }
 0x469   :  { %v928_v13 = vmul.f32 1.442695, %v910_v44  ;;  %958 = vadd.xlane.f32.xlu2 %v4537_v40 }
 0x46b   :  { %3193 = vpow2.f32 %v928_v13 }
 0x46d   :  { %v883_v1 = vpop.xlane.xlu2 %882 }
 0x46e   :  { %v911_v37 = vsub.f32 %v4442_v46, %v883_v1  ;;  %v887_v2 = vpop.xlane.xlu0 %886 }
 0x46f   :  { %v913_v8 = vsub.f32 %v4444_v41, %v887_v2 }
 0x470   :  { %v930_v42 = vmul.f32 1.442695, %v911_v37 }
 0x471   :  { %v934_v52 = vmul.f32 1.442695, %v913_v8  ;;  %v4542_v43 = vpop.eup %3193 }
 0x472   :  { %3195 = vpow2.f32 %v930_v42  ;;  %960 = vadd.xlane.f32.xlu2 %v4542_v43 }
 0x473   :  { %3197 = vpow2.f32 %v934_v52 }
 0x474   :  { %3199 = vpow2.f32 %v932_v36 }
 0x475   :  { %v4546_v35 = vpop.xlane.xlu1 %1362  ;;  %v4548_v44 = vpop.xlane.xlu2 %1360 }
 0x476   :  { %v895_v13 = vpop.xlane.xlu0 %894 }
 0x477   :  { %v917_v41 = vsub.f32 %v4457_v59, %v895_v13 }
 0x478   :  { %v4550_v46 = vpop.eup %3195 }
 0x479   :  { %v4552_v1 = vpop.eup %3197  ;;  %962 = vadd.xlane.f32.xlu1 %v4550_v46  ;;  %v942_v39 = vmul.f32 1.442695, %v917_v41 }
 0x47a   :  { %966 = vadd.xlane.f32.xlu0 %v4552_v1  ;;  %v4559_v20 = vpop.eup %3199 }
 0x47b   :  { %3201 = vpow2.f32 %v942_v39  ;;  %v1327_v39 = vpop.f32.mrf.mxu0 }
 0x47d   :  { %v891_v63 = vpop.xlane.xlu1 %890  ;;  %v889_v37 = vpop.xlane.xlu2 %888 }
 0x47e   :  { %v915_v2 = vsub.f32 %v4472_v10, %v891_v63  ;;  %v914_v8 = vsub.f32 %v4469_v16, %v889_v37  ;;  %v897_v55 = vpop.xlane.xlu0 %896 }
 0x47f   :  { %v918_v16 = vsub.f32 %v4475_v34, %v897_v55 }
 0x480   :  { %v938_v42 = vmul.f32 1.442695, %v915_v2  ;;  %v936_v52 = vmul.f32 1.442695, %v914_v8  ;;  %v4576_v8 = vadd.f32 %v1327_v39, %v4462_v24 }
 0x481   :  { %964 = vadd.xlane.f32.xlu1 %v4559_v20  ;;  %v4563_v13 = vpop.eup %3201 }
 0x482   :  { %3203 = vpow2.f32 %v938_v42  ;;  %v1385_v42 = vsub.f32 %v4412_v6, %v4525_v12 }
 0x483   :  { %3205 = vpow2.f32 %v936_v52 }
 0x484   :  { %v1402_v52 = vmul.f32 1.442695, %v1385_v42 }
 0x485   :  { %v893_v59 = vpop.xlane.xlu1 %892  ;;  %v899_v37 = vpop.xlane.xlu2 %898 }
 0x486   :  { %v916_v36 = vsub.f32 %v4490_v3, %v893_v59  ;;  %v944_v3 = vmul.f32 1.442695, %v918_v16  ;;  %v1384_v16 = vsub.f32 %v4401_v18, %v4523_v0  ;;  %v907_v39 = vpop.xlane.xlu0 %906 }
 0x488   :  { %v4565_v41 = vpop.eup %3203  ;;  %v940_v10 = vmul.f32 1.442695, %v916_v36 }
 0x489   :  { %v4567_v63 = vpop.eup %3205  ;;  %970 = vadd.xlane.f32.xlu2 %v4565_v41  ;;  %974 = vadd.xlane.f32.xlu1 %v4563_v13 }
 0x48a   :  { %3207 = vpow2.f32 %v940_v10  ;;  %968 = vadd.xlane.f32.xlu0 %v4567_v63  ;;  %v1329_v10 = vpop.f32.mrf.mxu0 }
 0x48b   :  { %3209 = vpow2.f32 %v944_v3 }
 0x48c   :  { %3211 = vpow2.f32 %v1402_v52  ;;  %v1400_v52 = vmul.f32 1.442695, %v1384_v16 }
 0x48d   :  { %v901_v59 = vpop.xlane.xlu2 %900  ;;  %v903_v3 = vpop.xlane.xlu1 %902 }
 0x48e   :  { %v920_v55 = vsub.f32 %v4506_v58, %v901_v59  ;;  %v919_v58 = vsub.f32 %v4493_v23, %v899_v37 }
 0x490   :  { %v4573_v2 = vpop.eup %3207  ;;  %v948_v34 = vmul.f32 1.442695, %v920_v55  ;;  %v946_v12 = vmul.f32 1.442695, %v919_v58  ;;  %v921_v55 = vsub.f32 %v4509_v51, %v903_v3  ;;  %v923_v3 = vsub.f32 %v4496_v60, %v907_v39 }
 0x491   :  { %972 = vadd.xlane.f32.xlu2 %v4573_v2  ;;  %v4582_v36 = vpop.eup %3209 }
 0x492   :  { %1364 = vmax.xlane.f32.xlu0 %v4576_v8  ;;  %v4586_v24 = vpop.eup %3211  ;;  %3213 = vpow2.f32 %v948_v34  ;;  %v1332_v59 = vpop.f32.mrf.mxu0  ;;  %v950_v37 = vmul.f32 1.442695, %v921_v55  ;;  %v4612_v34 = vadd.f32 %v1329_v10, %v4464_v4 }
 0x493   :  { %3215 = vpow2.f32 %v946_v12 }
 0x494   :  { %3217 = vpow2.f32 %v1400_v52 }
 0x495   :  { %v4625_v10 = vpop.xlane.xlu1 %904 }
 0x498   :  { %v4591_v6 = vpop.eup %3213 }
 0x499   :  { %v4607_v42 = vpop.eup %3215 }
 0x49a   :  { %976 = vadd.xlane.f32.xlu0 %v4582_v36  ;;  %v4615_v18 = vpop.eup %3217  ;;  %v4618_v12 = vpop.f32.mrf.mxu0 }
 0x4a2   :  { %1434 = vadd.xlane.f32.xlu0 %v4586_v24  ;;  %1870 = vrot.lane.b32.xlu1 %v4050_v50, %s3628_s8 }
 0x4a9   :  { %1189 = vrot.lane.b32.xlu2 %v4120_v32, %s3624_s27 }
 0x4aa   :  { %980 = vadd.xlane.f32.xlu0 %v4591_v6  ;;  %1183 = vrot.lane.b32.xlu1 %v4100_v47, %s3624_s27 }
 0x4b2   :  { %1185 = vrot.lane.b32.xlu1 %v4104_v15, %s3624_s27 }
 0x4be   :  { %1179 = vrot.lane.b32.xlu0 %v4059_v53, %s3624_s27  ;;  %v4628_v53 = vpop.f32.mrf.mxu0 }
 0x4c6   :  { %1181 = vrot.lane.b32.xlu0 %v4069_v21, %s3624_s27 }
 0x4d2   :  { %978 = vadd.xlane.f32.xlu2 %v4607_v42 }
 0x4d4   :  { %v957_v23 = vpop.xlane.xlu0 %956 }
 0x4d5   :  { %3219 = vrcp.f32 %v957_v23  ;;  %v954_v23 = vmul.f32 1.442695, %v923_v3 }
 0x4d6   :  { %3221 = vpow2.f32 %v950_v37 }
 0x4da   :  { %1366 = vmax.xlane.f32.xlu2 %v4612_v34 }
 0x4db   :  { %v3220_v58 = vpop.eup %3219 }
 0x4dc   :  { %v959_v0 = vpop.xlane.xlu2 %958  ;;  %1432 = vadd.xlane.f32.xlu1 %v4615_v18  ;;  %v1004_v51 = vmul.f32 %v3220_v58, %v4531_v30  ;;  %v4621_v16 = vpop.eup %3221 }
 0x4dd   :  { %3223 = vrcp.f32 %v959_v0 }
 0x4de   :  { %v1020_v55 = vpack.c.bf16 %v1004_v51, %v1004_v51  ;;  %v4634_v51 = vpop.f32.mrf.mxu0 }
 0x4e0   :  { %v1052_v0 = vunpack.c.l.b16 %v1020_v55 }
 0x4e2   :  { %982 = vadd.xlane.f32.xlu2 %v4621_v16 }
 0x4e3   :  { %v3224_v4 = vpop.eup %3223 }
 0x4e4   :  { %v1005_v52 = vmul.f32 %v3224_v4, %v4537_v40 }
 0x4e5   :  { %v961_v37 = vpop.xlane.xlu2 %960 }
 0x4e6   :  { %v1021_v21 = vpack.c.bf16 %v1005_v52, %v1005_v52  ;;  %3225 = vrcp.f32 %v961_v37 }
 0x4e7   :  { %3227 = vpow2.f32 %v954_v23 }
 0x4e8   :  { %v1053_v30 = vunpack.c.l.b16 %v1021_v21 }
 0x4ea   :  { %v1068_v58 = vpack.c.b16 %v1053_v30, %v1052_v0 }
 0x4ec   :  { %v963_v32 = vpop.xlane.xlu1 %962  ;;  %1124 = vmatmul.bf16.vlgmr.msrb.gmra.mxu3 %v1068_v58  ;;  %v3226_v60 = vpop.eup %3225 }
 0x4ed   :  { %3229 = vrcp.f32 %v963_v32  ;;  %v4630_v39 = vpop.eup %3227  ;;  %v1006_v40 = vmul.f32 %v3226_v60, %v4542_v43  ;;  %v967_v4 = vpop.xlane.xlu0 %966  ;;  %v4640_v32 = vadd.f32 %v1332_v59, %v4482_v29 }
 0x4ef   :  { %v1022_v21 = vpack.c.bf16 %v1006_v40, %v1006_v40 }
 0x4f0   :  { %986 = vadd.xlane.f32.xlu0 %v4630_v39 }
 0x4f1   :  { %v1054_v43 = vunpack.c.l.b16 %v1022_v21 }
 0x4f3   :  { %v3230_v3 = vpop.eup %3229 }
 0x4f4   :  { %v965_v52 = vpop.xlane.xlu1 %964  ;;  %v1007_v55 = vmul.f32 %v3230_v3, %v4550_v46  ;;  %v4645_v46 = vpop.f32.mrf.mxu0 }
 0x4f5   :  { %3231 = vrcp.f32 %v965_v52  ;;  %1177 = vrot.lane.b32.xlu1 %v4079_v22, %s3624_s27 }
 0x4f6   :  { %v1023_v23 = vpack.c.bf16 %v1007_v55, %v1007_v55  ;;  %3233 = vrcp.f32 %v967_v4 }
 0x4f8   :  { %1368 = vmax.xlane.f32.xlu0 %v4640_v32  ;;  %v1055_v37 = vunpack.c.l.b16 %v1023_v23 }
 0x4fa   :  { %2442 = vrot.lane.b32.xlu2 %v4050_v50, %s3627_s30  ;;  %v1069_v0 = vpack.c.b16 %v1055_v37, %v1054_v43 }
 0x4fb   :  { %v3232_v30 = vpop.eup %3231 }
 0x4fc   :  { %v971_v58 = vpop.xlane.xlu2 %970  ;;  %1129 = vmatmul.bf16.gmra.mxu3 %v1069_v0  ;;  %v3234_v60 = vpop.eup %3233  ;;  %v1008_v40 = vmul.f32 %v3232_v30, %v4559_v20  ;;  %v1213_v0 = vrot.slane %v4368_v14, 4 }
 0x4fd   :  { %v969_v29 = vpop.xlane.xlu0 %968  ;;  %v1009_v59 = vmul.f32 %v3234_v60, %v4552_v1  ;;  %3235 = vrcp.f32 %v971_v58  ;;  %v4651_v50 = vpop.f32.mrf.mxu0 }
 0x4fe   :  { %v1024_v3 = vpack.c.bf16 %v1008_v40, %v1008_v40  ;;  %3237 = vrcp.f32 %v969_v29  ;;  %v975_v1 = vpop.xlane.xlu1 %974  ;;  %v1566_v29 = vunpack.c.l.b16 %v1213_v0 }
 0x4ff   :  { %v1025_v52 = vpack.c.bf16 %v1009_v59, %v1009_v59 }
 0x500   :  { %v1056_v55 = vunpack.c.l.b16 %v1024_v3 }
 0x501   :  { %v1057_v21 = vunpack.c.l.b16 %v1025_v52  ;;  %v922_v52 = vsub.f32 %v4518_v48, %v4625_v10 }
 0x502   :  { %1175 = vrot.lane.b32.xlu2 %v4085_v27, %s3624_s27 }
 0x503   :  { %v3236_v23 = vpop.eup %3235  ;;  %v1070_v37 = vpack.c.b16 %v1057_v21, %v1056_v55  ;;  %v952_v22 = vmul.f32 1.442695, %v922_v52 }
 0x504   :  { %v973_v4 = vpop.xlane.xlu2 %972  ;;  %v3238_v20 = vpop.eup %3237  ;;  %v1011_v40 = vmul.f32 %v3236_v23, %v4565_v41 }
 0x505   :  { %v4653_v43 = vpop.xlane.xlu0 %1364  ;;  %v1010_v60 = vmul.f32 %v3238_v20, %v4567_v63  ;;  %v4660_v59 = vpop.f32.mrf.mxu0  ;;  %3239 = vrcp.f32 %v973_v4 }
 0x506   :  { %v1027_v21 = vpack.c.bf16 %v1011_v40, %v1011_v40  ;;  %3241 = vrcp.f32 %v975_v1 }
 0x507   :  { %v1026_v14 = vpack.c.bf16 %v1010_v60, %v1010_v60  ;;  %3243 = vpow2.f32 %v952_v22  ;;  %v1387_v60 = vsub.f32 %v4433_v28, %v4534_v62 }
 0x509   :  { %v1058_v63 = vunpack.c.l.b16 %v1026_v14 }
 0x50b   :  { %v3240_v20 = vpop.eup %3239 }
 0x50c   :  { %2444 = vrot.lane.b32.xlu0 %v4071_v9, %s3627_s30  ;;  %v1190_v30 = vpop.permute.xlu2 %1189  ;;  %1134 = vmatmul.bf16.gmra.mxu3 %v1070_v37  ;;  %v1059_v37 = vunpack.c.l.b16 %v1027_v21  ;;  %v3242_v48 = vpop.eup %3241  ;;  %v1406_v21 = vmul.f32 1.442695, %v1387_v60 }
 0x50d   :  { %v1214_v58 = vrot.slane %v1190_v30, 4  ;;  %v977_v27 = vpop.xlane.xlu0 %976  ;;  %v4665_v41 = vpop.f32.mrf.mxu0 }
 0x50e   :  { %v1071_v23 = vpack.c.b16 %v1059_v37, %v1058_v63  ;;  %v4667_v10 = vpop.eup %3243  ;;  %3245 = vpow2.f32 %v1406_v21  ;;  %v4723_v21 = vadd.f32 %v4651_v50, %v4503_v7 }
 0x50f   :  { %v1567_v3 = vunpack.c.l.b16 %v1214_v58  ;;  %v1012_v58 = vmul.f32 %v3240_v20, %v4573_v2 }
 0x511   :  { %v1579_v55 = vpack.c.b16 %v1567_v3, %v1566_v29  ;;  %v1028_v4 = vpack.c.bf16 %v1012_v58, %v1012_v58  ;;  %v4697_v58 = vadd.f32 %v4628_v53, %v4466_v54  ;;  %v4708_v53 = vadd.f32 %v4634_v51, %v4484_v45 }
 0x513   :  { %1596 = vmatpush.bf16.msrb.mxu1 %v1579_v55  ;;  %v1060_v52 = vunpack.c.l.b16 %v1028_v4  ;;  %v1388_v55 = vsub.f32 %v4452_v61, %v4548_v44 }
 0x514   :  { %v1871_v15 = vpop.permute.xlu1 %1870  ;;  %v4685_v62 = vpop.eup %3245 }
 0x515   :  { %3089 = vmatmul.msk.bf16.gmra.mxu0 %vm778_vm5, %v1871_v15  ;;  %v4669_v30 = vpop.xlane.xlu0 %1434  ;;  %v1013_v15 = vmul.f32 %v3242_v48, %v4563_v13  ;;  %v4674_v1 = vpop.f32.mrf.mxu0  ;;  %v4682_v13 = vadd.f32 %v4618_v12, %v4450_v19 }
 0x517   :  { %v1029_v29 = vpack.c.bf16 %v1013_v15, %v1013_v15 }
 0x519   :  { %v1061_v37 = vunpack.c.l.b16 %v1029_v29 }
 0x51b   :  { %v1072_v20 = vpack.c.b16 %v1061_v37, %v1060_v52 }
 0x51c   :  { %v1184_v0 = vpop.permute.xlu1 %1183  ;;  %1139 = vmatmul.bf16.gmra.mxu3 %v1071_v23 }
 0x51d   :  { %v1211_v22 = vrot.slane %v1184_v0, 4  ;;  %v981_v63 = vpop.xlane.xlu0 %980  ;;  %v1408_v0 = vmul.f32 1.442695, %v1388_v55  ;;  %v1949_v28 = vpop.f32.mrf.mxu0 }
 0x51e   :  { %v4701_v60 = vadd.f32 %v1949_v28, %v4406_v33 }
 0x51f   :  { %984 = vadd.xlane.f32.xlu1 %v4667_v10  ;;  %v1564_v14 = vunpack.c.l.b16 %v1211_v22  ;;  %3247 = vpow2.f32 %v1408_v0 }
 0x520   :  { %3249 = vrcp.f32 %v977_v27 }
 0x524   :  { %v1186_v40 = vpop.permute.xlu1 %1185 }
 0x525   :  { %v1212_v3 = vrot.slane %v1186_v40, 4  ;;  %v4688_v44 = vpop.eup %3247  ;;  %v4691_v19 = vpop.f32.mrf.mxu0  ;;  %v1389_v40 = vsub.f32 %v4454_v56, %v4546_v35 }
 0x526   :  { %v3250_v52 = vpop.eup %3249 }
 0x527   :  { %v1565_v2 = vunpack.c.l.b16 %v1212_v3  ;;  %v1014_v56 = vmul.f32 %v3250_v52, %v4582_v36 }
 0x529   :  { %v1578_v23 = vpack.c.b16 %v1565_v2, %v1564_v14  ;;  %v1030_v55 = vpack.c.bf16 %v1014_v56, %v1014_v56 }
 0x52b   :  { %1370 = vmax.xlane.f32.xlu2 %v4682_v13  ;;  %1597 = vmatpush.bf16.msrb.mxu1 %v1578_v23  ;;  %v1062_v37 = vunpack.c.l.b16 %v1030_v55  ;;  %v1386_v23 = vsub.f32 %v4419_v31, %v4528_v25 }
 0x52c   :  { %1144 = vmatmul.bf16.gmra.mxu3 %v1072_v20 }
 0x52d   :  { %v1954_v54 = vpop.f32.mrf.mxu0 }
 0x52e   :  { %v4712_v3 = vadd.f32 %v1954_v54, %v4428_v26 }
 0x530   :  { %v1180_v61 = vpop.permute.xlu0 %1179 }
 0x531   :  { %v1209_v12 = vrot.slane %v1180_v61, 4 }
 0x533   :  { %1438 = vadd.xlane.f32.xlu2 %v4685_v62  ;;  %v1562_v4 = vunpack.c.l.b16 %v1209_v12 }
 0x536   :  { %1440 = vadd.xlane.f32.xlu0 %v4688_v44 }
 0x538   :  { %v1182_v48 = vpop.permute.xlu0 %1181  ;;  %1872 = vrot.lane.b32.xlu1 %v4071_v9, %s3628_s8  ;;  %v1410_v9 = vmul.f32 1.442695, %v1389_v40 }
 0x539   :  { %v1210_v15 = vrot.slane %v1182_v48, 4 }
 0x53a   :  { %3251 = vpow2.f32 %v1410_v9 }
 0x53b   :  { %v1563_v22 = vunpack.c.l.b16 %v1210_v15  ;;  %1372 = vmax.xlane.f32.xlu2 %v4697_v58  ;;  %v4742_v15 = vadd.f32 %v4665_v41, %v4486_v11 }
 0x53d   :  { %v1577_v29 = vpack.c.b16 %v1563_v22, %v1562_v4 }
 0x53e   :  { %1989 = vmax.xlane.f32.xlu0 %v4701_v60 }
 0x53f   :  { %1598 = vmatpush.bf16.msrb.mxu1 %v1577_v29 }
 0x540   :  { %v4716_v35 = vpop.eup %3251 }
 0x543   :  { %1374 = vmax.xlane.f32.xlu2 %v4708_v53 }
 0x545   :  { %v979_v33 = vpop.xlane.xlu2 %978 }
 0x546   :  { %3253 = vrcp.f32 %v979_v33  ;;  %1993 = vmax.xlane.f32.xlu0 %v4712_v3 }
 0x547   :  { %3255 = vrcp.f32 %v981_v63 }
 0x54b   :  { %1442 = vadd.xlane.f32.xlu2 %v4716_v35 }
 0x54c   :  { %v3254_v27 = vpop.eup %3253 }
 0x54d   :  { %v1367_v45 = vpop.xlane.xlu2 %1366  ;;  %v1015_v51 = vmul.f32 %v3254_v27, %v4607_v42  ;;  %v3256_v0 = vpop.eup %3255  ;;  %v4754_v27 = vadd.f32 %v4645_v46, %v4501_v38 }
 0x54e   :  { %v1391_v26 = vsub.f32 %v4612_v34, %v1367_v45  ;;  %v1404_v34 = vmul.f32 1.442695, %v1386_v23  ;;  %v1016_v28 = vmul.f32 %v3256_v0, %v4591_v6  ;;  %v4763_v23 = vadd.f32 %v4660_v59, %v4515_v17 }
 0x54f   :  { %v1031_v14 = vpack.c.bf16 %v1015_v51, %v1015_v51  ;;  %v1433_v63 = vpop.xlane.xlu1 %1432 }
 0x550   :  { %v1414_v2 = vmul.f32 1.442695, %v1391_v26  ;;  %v1032_v50 = vpack.c.bf16 %v1016_v28, %v1016_v28 }
 0x551   :  { %v1063_v36 = vunpack.c.l.b16 %v1031_v14 }
 0x552   :  { %3257 = vpow2.f32 %v1414_v2  ;;  %v1064_v4 = vunpack.c.l.b16 %v1032_v50 }
 0x553   :  { %1378 = vmax.xlane.f32.xlu2 %v4723_v21  ;;  %v1073_v20 = vpack.c.b16 %v1063_v36, %v1062_v37 }
 0x555   :  { %v983_v42 = vpop.xlane.xlu2 %982  ;;  %1149 = vmatmul.bf16.gmra.mxu3 %v1073_v20 }
 0x556   :  { %3259 = vrcp.f32 %v983_v42 }
 0x557   :  { %3261 = vrcp.f32 %v1433_v63 }
 0x558   :  { %v4729_v61 = vpop.eup %3257  ;;  %3263 = vpow2.f32 %v1404_v34 }
 0x559   :  { %3265 = vrcp.f32 %v4669_v30 }
 0x55a   :  { %1840 = vrot.lane.b32.xlu0 %v4056_v57, %s3628_s8 }
 0x55b   :  { %1446 = vadd.xlane.f32.xlu2 %v4729_v61 }
 0x55c   :  { %v3260_v25 = vpop.eup %3259 }
 0x55d   :  { %v4735_v31 = vpop.permute.xlu2 %2442  ;;  %v1017_v7 = vmul.f32 %v3260_v25, %v4621_v16  ;;  %v3262_v48 = vpop.eup %3261  ;;  %v1390_v16 = vsub.f32 %v4576_v8, %v4653_v43 }
 0x55e   :  { %v4738_v6 = vpop.eup %3263  ;;  %v1480_v29 = vmul.f32 %v3262_v48, %v4615_v18 }
 0x55f   :  { %v1033_v12 = vpack.c.bf16 %v1017_v7, %v1017_v7  ;;  %v3266_v40 = vpop.eup %3265  ;;  %v1412_v33 = vmul.f32 1.442695, %v1390_v16 }
 0x560   :  { %v1481_v11 = vmul.f32 %v3266_v40, %v4586_v24  ;;  %v1496_v56 = vpack.c.bf16 %v1480_v29, %v1480_v29 }
 0x561   :  { %v1065_v22 = vunpack.c.l.b16 %v1033_v12  ;;  %3267 = vpow2.f32 %v1412_v33 }
 0x562   :  { %1836 = vrot.lane.b32.xlu0 %v4046_v49, %s3628_s8  ;;  %1436 = vadd.xlane.f32.xlu1 %v4738_v6  ;;  %v1497_v8 = vpack.c.bf16 %v1481_v11, %v1481_v11  ;;  %v1528_v18 = vunpack.c.l.b16 %v1496_v56 }
 0x563   :  { %1382 = vmax.xlane.f32.xlu2 %v4742_v15  ;;  %v1074_v30 = vpack.c.b16 %v1065_v22, %v1064_v4  ;;  %v987_v41 = vpop.xlane.xlu0 %986 }
 0x564   :  { %v1529_v26 = vunpack.c.l.b16 %v1497_v8 }
 0x565   :  { %v1176_v9 = vpop.permute.xlu2 %1175  ;;  %1154 = vmatmul.bf16.gmra.mxu3 %v1074_v30 }
 0x566   :  { %v1207_v54 = vrot.slane %v1176_v9, 4  ;;  %v1544_v14 = vpack.c.b16 %v1529_v26, %v1528_v18 }
 0x567   :  { %v1178_v52 = vpop.permute.xlu1 %1177  ;;  %v4757_v37 = vpop.eup %3267 }
 0x568   :  { %v1208_v45 = vrot.slane %v1178_v52, 4  ;;  %v1560_v43 = vunpack.c.l.b16 %v1207_v54 }
 0x56a   :  { %v1561_v51 = vunpack.c.l.b16 %v1208_v45  ;;  %1376 = vmax.xlane.f32.xlu1 %v4754_v27 }
 0x56b   :  { %v1369_v2 = vpop.xlane.xlu0 %1368 }
 0x56c   :  { %v1576_v55 = vpack.c.b16 %v1561_v51, %v1560_v43  ;;  %v1392_v38 = vsub.f32 %v4640_v32, %v1369_v2  ;;  %v4772_v32 = vadd.f32 %v4674_v1, %v4398_v5  ;;  %v5475_v2 = vld [vmem:[#allocation35_spill] sm:$0xff] }
 0x56e   :  { %1599 = vmatpush.bf16.msrb.mxu1 %v1576_v55  ;;  %v1416_v46 = vmul.f32 1.442695, %v1392_v38 }
 0x56f   :  { %v1125_v24 = vpop.f32.mrf.mxu3 }
 0x570   :  { %3269 = vpow2.f32 %v1416_v46 }
 0x571   :  { %1600 = vmatmul.bf16.vlgmr.msrb.gmra.mxu1 %v1544_v14  ;;  %3271 = vrcp.f32 %v987_v41 }
 0x572   :  { %1444 = vadd.xlane.f32.xlu1 %v4757_v37 }
 0x576   :  { %v4767_v0 = vpop.eup %3269 }
 0x577   :  { %v1127_v36 = vpop.f32.mrf.mxu3  ;;  %v3272_v28 = vpop.eup %3271 }
 0x578   :  { %v1165_v20 = vpack.c.bf16 %v1127_v36, %v1125_v24  ;;  %v1019_v25 = vmul.f32 %v3272_v28, %v4630_v39 }
 0x57a   :  { %3075 = vmatmul.msk.bf16.vlgmr.msra.gmra.mxu2 %vm778_vm5, %v1165_v20  ;;  %1380 = vmax.xlane.f32.xlu1 %v4763_v23  ;;  %v1035_v1 = vpack.c.bf16 %v1019_v25, %v1019_v25 }
 0x57c   :  { %v1067_v40 = vunpack.c.l.b16 %v1035_v1 }
 0x57e   :  { %v4803_v20 = vpop.permute.xlu0 %2444 }
 0x57f   :  { %v1130_v42 = vpop.f32.mrf.mxu3 }
 0x582   :  { %1448 = vadd.xlane.f32.xlu1 %v4767_v0 }
 0x587   :  { %v1132_v34 = vpop.f32.mrf.mxu3 }
 0x588   :  { %v1166_v63 = vpack.c.bf16 %v1132_v34, %v1130_v42 }
 0x58a   :  { %3076 = vmatmul.msk.bf16.gmra.mxu2 %vm778_vm5, %v1166_v63  ;;  %1987 = vmax.xlane.f32.xlu1 %v4772_v32  ;;  %v3128_v63 = vld [vmem:[#allocation8 + $0x8] sm:$0xff] }
 0x58b   :  { %1689 = vmatpush.bf16.msra.mxu3 %v3128_v63 }
 0x58f   :  { %v1135_v17 = vpop.f32.mrf.mxu3 }
 0x592   :  { %v985_v59 = vpop.xlane.xlu1 %984 }
 0x593   :  { %3273 = vrcp.f32 %v985_v59 }
 0x597   :  { %v1137_v7 = vpop.f32.mrf.mxu3 }
 0x598   :  { %v1167_v50 = vpack.c.bf16 %v1137_v7, %v1135_v17 }
 0x599   :  { %v3274_v12 = vpop.eup %3273 }
 0x59a   :  { %3077 = vmatmul.msk.bf16.gmra.mxu2 %vm778_vm5, %v1167_v50  ;;  %v1018_v5 = vmul.f32 %v3274_v12, %v4667_v10 }
 0x59c   :  { %v1034_v48 = vpack.c.bf16 %v1018_v5, %v1018_v5 }
 0x59e   :  { %v1371_v4 = vpop.xlane.xlu2 %1370  ;;  %v1066_v22 = vunpack.c.l.b16 %v1034_v48 }
 0x59f   :  { %v1393_v16 = vsub.f32 %v4682_v13, %v1371_v4  ;;  %v1140_v30 = vpop.f32.mrf.mxu3 }
 0x5a0   :  { %v1075_v29 = vpack.c.b16 %v1067_v40, %v1066_v22 }
 0x5a1   :  { %v1418_v9 = vmul.f32 1.442695, %v1393_v16 }
 0x5a2   :  { %1159 = vmatmul.bf16.gmra.mxu3 %v1075_v29 }
 0x5a3   :  { %3275 = vpow2.f32 %v1418_v9 }
 0x5a6   :  { %v1439_v39 = vpop.xlane.xlu2 %1438 }
 0x5a7   :  { %v1142_v11 = vpop.f32.mrf.mxu3 }
 0x5a8   :  { %v1168_v41 = vpack.c.bf16 %v1142_v11, %v1140_v30 }
 0x5a9   :  { %v4780_v54 = vpop.eup %3275  ;;  %v1441_v7 = vpop.xlane.xlu0 %1440 }
 0x5aa   :  { %1450 = vadd.xlane.f32.xlu2 %v4780_v54  ;;  %v1873_v10 = vpop.permute.xlu1 %1872  ;;  %3078 = vmatmul.msk.bf16.gmra.mxu2 %vm778_vm5, %v1168_v41  ;;  %v1957_v41 = vpop.f32.mrf.mxu0 }
 0x5ab   :  { %3090 = vmatmul.msk.bf16.gmra.mxu0 %vm778_vm5, %v1873_v10 }
 0x5ae   :  { %v1373_v33 = vpop.xlane.xlu2 %1372 }
 0x5af   :  { %v1394_v13 = vsub.f32 %v4697_v58, %v1373_v33  ;;  %v1145_v52 = vpop.f32.mrf.mxu3  ;;  %v5476_v33 = vld [vmem:[#allocation20_spill] sm:$0xff] }
 0x5b1   :  { %v1420_v56 = vmul.f32 1.442695, %v1394_v13 }
 0x5b3   :  { %3277 = vpow2.f32 %v1420_v56 }
 0x5b6   :  { %v1375_v45 = vpop.xlane.xlu2 %1374 }
 0x5b7   :  { %v1395_v8 = vsub.f32 %v4708_v53, %v1375_v45  ;;  %v1147_v43 = vpop.f32.mrf.mxu3  ;;  %v4797_v53 = vadd.f32 %v4691_v19, %v5475_v2  ;;  %v4820_v45 = vld [vmem:[#allocation10 + $0x20] sm:$0xff] }
 0x5b8   :  { %v1169_v51 = vpack.c.bf16 %v1147_v43, %v1145_v52  ;;  %v5477_v2 = vld [vmem:[#allocation16_spill] sm:$0xff] }
 0x5b9   :  { %v4787_v18 = vpop.eup %3277  ;;  %v1422_v55 = vmul.f32 1.442695, %v1395_v8 }
 0x5ba   :  { %1452 = vadd.xlane.f32.xlu2 %v4787_v18  ;;  %3079 = vmatmul.msk.bf16.gmra.mxu2 %vm778_vm5, %v1169_v51 }
 0x5bb   :  { %3279 = vpow2.f32 %v1422_v55 }
 0x5be   :  { %v1443_v26 = vpop.xlane.xlu2 %1442 }
 0x5c1   :  { %v4791_v24 = vpop.eup %3279 }
 0x5c2   :  { %1454 = vadd.xlane.f32.xlu1 %v4791_v24 }
 0x5c6   :  { %v1379_v58 = vpop.xlane.xlu2 %1378 }
 0x5c7   :  { %v1397_v14 = vsub.f32 %v4723_v21, %v1379_v58  ;;  %v1959_v58 = vpop.f32.mrf.mxu0 }
 0x5c9   :  { %v1426_v38 = vmul.f32 1.442695, %v1397_v14 }
 0x5ca   :  { %1991 = vmax.xlane.f32.xlu1 %v4797_v53 }
 0x5cb   :  { %3281 = vpow2.f32 %v1426_v38 }
 0x5cc   :  { %3283 = vrcp.f32 %v1439_v39 }
 0x5ce   :  { %v1447_v46 = vpop.xlane.xlu2 %1446 }
 0x5d1   :  { %v4800_v36 = vpop.eup %3281 }
 0x5d2   :  { %1458 = vadd.xlane.f32.xlu1 %v4800_v36  ;;  %v3284_v34 = vpop.eup %3283 }
 0x5d3   :  { %v1483_v28 = vmul.f32 %v3284_v34, %v4685_v62 }
 0x5d5   :  { %v1437_v42 = vpop.xlane.xlu1 %1436  ;;  %v1499_v5 = vpack.c.bf16 %v1483_v28, %v1483_v28 }
 0x5d6   :  { %3285 = vrcp.f32 %v1437_v42  ;;  %v1383_v21 = vpop.xlane.xlu2 %1382  ;;  %v4829_v42 = vld [vmem:[#allocation10 + $0x28] sm:$0xff] }
 0x5d7   :  { %v1399_v19 = vsub.f32 %v4742_v15, %v1383_v21  ;;  %v1531_v30 = vunpack.c.l.b16 %v1499_v5 }
 0x5d8   :  { %v1150_v17 = vpop.f32.mrf.mxu3 }
 0x5d9   :  { %v1430_v59 = vmul.f32 1.442695, %v1399_v19 }
 0x5db   :  { %3287 = vpow2.f32 %v1430_v59  ;;  %v5478_v59 = vld [vmem:[#allocation19_spill] sm:$0xff] }
 0x5dc   :  { %v3286_v25 = vpop.eup %3285  ;;  %3289 = vrcp.f32 %v1443_v26 }
 0x5dd   :  { %v1377_v50 = vpop.xlane.xlu1 %1376  ;;  %v1482_v12 = vmul.f32 %v3286_v25, %v4738_v6  ;;  %3291 = vrcp.f32 %v1441_v7 }
 0x5de   :  { %v1396_v1 = vsub.f32 %v4754_v27, %v1377_v50 }
 0x5df   :  { %v1498_v48 = vpack.c.bf16 %v1482_v12, %v1482_v12 }
 0x5e0   :  { %v1424_v4 = vmul.f32 1.442695, %v1396_v1  ;;  %v1152_v22 = vpop.f32.mrf.mxu3  ;;  %v5480_v1 = vld [vmem:[#allocation18_spill] sm:$0xff] }
 0x5e1   :  { %v4809_v15 = vpop.eup %3287  ;;  %v1170_v40 = vpack.c.bf16 %v1152_v22, %v1150_v17  ;;  %v1530_v16 = vunpack.c.l.b16 %v1498_v48 }
 0x5e2   :  { %3293 = vpow2.f32 %v1424_v4  ;;  %1462 = vadd.xlane.f32.xlu0 %v4809_v15  ;;  %v3290_v6 = vpop.eup %3289  ;;  %v5481_v4 = vld [vmem:[#allocation17_spill] sm:$0xff] }
 0x5e3   :  { %3080 = vmatmul.msk.bf16.gmra.mxu2 %vm778_vm5, %v1170_v40  ;;  %v1545_v62 = vpack.c.b16 %v1531_v30, %v1530_v16  ;;  %v3292_v29 = vpop.eup %3291  ;;  %v1485_v27 = vmul.f32 %v3290_v6, %v4716_v35  ;;  %v4823_v35 = vadd.f32 %v4820_v45, %v1957_v41 }
 0x5e4   :  { %v1484_v11 = vmul.f32 %v3292_v29, %v4688_v44 }
 0x5e5   :  { %1605 = vmatmul.bf16.gmra.mxu1 %v1545_v62  ;;  %v1445_v10 = vpop.xlane.xlu1 %1444  ;;  %v1501_v13 = vpack.c.bf16 %v1485_v27, %v1485_v27  ;;  %v4856_v27 = vpop.f32.mrf.mxu0 }
 0x5e6   :  { %v1500_v52 = vpack.c.bf16 %v1484_v11, %v1484_v11  ;;  %3295 = vrcp.f32 %v1445_v10 }
 0x5e7   :  { %v1533_v8 = vunpack.c.l.b16 %v1501_v13  ;;  %3297 = vrcp.f32 %v1447_v46  ;;  %v4832_v46 = vadd.f32 %v4829_v42, %v1959_v58 }
 0x5e8   :  { %v4814_v9 = vpop.eup %3293  ;;  %v1155_v39 = vpop.f32.mrf.mxu3  ;;  %v1532_v44 = vunpack.c.l.b16 %v1500_v52 }
 0x5e9   :  { %1456 = vadd.xlane.f32.xlu2 %v4814_v9 }
 0x5ea   :  { %v1546_v55 = vpack.c.b16 %v1533_v8, %v1532_v44 }
 0x5eb   :  { %1838 = vrot.lane.b32.xlu1 %v5476_v33, %s3628_s8 }
 0x5ec   :  { %v3296_v26 = vpop.eup %3295 }
 0x5ed   :  { %v3298_v14 = vpop.eup %3297  ;;  %v1486_v21 = vmul.f32 %v3296_v26, %v4757_v37  ;;  %v1381_v7 = vpop.xlane.xlu1 %1380  ;;  %v5479_v37 = vld [vmem:[#allocation27_spill] sm:$0xff] }
 0x5ee   :  { %v1601_v56 = vpop.f32.mrf.mxu1  ;;  %v1487_v63 = vmul.f32 %v3298_v14, %v4729_v61  ;;  %v1398_v12 = vsub.f32 %v4763_v23, %v1381_v7  ;;  %v5487_v7 = vld [vmem:[#allocation30_spill] sm:$0xff] }
 0x5ef   :  { %v1502_v19 = vpack.c.bf16 %v1486_v21, %v1486_v21  ;;  %v5483_v21 = vld [vmem:[#allocation29_spill] sm:$0xff] }
 0x5f0   :  { %v1157_v43 = vpop.f32.mrf.mxu3  ;;  %v1503_v17 = vpack.c.bf16 %v1487_v63, %v1487_v63  ;;  %v1428_v5 = vmul.f32 1.442695, %v1398_v12  ;;  %v5484_v63 = vld [vmem:[#allocation26_spill] sm:$0xff] }
 0x5f1   :  { %v1171_v51 = vpack.c.bf16 %v1157_v43, %v1155_v39  ;;  %1995 = vmax.xlane.f32.xlu2 %v4823_v35  ;;  %v1534_v28 = vunpack.c.l.b16 %v1502_v19 }
 0x5f2   :  { %v1535_v25 = vunpack.c.l.b16 %v1503_v17  ;;  %3299 = vpow2.f32 %v1428_v5 }
 0x5f3   :  { %3081 = vmatmul.msk.bf16.gmra.mxu2 %vm778_vm5, %v1171_v51  ;;  %v4871_v51 = vld [vmem:[#allocation10 + $0x38] sm:$0xff] }
 0x5f4   :  { %v1547_v50 = vpack.c.b16 %v1535_v25, %v1534_v28  ;;  %v5486_v25 = vld [vmem:[#allocation21_spill] sm:$0xff] }
 0x5f5   :  { %1610 = vmatmul.bf16.gmra.mxu1 %v1546_v55  ;;  %v1449_v48 = vpop.xlane.xlu1 %1448  ;;  %v5482_v55 = vld [vmem:[#allocation22_spill] sm:$0xff] }
 0x5f6   :  { %1826 = vrot.lane.b32.xlu0 %v5477_v2, %s3628_s8  ;;  %v1603_v38 = vpop.f32.mrf.mxu1  ;;  %3301 = vrcp.f32 %v1449_v48 }
 0x5f7   :  { %v1641_v34 = vpack.c.bf16 %v1603_v38, %v1601_v56 }
 0x5f8   :  { %v4847_v61 = vpop.eup %3299 }
 0x5f9   :  { %1997 = vmax.xlane.f32.xlu2 %v4832_v46  ;;  %3063 = vmatmul.msk.bf16.vlgmr.msra.gmra.mxu3 %vm778_vm5, %v1641_v34 }
 0x5fc   :  { %v3302_v22 = vpop.eup %3301 }
 0x5fd   :  { %v1488_v40 = vmul.f32 %v3302_v22, %v4767_v0  ;;  %v4860_v41 = vpop.f32.mrf.mxu2  ;;  %v4862_v13 = vpop.xlane.xlu1 %1987 }
 0x5fe   :  { %2406 = vrot.lane.b32.xlu0 %v5478_v59, %s3627_s30 }
 0x5ff   :  { %v1504_v6 = vpack.c.bf16 %v1488_v40, %v1488_v40 }
 0x601   :  { %v1536_v39 = vunpack.c.l.b16 %v1504_v6  ;;  %v5489_v6 = vld [vmem:[#allocation32_spill] sm:$0xff] }
 0x605   :  { %1615 = vmatmul.bf16.gmra.mxu1 %v1547_v50 }
 0x606   :  { %1822 = vrot.lane.b32.xlu0 %v5479_v37, %s3628_s8 }
 0x60e   :  { %2404 = vrot.lane.b32.xlu0 %v5480_v1, %s3627_s30 }
 0x611   :  { %1834 = vrot.lane.b32.xlu2 %v5478_v59, %s3628_s8 }
 0x615   :  { %1460 = vadd.xlane.f32.xlu1 %v4847_v61 }
 0x619   :  { %1830 = vrot.lane.b32.xlu2 %v5481_v4, %s3628_s8 }
 0x61d   :  { %v1451_v23 = vpop.xlane.xlu2 %1450 }
 0x61e   :  { %3303 = vrcp.f32 %v1451_v23 }
 0x621   :  { %1832 = vrot.lane.b32.xlu2 %v5480_v1, %s3628_s8  ;;  %v5488_v1 = vld [vmem:[#allocation25_spill] sm:$0xff] }
 0x624   :  { %v3304_v16 = vpop.eup %3303 }
 0x625   :  { %v1160_v30 = vpop.f32.mrf.mxu3  ;;  %v1489_v62 = vmul.f32 %v3304_v16, %v4780_v54  ;;  %v1964_v54 = vpop.f32.mrf.mxu0 }
 0x626   :  { %v4874_v44 = vadd.f32 %v4871_v51, %v1964_v54 }
 0x627   :  { %v1505_v29 = vpack.c.bf16 %v1489_v62, %v1489_v62 }
 0x629   :  { %2410 = vrot.lane.b32.xlu2 %v5476_v33, %s3627_s30  ;;  %v1537_v11 = vunpack.c.l.b16 %v1505_v29  ;;  %v4869_v33 = vpop.f32.mrf.mxu2  ;;  %v5490_v29 = vld [vmem:[#allocation24_spill] sm:$0xff] }
 0x62b   :  { %v1548_v10 = vpack.c.b16 %v1537_v11, %v1536_v39 }
 0x62d   :  { %v1453_v52 = vpop.xlane.xlu2 %1452  ;;  %v1162_v0 = vpop.f32.mrf.mxu3  ;;  %1620 = vmatmul.bf16.gmra.mxu1 %v1548_v10 }
 0x62e   :  { %v1172_v56 = vpack.c.bf16 %v1162_v0, %v1160_v30  ;;  %2412 = vrot.lane.b32.xlu1 %v4056_v57, %s3627_s30  ;;  %3305 = vrcp.f32 %v1453_v52  ;;  %v5491_v52 = vld [vmem:[#allocation23_spill] sm:$0xff] }
 0x630   :  { %3082 = vmatmul.msk.bf16.gmra.mxu2 %vm778_vm5, %v1172_v56 }
 0x631   :  { %2402 = vrot.lane.b32.xlu2 %v5481_v4, %s3627_s30  ;;  %v4885_v38 = vpop.f32.mrf.mxu2 }
 0x634   :  { %v3306_v43 = vpop.eup %3305 }
 0x635   :  { %v1455_v8 = vpop.xlane.xlu1 %1454  ;;  %v1490_v57 = vmul.f32 %v3306_v43, %v4787_v18  ;;  %v5485_v18 = vld [vmem:[#allocation28_spill] sm:$0xff] }
 0x636   :  { %3307 = vrcp.f32 %v1455_v8  ;;  %1828 = vrot.lane.b32.xlu1 %v5482_v55, %s3628_s8 }
 0x637   :  { %v1506_v14 = vpack.c.bf16 %v1490_v57, %v1490_v57 }
 0x638   :  { %2001 = vmax.xlane.f32.xlu0 %v4874_v44 }
 0x639   :  { %1818 = vrot.lane.b32.xlu2 %v4100_v47, %s3628_s8  ;;  %v1538_v19 = vunpack.c.l.b16 %v1506_v14  ;;  %v4895_v28 = vpop.f32.mrf.mxu2  ;;  %v4936_v14 = vld [vmem:[#allocation10 + $0x30] sm:$0xff] }
 0x63c   :  { %v3308_v26 = vpop.eup %3307 }
 0x63d   :  { %v1491_v58 = vmul.f32 %v3308_v26, %v4791_v24  ;;  %v4893_v24 = vpop.xlane.xlu0 %1989 }
 0x63e   :  { %2408 = vrot.lane.b32.xlu1 %v4046_v49, %s3627_s30  ;;  %v4899_v49 = vpop.xlane.xlu1 %1991 }
 0x63f   :  { %v1507_v34 = vpack.c.bf16 %v1491_v58, %v1491_v58 }
 0x640   :  { %3103 = vmatmul.msk.bf16.vlgmr.msrb.gmra.mxu2 %vm778_vm5, %v5483_v21  ;;  %v5492_v21 = vld [vmem:[#allocation33_spill] sm:$0xff] }
 0x641   :  { %1820 = vrot.lane.b32.xlu2 %v5484_v63, %s3628_s8  ;;  %v1539_v17 = vunpack.c.l.b16 %v1507_v34  ;;  %v4909_v12 = vpop.f32.mrf.mxu2 }
 0x643   :  { %v1549_v59 = vpack.c.b16 %v1539_v17, %v1538_v19 }
 0x645   :  { %1625 = vmatmul.bf16.gmra.mxu1 %v1549_v59  ;;  %v4905_v50 = vpop.xlane.xlu0 %1993 }
 0x646   :  { %1824 = vrot.lane.b32.xlu1 %v5485_v18, %s3628_s8  ;;  %v1459_v5 = vpop.xlane.xlu1 %1458 }
 0x647   :  { %3309 = vrcp.f32 %v1459_v5 }
 0x649   :  { %2398 = vrot.lane.b32.xlu2 %v5477_v2, %s3627_s30  ;;  %v4917_v22 = vpop.f32.mrf.mxu2 }
 0x64c   :  { %1814 = vrot.lane.b32.xlu0 %v5486_v25, %s3628_s8 }
 0x64d   :  { %v1841_v2 = vpop.permute.xlu0 %1840  ;;  %v3310_v23 = vpop.eup %3309 }
 0x64e   :  { %v1857_v48 = vrot.slane %v1841_v2, 4 }
 0x650   :  { %3104 = vmatmul.msk.bf16.gmra.mxu2 %vm778_vm5, %v5487_v7  ;;  %v2210_v30 = vunpack.c.l.b16 %v1857_v48 }
 0x651   :  { %2400 = vrot.lane.b32.xlu2 %v5482_v55, %s3627_s30  ;;  %v4929_v8 = vpop.f32.mrf.mxu2 }
 0x654   :  { %2394 = vrot.lane.b32.xlu0 %v5479_v37, %s3627_s30  ;;  %v1493_v37 = vmul.f32 %v3310_v23, %v4800_v36 }
 0x655   :  { %v1837_v34 = vpop.permute.xlu0 %1836 }
 0x656   :  { %v1509_v56 = vpack.c.bf16 %v1493_v37, %v1493_v37  ;;  %v1855_v17 = vrot.slane %v1837_v34, 4 }
 0x658   :  { %v1541_v36 = vunpack.c.l.b16 %v1509_v56  ;;  %v2208_v5 = vunpack.c.l.b16 %v1855_v17 }
 0x659   :  { %1810 = vrot.lane.b32.xlu2 %v5488_v1, %s3628_s8 }
 0x65c   :  { %v1457_v4 = vpop.xlane.xlu2 %1456  ;;  %2390 = vrot.lane.b32.xlu0 %v4100_v47, %s3627_s30 }
 0x65d   :  { %3311 = vrcp.f32 %v1457_v4  ;;  %v1839_v40 = vpop.permute.xlu1 %1838 }
 0x65e   :  { %v1856_v16 = vrot.slane %v1839_v40, 4 }
 0x660   :  { %v2209_v62 = vunpack.c.l.b16 %v1856_v16  ;;  %3105 = vmatmul.msk.bf16.gmra.mxu2 %vm778_vm5, %v5489_v6  ;;  %v1463_v16 = vpop.xlane.xlu0 %1462  ;;  %v2020_v6 = vsub.f32 %v4701_v60, %v4893_v24  ;;  %v4958_v24 = vld [vmem:[#allocation10 + $0x40] sm:$0xff] }
 0x661   :  { %1812 = vrot.lane.b32.xlu2 %v5490_v29, %s3628_s8  ;;  %3313 = vrcp.f32 %v1463_v16 }
 0x662   :  { %v2218_v39 = vpack.c.b16 %v2210_v30, %v2209_v62  ;;  %v1606_v11 = vpop.f32.mrf.mxu1  ;;  %v5493_v30 = vld [vmem:[#allocation31_spill] sm:$0xff] }
 0x663   :  { %v3312_v10 = vpop.eup %3311 }
 0x664   :  { %v4924_v47 = vpop.xlane.xlu2 %1995  ;;  %2388 = vrot.lane.b32.xlu0 %v5491_v52, %s3627_s30  ;;  %2227 = vmatpush.bf16.msra.mxu1 %v2218_v39  ;;  %v1492_v0 = vmul.f32 %v3312_v10, %v4814_v9  ;;  %v4940_v9 = vadd.f32 %v4936_v14, %v4856_v27 }
 0x666   :  { %v1508_v54 = vpack.c.bf16 %v1492_v0, %v1492_v0  ;;  %v2037_v0 = vmul.f32 1.442695, %v2020_v6 }
 0x668   :  { %v1540_v43 = vunpack.c.l.b16 %v1508_v54 }
 0x669   :  { %2392 = vrot.lane.b32.xlu2 %v5484_v63, %s3627_s30  ;;  %v4945_v63 = vpop.f32.mrf.mxu2 }
 0x66a   :  { %v1608_v55 = vpop.f32.mrf.mxu1  ;;  %v1550_v57 = vpack.c.b16 %v1541_v36, %v1540_v43  ;;  %v3314_v36 = vpop.eup %3313 }
 0x66b   :  { %v1642_v26 = vpack.c.bf16 %v1608_v55, %v1606_v11  ;;  %v1967_v55 = vpop.f32.mrf.mxu0 }
 0x66c   :  { %v4933_v58 = vpop.xlane.xlu2 %1997  ;;  %1630 = vmatmul.bf16.gmra.mxu1 %v1550_v57  ;;  %v4961_v34 = vadd.f32 %v4958_v24, %v1967_v55 }
 0x66d   :  { %3064 = vmatmul.msk.bf16.gmra.mxu3 %vm778_vm5, %v1642_v26 }
 0x670   :  { %3106 = vmatmul.msk.bf16.gmra.mxu2 %vm778_vm5, %v5492_v21  ;;  %1999 = vmax.xlane.f32.xlu1 %v4940_v9 }
 0x671   :  { %v4947_v23 = vpop.f32.mrf.mxu2 }
 0x672   :  { %v1611_v19 = vpop.f32.mrf.mxu1 }
 0x674   :  { %v1835_v59 = vpop.permute.xlu2 %1834 }
 0x675   :  { %v1854_v7 = vrot.slane %v1835_v59, 4 }
 0x677   :  { %v2207_v2 = vunpack.c.l.b16 %v1854_v7 }
 0x679   :  { %v2217_v48 = vpack.c.b16 %v2208_v5, %v2207_v2  ;;  %v4954_v11 = vpop.f32.mrf.mxu2 }
 0x67a   :  { %v1613_v4 = vpop.f32.mrf.mxu1 }
 0x67b   :  { %v1643_v27 = vpack.c.bf16 %v1613_v4, %v1611_v19  ;;  %2228 = vmatpush.bf16.msra.mxu1 %v2217_v48  ;;  %v1495_v19 = vmul.f32 %v3314_v36, %v4809_v15  ;;  %v1827_v48 = vpop.permute.xlu0 %1826 }
 0x67c   :  { %v1831_v40 = vpop.permute.xlu2 %1830  ;;  %v1850_v36 = vrot.slane %v1827_v48, 4 }
 0x67d   :  { %3065 = vmatmul.msk.bf16.gmra.mxu3 %vm778_vm5, %v1643_v27  ;;  %v1852_v37 = vrot.slane %v1831_v40, 4  ;;  %v1511_v5 = vpack.c.bf16 %v1495_v19, %v1495_v19 }
 0x67f   :  { %v2205_v56 = vunpack.c.l.b16 %v1852_v37  ;;  %v1543_v40 = vunpack.c.l.b16 %v1511_v5 }
 0x680   :  { %3107 = vmatmul.msk.bf16.gmra.mxu2 %vm778_vm5, %v5493_v30 }
 0x681   :  { %v4964_v17 = vpop.f32.mrf.mxu2 }
 0x682   :  { %v1616_v62 = vpop.f32.mrf.mxu1 }
 0x684   :  { %v1833_v39 = vpop.permute.xlu2 %1832 }
 0x685   :  { %v1853_v10 = vrot.slane %v1833_v39, 4 }
 0x687   :  { %v2206_v54 = vunpack.c.l.b16 %v1853_v10 }
 0x688   :  { %v1461_v43 = vpop.xlane.xlu1 %1460 }
 0x689   :  { %v2216_v57 = vpack.c.b16 %v2206_v54, %v2205_v56  ;;  %3315 = vrcp.f32 %v1461_v43  ;;  %1816 = vrot.lane.b32.xlu1 %v5491_v52, %s3628_s8  ;;  %v5494_v52 = vld [vmem:[#allocation34_spill] sm:$0xff]  ;;  %v4976_v30 = vpop.f32.mrf.mxu2 }
 0x68a   :  { %v1618_v26 = vpop.f32.mrf.mxu1  ;;  %3317 = vpow2.f32 %v2037_v0 }
 0x68b   :  { %v1644_v60 = vpack.c.bf16 %v1618_v26, %v1616_v62  ;;  %2229 = vmatpush.bf16.msra.mxu1 %v2216_v57  ;;  %v2203_v26 = vunpack.c.l.b16 %v1850_v36 }
 0x68c   :  { %v2411_v21 = vpop.permute.xlu2 %2410 }
 0x68d   :  { %3066 = vmatmul.msk.bf16.gmra.mxu3 %vm778_vm5, %v1644_v60  ;;  %v2428_v6 = vrot.slane %v2411_v21, 4 }
 0x68e   :  { %2003 = vmax.xlane.f32.xlu0 %v4961_v34 }
 0x68f   :  { %v3316_v59 = vpop.eup %3315  ;;  %v2781_v10 = vunpack.c.l.b16 %v2428_v6 }
 0x690   :  { %3108 = vmatmul.msk.bf16.gmra.mxu2 %vm778_vm5, %v5494_v52  ;;  %v1494_v7 = vmul.f32 %v3316_v59, %v4847_v61  ;;  %v4971_v2 = vpop.eup %3317  ;;  %v2407_v61 = vpop.permute.xlu0 %2406 }
 0x691   :  { %2396 = vrot.lane.b32.xlu1 %v5485_v18, %s3627_s30  ;;  %v4982_v37 = vpop.f32.mrf.mxu2  ;;  %v2426_v59 = vrot.slane %v2407_v61, 4 }
 0x692   :  { %2069 = vadd.xlane.f32.xlu2 %v4971_v2  ;;  %v1510_v15 = vpack.c.bf16 %v1494_v7, %v1494_v7 }
 0x694   :  { %v2403_v4 = vpop.permute.xlu2 %2402  ;;  %v1542_v27 = vunpack.c.l.b16 %v1510_v15 }
 0x695   :  { %v2424_v5 = vrot.slane %v2403_v4, 4 }
 0x696   :  { %v1551_v16 = vpack.c.b16 %v1543_v40, %v1542_v27  ;;  %v2779_v27 = vunpack.c.l.b16 %v2426_v59 }
 0x698   :  { %1635 = vmatmul.bf16.gmra.mxu1 %v1551_v16  ;;  %v1823_v43 = vpop.permute.xlu0 %1822 }
 0x699   :  { %2386 = vrot.lane.b32.xlu1 %v5486_v25, %s3627_s30  ;;  %v4984_v60 = vpop.f32.mrf.mxu2  ;;  %v1848_v61 = vrot.slane %v1823_v43, 4 }
 0x69c   :  { %v1819_v62 = vpop.permute.xlu2 %1818 }
 0x69d   :  { %v1846_v59 = vrot.slane %v1819_v62, 4 }
 0x6a0   :  { %3109 = vmatmul.msk.bf16.gmra.mxu2 %vm778_vm5, %v4735_v31  ;;  %v2413_v18 = vpop.permute.xlu1 %2412  ;;  %v2405_v52 = vpop.permute.xlu0 %2404 }
 0x6a1   :  { %v2429_v39 = vrot.slane %v2413_v18, 4  ;;  %v2425_v40 = vrot.slane %v2405_v52, 4 }
 0x6a3   :  { %v2782_v0 = vunpack.c.l.b16 %v2429_v39  ;;  %v2778_v36 = vunpack.c.l.b16 %v2425_v40  ;;  %v4995_v40 = vld [vmem:[#allocation10 + $0x48] sm:$0xff] }
 0x6a4   :  { %v1821_v56 = vpop.permute.xlu2 %1820 }
 0x6a5   :  { %v2790_v54 = vpack.c.b16 %v2782_v0, %v2781_v10  ;;  %v2777_v10 = vunpack.c.l.b16 %v2424_v5  ;;  %v2019_v5 = vsub.f32 %v4772_v32, %v4862_v13  ;;  %v2022_v32 = vsub.f32 %v4712_v3, %v4905_v50  ;;  %v3451_v13 = vld [vmem:[#allocation10] sm:$0xff] }
 0x6a7   :  { %2799 = vmatpush.bf16.msrb.mxu0 %v2790_v54  ;;  %v2788_v4 = vpack.c.b16 %v2778_v36, %v2777_v10 }
 0x6a8   :  { %v1829_v55 = vpop.permute.xlu1 %1828 }
 0x6a9   :  { %v1851_v57 = vrot.slane %v1829_v55, 4 }
 0x6aa   :  { %v1621_v25 = vpop.f32.mrf.mxu1 }
 0x6ab   :  { %v2204_v21 = vunpack.c.l.b16 %v1851_v57  ;;  %v1847_v57 = vrot.slane %v1821_v56, 4  ;;  %v2035_v56 = vmul.f32 1.442695, %v2019_v5 }
 0x6ac   :  { %v2399_v19 = vpop.permute.xlu2 %2398 }
 0x6ad   :  { %v2215_v31 = vpack.c.b16 %v2204_v21, %v2203_v26  ;;  %v2422_v55 = vrot.slane %v2399_v19, 4  ;;  %v1969_v19 = vpop.f32.mrf.mxu0  ;;  %3319 = vpow2.f32 %v2035_v56 }
 0x6ae   :  { %v4998_v62 = vadd.f32 %v4995_v40, %v1969_v19 }
 0x6af   :  { %2230 = vmatpush.bf16.msra.mxu1 %v2215_v31  ;;  %v2201_v31 = vunpack.c.l.b16 %v1848_v61 }
 0x6b0   :  { %v2409_v7 = vpop.permute.xlu1 %2408  ;;  %3110 = vmatmul.msk.bf16.gmra.mxu2 %vm778_vm5, %v4803_v20 }
 0x6b1   :  { %v2427_v15 = vrot.slane %v2409_v7, 4 }
 0x6b2   :  { %v1623_v48 = vpop.f32.mrf.mxu1 }
 0x6b3   :  { %v2780_v16 = vunpack.c.l.b16 %v2427_v15  ;;  %v1645_v6 = vpack.c.bf16 %v1623_v48, %v1621_v25  ;;  %v4988_v18 = vpop.f32.mrf.mxu2  ;;  %v2775_v25 = vunpack.c.l.b16 %v2422_v55  ;;  %v2200_v15 = vunpack.c.l.b16 %v1847_v57 }
 0x6b4   :  { %v2401_v39 = vpop.permute.xlu2 %2400  ;;  %v2023_v57 = vsub.f32 %v4823_v35, %v4924_v47  ;;  %v5030_v35 = vpop.xlane.xlu0 %2001 }
 0x6b5   :  { %v2789_v0 = vpack.c.b16 %v2780_v16, %v2779_v27  ;;  %v2423_v54 = vrot.slane %v2401_v39, 4  ;;  %3067 = vmatmul.msk.bf16.gmra.mxu3 %vm778_vm5, %v1645_v6  ;;  %v2199_v27 = vunpack.c.l.b16 %v1846_v59 }
 0x6b6   :  { %v2043_v59 = vmul.f32 1.442695, %v2023_v57 }
 0x6b7   :  { %2800 = vmatpush.bf16.msrb.mxu0 %v2789_v0  ;;  %v2776_v26 = vunpack.c.l.b16 %v2423_v54  ;;  %v2213_v16 = vpack.c.b16 %v2200_v15, %v2199_v27  ;;  %v2041_v0 = vmul.f32 1.442695, %v2022_v32  ;;  %v5006_v54 = vpop.eup %3319  ;;  %v3455_v15 = vld [vmem:[#allocation10 + $0x18] sm:$0xff] }
 0x6b8   :  { %v1825_v20 = vpop.permute.xlu1 %1824 }
 0x6b9   :  { %v1849_v21 = vrot.slane %v1825_v20, 4  ;;  %v2787_v43 = vpack.c.b16 %v2776_v26, %v2775_v25  ;;  %3321 = vpow2.f32 %v2041_v0  ;;  %v3452_v20 = vld [vmem:[#allocation10 + $0x8] sm:$0xff]  ;;  %v3453_v26 = vld [vmem:[#allocation10 + $0x10] sm:$0xff] }
 0x6ba   :  { %v5021_v25 = vld [vmem:[#allocation10 + $0x50] sm:$0xff]  ;;  %3323 = vpow2.f32 %v2043_v59 }
 0x6bb   :  { %v2202_v52 = vunpack.c.l.b16 %v1849_v21  ;;  %v4991_v7 = vpop.f32.mrf.mxu2  ;;  %2801 = vmatpush.bf16.msrb.mxu0 %v2788_v4 }
 0x6bc   :  { %5495 = vst [vmem:[#allocation35_spill] sm:$0xff] %v4991_v7 }
 0x6bd   :  { %v2214_v48 = vpack.c.b16 %v2202_v52, %v2201_v31  ;;  %v1972_v31 = vpop.f32.mrf.mxu0 }
 0x6be   :  { %v5024_v52 = vadd.f32 %v5021_v25, %v1972_v31  ;;  %v1815_v19 = vpop.permute.xlu0 %1814 }
 0x6bf   :  { %2231 = vmatpush.bf16.msra.mxu1 %v2214_v48  ;;  %2802 = vmatpush.bf16.msrb.mxu0 %v2787_v43  ;;  %v5013_v3 = vpop.eup %3321 }
 0x6c0   :  { %v5032_v47 = vpop.eup %3323 }
 0x6c2   :  { %v1626_v6 = vpop.f32.mrf.mxu1 }
 0x6c3   :  { %v2519_v39 = vpop.f32.mrf.mxu2  ;;  %2005 = vmax.xlane.f32.xlu1 %v4998_v62  ;;  %2232 = vmatpush.bf16.msra.mxu1 %v2213_v16 }
 0x6c4   :  { %v5003_v10 = vadd.f32 %v3451_v13, %v2519_v39 }
 0x6c6   :  { %2559 = vmax.xlane.f32.xlu0 %v5003_v10  ;;  %v2395_v32 = vpop.permute.xlu0 %2394 }
 0x6ca   :  { %v1628_v61 = vpop.f32.mrf.mxu1 }
 0x6cb   :  { %v1646_v36 = vpack.c.bf16 %v1628_v61, %v1626_v6  ;;  %v2521_v55 = vpop.f32.mrf.mxu2  ;;  %2067 = vadd.xlane.f32.xlu1 %v5006_v54  ;;  %v1811_v6 = vpop.permute.xlu2 %1810 }
 0x6cc   :  { %v5009_v4 = vadd.f32 %v3452_v20, %v2521_v55  ;;  %v1844_v55 = vrot.slane %v1815_v19, 4 }
 0x6cd   :  { %3068 = vmatmul.msk.bf16.gmra.mxu3 %vm778_vm5, %v1646_v36 }
 0x6ce   :  { %2561 = vmax.xlane.f32.xlu2 %v5009_v4  ;;  %v2391_v59 = vpop.permute.xlu0 %2390 }
 0x6d3   :  { %v2524_v50 = vpop.f32.mrf.mxu2  ;;  %2073 = vadd.xlane.f32.xlu1 %v5013_v3 }
 0x6d4   :  { %v5018_v21 = vadd.f32 %v3453_v26, %v2524_v50 }
 0x6d6   :  { %2563 = vmax.xlane.f32.xlu0 %v5018_v21 }
 0x6db   :  { %v2526_v5 = vpop.f32.mrf.mxu2  ;;  %2007 = vmax.xlane.f32.xlu1 %v5024_v52 }
 0x6dc   :  { %v5027_v43 = vadd.f32 %v3455_v15, %v2526_v5  ;;  %v1842_v5 = vrot.slane %v1811_v6, 4 }
 0x6de   :  { %2565 = vmax.xlane.f32.xlu2 %v5027_v43 }
 0x6e3   :  { %v5034_v48 = vpop.f32.mrf.mxu2  ;;  %2075 = vadd.xlane.f32.xlu1 %v5032_v47  ;;  %v5041_v0 = vpop.xlane.xlu1 %1999 }
 0x6e9   :  { %v1631_v27 = vpop.f32.mrf.mxu1 }
 0x6eb   :  { %v2531_v56 = vpop.f32.mrf.mxu2 }
 0x6ec   :  { %v5038_v16 = vadd.f32 %v4829_v42, %v2531_v56  ;;  %v1813_v42 = vpop.permute.xlu2 %1812 }
 0x6ed   :  { %v1843_v57 = vrot.slane %v1813_v42, 4  ;;  %v2418_v42 = vrot.slane %v2391_v59, 4 }
 0x6ee   :  { %2569 = vmax.xlane.f32.xlu0 %v5038_v16 }
 0x6f1   :  { %v1633_v39 = vpop.f32.mrf.mxu1 }
 0x6f2   :  { %v1647_v13 = vpack.c.bf16 %v1633_v39, %v1631_v27  ;;  %v2196_v27 = vunpack.c.l.b16 %v1843_v57  ;;  %v2195_v39 = vunpack.c.l.b16 %v1842_v5  ;;  %v2389_v57 = vpop.permute.xlu0 %2388 }
 0x6f3   :  { %v2534_v61 = vpop.f32.mrf.mxu2 }
 0x6f4   :  { %v5044_v36 = vadd.f32 %v4936_v14, %v2534_v61  ;;  %3069 = vmatmul.msk.bf16.gmra.mxu3 %vm778_vm5, %v1647_v13  ;;  %v2197_v14 = vunpack.c.l.b16 %v1844_v55  ;;  %v2420_v13 = vrot.slane %v2395_v32, 4  ;;  %v2211_v7 = vpack.c.b16 %v2196_v27, %v2195_v39 }
 0x6f6   :  { %2571 = vmax.xlane.f32.xlu0 %v5044_v36  ;;  %2382 = vrot.lane.b32.xlu2 %v5488_v1, %s3627_s30  ;;  %v2393_v1 = vpop.permute.xlu2 %2392 }
 0x6f7   :  { %v2419_v6 = vrot.slane %v2393_v1, 4 }
 0x6f9   :  { %v2772_v32 = vunpack.c.l.b16 %v2419_v6 }
 0x6fb   :  { %v2536_v20 = vpop.f32.mrf.mxu2  ;;  %v1817_v50 = vpop.permute.xlu1 %1816 }
 0x6fc   :  { %v5051_v26 = vadd.f32 %v4871_v51, %v2536_v20  ;;  %v1845_v31 = vrot.slane %v1817_v50, 4  ;;  %v2773_v50 = vunpack.c.l.b16 %v2420_v13 }
 0x6fe   :  { %v2198_v15 = vunpack.c.l.b16 %v1845_v31  ;;  %2573 = vmax.xlane.f32.xlu1 %v5051_v26  ;;  %v2771_v31 = vunpack.c.l.b16 %v2418_v42  ;;  %v1974_v42 = vpop.f32.mrf.mxu0 }
 0x700   :  { %v2212_v56 = vpack.c.b16 %v2198_v15, %v2197_v14  ;;  %v2417_v14 = vrot.slane %v2389_v57, 4  ;;  %v2785_v15 = vpack.c.b16 %v2772_v32, %v2771_v31  ;;  %v5084_v32 = vld [vmem:[#allocation10 + $0x68] sm:$0xff] }
 0x702   :  { %2233 = vmatpush.bf16.msra.mxu1 %v2212_v56  ;;  %v2770_v27 = vunpack.c.l.b16 %v2417_v14 }
 0x703   :  { %v2539_v19 = vpop.f32.mrf.mxu2  ;;  %v2397_v61 = vpop.permute.xlu1 %2396 }
 0x704   :  { %v5055_v51 = vadd.f32 %v4958_v24, %v2539_v19  ;;  %v2421_v20 = vrot.slane %v2397_v61, 4  ;;  %v5064_v19 = vadd.f32 %v4820_v45, %v5034_v48  ;;  %v5076_v45 = vpop.xlane.xlu0 %2003 }
 0x706   :  { %v2774_v55 = vunpack.c.l.b16 %v2421_v20  ;;  %2575 = vmax.xlane.f32.xlu1 %v5055_v51  ;;  %2234 = vmatpush.bf16.msra.mxu1 %v2211_v7  ;;  %v2021_v7 = vsub.f32 %v4797_v53, %v4899_v49  ;;  %v5073_v53 = vpop.f32.mrf.mxu0 }
 0x708   :  { %v2786_v5 = vpack.c.b16 %v2774_v55, %v2773_v50  ;;  %v2039_v1 = vmul.f32 1.442695, %v2021_v7  ;;  %v3456_v50 = vld [vmem:[#allocation10 + $0x58] sm:$0xff]  ;;  %v2070_v55 = vpop.xlane.xlu2 %2069 }
 0x709   :  { %v5071_v6 = vadd.f32 %v3456_v50, %v1974_v42 }
 0x70a   :  { %2384 = vrot.lane.b32.xlu0 %v5490_v29, %s3627_s30  ;;  %2803 = vmatpush.bf16.msrb.mxu0 %v2786_v5  ;;  %3325 = vpow2.f32 %v2039_v1 }
 0x70b   :  { %v2387_v59 = vpop.permute.xlu1 %2386  ;;  %v2541_v49 = vpop.f32.mrf.mxu2  ;;  %3327 = vrcp.f32 %v2070_v55 }
 0x70c   :  { %v2416_v24 = vrot.slane %v2387_v59, 4  ;;  %v5079_v48 = vadd.f32 %v4995_v40, %v2541_v49 }
 0x70e   :  { %v2769_v56 = vunpack.c.l.b16 %v2416_v24  ;;  %2804 = vmatpush.bf16.msrb.mxu0 %v2785_v15  ;;  %v1979_v31 = vpop.f32.mrf.mxu0 }
 0x70f   :  { %v5087_v14 = vadd.f32 %v5084_v32, %v1979_v31 }
 0x710   :  { %v2784_v39 = vpack.c.b16 %v2770_v27, %v2769_v56  ;;  %v5068_v20 = vpop.eup %3325 }
 0x711   :  { %v3328_v24 = vpop.eup %3327 }
 0x712   :  { %2805 = vmatpush.bf16.msrb.mxu0 %v2784_v39  ;;  %v2116_v56 = vmul.f32 %v3328_v24, %v4971_v2 }
 0x713   :  { %v2544_v42 = vpop.f32.mrf.mxu2 }
 0x715   :  { %v1636_v13 = vpop.f32.mrf.mxu1 }
 0x71d   :  { %v1638_v61 = vpop.f32.mrf.mxu1 }
 0x71e   :  { %v1648_v29 = vpack.c.bf16 %v1638_v61, %v1636_v13  ;;  %v2024_v61 = vsub.f32 %v4832_v46, %v4933_v58 }
 0x71f   :  { %2567 = vmax.xlane.f32.xlu2 %v5064_v19 }
 0x720   :  { %3070 = vmatmul.msk.bf16.gmra.mxu3 %vm778_vm5, %v1648_v29  ;;  %v2045_v55 = vmul.f32 1.442695, %v2024_v61  ;;  %v2026_v61 = vsub.f32 %v4874_v44, %v5030_v35  ;;  %v1982_v35 = vpop.f32.mrf.mxu0 }
 0x727   :  { %2071 = vadd.xlane.f32.xlu2 %v5068_v20 }
 0x72f   :  { %2009 = vmax.xlane.f32.xlu2 %v5071_v6 }
 0x734   :  { %2577 = vmax.xlane.f32.xlu0 %v5079_v48 }
 0x736   :  { %v5082_v57 = vpop.xlane.xlu1 %2005 }
 0x739   :  { %v2560_v5 = vpop.xlane.xlu0 %2559 }
 0x73a   :  { %v2591_v59 = vsub.f32 %v5003_v10, %v2560_v5  ;;  %v2132_v10 = vpack.c.bf16 %v2116_v56, %v2116_v56  ;;  %v2025_v56 = vsub.f32 %v4940_v9, %v5041_v0  ;;  %v5129_v0 = vld [vmem:[#allocation10 + $0x60] sm:$0xff] }
 0x73c   :  { %v2607_v15 = vmul.f32 1.442695, %v2591_v59  ;;  %2013 = vmax.xlane.f32.xlu0 %v5087_v14  ;;  %v2164_v2 = vunpack.c.l.b16 %v2132_v10  ;;  %v5101_v59 = vadd.f32 %v5021_v25, %v2544_v42 }
 0x73e   :  { %3329 = vpow2.f32 %v2607_v15  ;;  %v2068_v40 = vpop.xlane.xlu1 %2067 }
 0x73f   :  { %3331 = vrcp.f32 %v2068_v40 }
 0x741   :  { %v2562_v27 = vpop.xlane.xlu2 %2561 }
 0x742   :  { %v2592_v39 = vsub.f32 %v5009_v4, %v2562_v27 }
 0x744   :  { %v5093_v13 = vpop.eup %3329  ;;  %v2609_v7 = vmul.f32 1.442695, %v2592_v39  ;;  %v2546_v39 = vpop.f32.mrf.mxu2 }
 0x745   :  { %v3332_v1 = vpop.eup %3331  ;;  %2639 = vadd.xlane.f32.xlu1 %v5093_v13 }
 0x746   :  { %v2115_v29 = vmul.f32 %v3332_v1, %v5006_v54  ;;  %3333 = vpow2.f32 %v2609_v7  ;;  %v5112_v27 = vpop.xlane.xlu1 %2073  ;;  %v2047_v7 = vmul.f32 1.442695, %v2025_v56  ;;  %v5118_v1 = vadd.f32 %v3456_v50, %v2546_v39 }
 0x747   :  { %3335 = vpow2.f32 %v2045_v55  ;;  %v5133_v50 = vadd.f32 %v5129_v0, %v5073_v53  ;;  %v2028_v39 = vsub.f32 %v4998_v62, %v5082_v57 }
 0x748   :  { %v2131_v49 = vpack.c.bf16 %v2115_v29, %v2115_v29  ;;  %v2049_v29 = vmul.f32 1.442695, %v2026_v61  ;;  %v3460_v61 = vld [vmem:[#allocation10 + $0x70] sm:$0xff] }
 0x749   :  { %v2564_v31 = vpop.xlane.xlu0 %2563 }
 0x74a   :  { %v2163_v5 = vunpack.c.l.b16 %v2131_v49  ;;  %v2593_v4 = vsub.f32 %v5018_v21, %v2564_v31 }
 0x74c   :  { %v5103_v15 = vpop.eup %3333  ;;  %v2179_v46 = vpack.c.b16 %v2164_v2, %v2163_v5  ;;  %v2611_v58 = vmul.f32 1.442695, %v2593_v4  ;;  %v5139_v55 = vpop.f32.mrf.mxu2 }
 0x74d   :  { %2641 = vadd.xlane.f32.xlu2 %v5103_v15  ;;  %2579 = vmax.xlane.f32.xlu1 %v5101_v59  ;;  %v5108_v24 = vpop.eup %3335  ;;  %v1984_v4 = vpop.f32.mrf.mxu0 }
 0x74e   :  { %3337 = vpow2.f32 %v2611_v58  ;;  %2235 = vmatmul.bf16.vlgmr.msra.gmra.mxu1 %v2179_v46  ;;  %v5126_v10 = vpop.xlane.xlu1 %2007 }
 0x751   :  { %v2566_v54 = vpop.xlane.xlu2 %2565 }
 0x752   :  { %v2594_v40 = vsub.f32 %v5027_v43, %v2566_v54 }
 0x754   :  { %v5110_v21 = vpop.eup %3337  ;;  %v2613_v25 = vmul.f32 1.442695, %v2594_v40  ;;  %v2551_v46 = vpop.f32.mrf.mxu2  ;;  %v5150_v40 = vld [vmem:[#allocation10 + $0x78] sm:$0xff] }
 0x755   :  { %2077 = vadd.xlane.f32.xlu2 %v5108_v24  ;;  %2643 = vadd.xlane.f32.xlu1 %v5110_v21  ;;  %v5156_v56 = vadd.f32 %v5084_v32, %v2551_v46 }
 0x756   :  { %3339 = vpow2.f32 %v2613_v25  ;;  %v5141_v31 = vpop.xlane.xlu1 %2075  ;;  %v5153_v25 = vadd.f32 %v5150_v40, %v1984_v4 }
 0x757   :  { %3341 = vpow2.f32 %v2047_v7  ;;  %v2053_v7 = vmul.f32 1.442695, %v2028_v39 }
 0x758   :  { %3343 = vpow2.f32 %v2049_v29  ;;  %v5162_v29 = vadd.f32 %v3460_v61, %v1982_v35 }
 0x75c   :  { %v5120_v43 = vpop.eup %3339  ;;  %v2554_v4 = vpop.f32.mrf.mxu2 }
 0x75d   :  { %2581 = vmax.xlane.f32.xlu2 %v5118_v1  ;;  %2645 = vadd.xlane.f32.xlu1 %v5120_v43  ;;  %v5135_v49 = vpop.eup %3341  ;;  %v5169_v35 = vadd.f32 %v3460_v61, %v2554_v4 }
 0x761   :  { %v2570_v42 = vpop.xlane.xlu0 %2569 }
 0x762   :  { %v2596_v9 = vsub.f32 %v5038_v16, %v2570_v42  ;;  %v5143_v16 = vpop.eup %3343 }
 0x764   :  { %v2617_v44 = vmul.f32 1.442695, %v2596_v9 }
 0x765   :  { %2011 = vmax.xlane.f32.xlu2 %v5133_v50  ;;  %2079 = vadd.xlane.f32.xlu1 %v5135_v49 }
 0x766   :  { %3345 = vpow2.f32 %v2617_v44 }
 0x769   :  { %v2572_v2 = vpop.xlane.xlu0 %2571 }
 0x76a   :  { %v2597_v53 = vsub.f32 %v5044_v36, %v2572_v2  ;;  %v2383_v36 = vpop.permute.xlu2 %2382 }
 0x76b   :  { %v2414_v42 = vrot.slane %v2383_v36, 4 }
 0x76c   :  { %v5145_v5 = vpop.eup %3345  ;;  %v2619_v54 = vmul.f32 1.442695, %v2597_v53 }
 0x76d   :  { %2081 = vadd.xlane.f32.xlu2 %v5143_v16  ;;  %2649 = vadd.xlane.f32.xlu1 %v5145_v5  ;;  %v2767_v62 = vunpack.c.l.b16 %v2414_v42 }
 0x76e   :  { %3347 = vpow2.f32 %v2619_v54 }
 0x76f   :  { %3349 = vpow2.f32 %v2053_v7 }
 0x771   :  { %v2574_v58 = vpop.xlane.xlu1 %2573 }
 0x774   :  { %v5164_v44 = vpop.eup %3347 }
 0x775   :  { %2017 = vmax.xlane.f32.xlu2 %v5153_v25  ;;  %2585 = vmax.xlane.f32.xlu1 %v5156_v56  ;;  %v5171_v39 = vpop.eup %3349 }
 0x779   :  { %v2576_v9 = vpop.xlane.xlu1 %2575 }
 0x77a   :  { %v2599_v53 = vsub.f32 %v5055_v51, %v2576_v9 }
 0x77c   :  { %v2385_v2 = vpop.permute.xlu0 %2384  ;;  %v2623_v54 = vmul.f32 1.442695, %v2599_v53 }
 0x77d   :  { %v2415_v32 = vrot.slane %v2385_v2, 4  ;;  %2015 = vmax.xlane.f32.xlu1 %v5162_v29  ;;  %2651 = vadd.xlane.f32.xlu2 %v5164_v44 }
 0x77e   :  { %3351 = vpow2.f32 %v2623_v54  ;;  %v5189_v54 = vadd.f32 %v5129_v0, %v5139_v55 }
 0x77f   :  { %v2768_v57 = vunpack.c.l.b16 %v2415_v32  ;;  %3353 = vrcp.f32 %v5112_v27  ;;  %v2598_v32 = vsub.f32 %v5051_v26, %v2574_v58 }
 0x781   :  { %v2783_v46 = vpack.c.b16 %v2768_v57, %v2767_v62  ;;  %v2621_v57 = vmul.f32 1.442695, %v2598_v32 }
 0x783   :  { %2806 = vmatpush.bf16.msrb.mxu0 %v2783_v46 }
 0x784   :  { %v5175_v36 = vpop.eup %3351 }
 0x785   :  { %2085 = vadd.xlane.f32.xlu1 %v5171_v39  ;;  %2587 = vmax.xlane.f32.xlu2 %v5169_v35  ;;  %v3354_v9 = vpop.eup %3353 }
 0x786   :  { %v2118_v53 = vmul.f32 %v3354_v9, %v5013_v3  ;;  %v2027_v3 = vsub.f32 %v4961_v34, %v5076_v45  ;;  %v3129_v34 = vld [vmem:[#allocation8 + $0x10] sm:$0xff] }
 0x787   :  { %2324 = vmatpush.bf16.msrb.mxu3 %v3129_v34 }
 0x788   :  { %v2134_v46 = vpack.c.bf16 %v2118_v53, %v2118_v53  ;;  %v2051_v9 = vmul.f32 1.442695, %v2027_v3 }
 0x78a   :  { %v2166_v58 = vunpack.c.l.b16 %v2134_v46 }
 0x78d   :  { %2655 = vadd.xlane.f32.xlu1 %v5175_v36 }
 0x792   :  { %v2568_v51 = vpop.xlane.xlu2 %2567 }
 0x793   :  { %v2595_v7 = vsub.f32 %v5064_v19, %v2568_v51 }
 0x795   :  { %v2615_v42 = vmul.f32 1.442695, %v2595_v7 }
 0x797   :  { %3355 = vpow2.f32 %v2615_v42 }
 0x79a   :  { %v2072_v61 = vpop.xlane.xlu2 %2071 }
 0x79b   :  { %3357 = vrcp.f32 %v2072_v61 }
 0x79c   :  { %3359 = vpow2.f32 %v2621_v57 }
 0x79d   :  { %v5180_v2 = vpop.eup %3355 }
 0x79e   :  { %2647 = vadd.xlane.f32.xlu0 %v5180_v2 }
 0x7a1   :  { %v3358_v62 = vpop.eup %3357 }
 0x7a2   :  { %v2010_v4 = vpop.xlane.xlu2 %2009  ;;  %v2117_v19 = vmul.f32 %v3358_v62, %v5068_v20  ;;  %v5195_v0 = vpop.eup %3359 }
 0x7a3   :  { %v2030_v27 = vsub.f32 %v5071_v6, %v2010_v4  ;;  %v2556_v62 = vpop.f32.mrf.mxu2 }
 0x7a4   :  { %v2133_v51 = vpack.c.bf16 %v2117_v19, %v2117_v19  ;;  %v5210_v4 = vadd.f32 %v5150_v40, %v2556_v62 }
 0x7a5   :  { %v2057_v7 = vmul.f32 1.442695, %v2030_v27 }
 0x7a6   :  { %2583 = vmax.xlane.f32.xlu0 %v5189_v54  ;;  %v2165_v26 = vunpack.c.l.b16 %v2133_v51 }
 0x7a7   :  { %3361 = vpow2.f32 %v2057_v7  ;;  %v2578_v42 = vpop.xlane.xlu0 %2577 }
 0x7a8   :  { %v2600_v20 = vsub.f32 %v5079_v48, %v2578_v42  ;;  %v2180_v61 = vpack.c.b16 %v2166_v58, %v2165_v26  ;;  %v2029_v48 = vsub.f32 %v5024_v52, %v5126_v10 }
 0x7aa   :  { %v2625_v6 = vmul.f32 1.442695, %v2600_v20  ;;  %2240 = vmatmul.bf16.gmra.mxu1 %v2180_v61  ;;  %v2055_v57 = vmul.f32 1.442695, %v2029_v48 }
 0x7ac   :  { %3363 = vpow2.f32 %v2625_v6 }
 0x7ad   :  { %v5197_v55 = vpop.eup %3361  ;;  %3365 = vpow2.f32 %v2051_v9 }
 0x7ae   :  { %2653 = vadd.xlane.f32.xlu0 %v5195_v0  ;;  %2089 = vadd.xlane.f32.xlu1 %v5197_v55 }
 0x7af   :  { %v2014_v7 = vpop.xlane.xlu0 %2013 }
 0x7b0   :  { %v2032_v40 = vsub.f32 %v5087_v14, %v2014_v7 }
 0x7b2   :  { %v5201_v32 = vpop.eup %3363  ;;  %v2061_v6 = vmul.f32 1.442695, %v2032_v40 }
 0x7b3   :  { %2657 = vadd.xlane.f32.xlu2 %v5201_v32  ;;  %v5204_v45 = vpop.eup %3365 }
 0x7b6   :  { %2083 = vadd.xlane.f32.xlu0 %v5204_v45 }
 0x7b8   :  { %v2640_v53 = vpop.xlane.xlu1 %2639 }
 0x7b9   :  { %3367 = vrcp.f32 %v2640_v53 }
 0x7ba   :  { %3369 = vpow2.f32 %v2055_v57 }
 0x7be   :  { %2589 = vmax.xlane.f32.xlu0 %v5210_v4 }
 0x7bf   :  { %v3368_v27 = vpop.eup %3367 }
 0x7c0   :  { %v2642_v19 = vpop.xlane.xlu2 %2641  ;;  %v2580_v46 = vpop.xlane.xlu1 %2579  ;;  %v2687_v10 = vmul.f32 %v3368_v27, %v5093_v13 }
 0x7c1   :  { %3371 = vrcp.f32 %v2642_v19  ;;  %v2601_v51 = vsub.f32 %v5101_v59, %v2580_v46  ;;  %v5216_v26 = vpop.eup %3369 }
 0x7c2   :  { %3373 = vrcp.f32 %v5141_v31  ;;  %v2703_v3 = vpack.c.bf16 %v2687_v10, %v2687_v10 }
 0x7c3   :  { %v2627_v52 = vmul.f32 1.442695, %v2601_v51 }
 0x7c4   :  { %v2735_v34 = vunpack.c.l.b16 %v2703_v3 }
 0x7c5   :  { %3375 = vpow2.f32 %v2627_v52 }
 0x7c6   :  { %2087 = vadd.xlane.f32.xlu0 %v5216_v26 }
 0x7c7   :  { %v3372_v58 = vpop.eup %3371 }
 0x7c8   :  { %v2688_v42 = vmul.f32 %v3372_v58, %v5103_v15  ;;  %v2078_v20 = vpop.xlane.xlu2 %2077  ;;  %v2644_v61 = vpop.xlane.xlu1 %2643 }
 0x7c9   :  { %v3374_v59 = vpop.eup %3373  ;;  %3377 = vrcp.f32 %v2078_v20 }
 0x7ca   :  { %v2704_v31 = vpack.c.bf16 %v2688_v42, %v2688_v42  ;;  %3379 = vrcp.f32 %v2644_v61  ;;  %v2119_v14 = vmul.f32 %v3374_v59, %v5032_v47 }
 0x7cb   :  { %v5221_v9 = vpop.eup %3375  ;;  %v2236_v13 = vpop.f32.mrf.mxu1  ;;  %3381 = vpow2.f32 %v2061_v6 }
 0x7cc   :  { %v2736_v48 = vunpack.c.l.b16 %v2704_v31  ;;  %2659 = vadd.xlane.f32.xlu2 %v5221_v9  ;;  %v2135_v46 = vpack.c.bf16 %v2119_v14, %v2119_v14 }
 0x7ce   :  { %v2751_v53 = vpack.c.b16 %v2736_v48, %v2735_v34  ;;  %v2167_v47 = vunpack.c.l.b16 %v2135_v46 }
 0x7cf   :  { %v3378_v62 = vpop.eup %3377 }
 0x7d0   :  { %v2582_v15 = vpop.xlane.xlu2 %2581  ;;  %v2646_v57 = vpop.xlane.xlu1 %2645  ;;  %2807 = vmatmul.bf16.vlgmr.msrb.gmra.mxu0 %v2751_v53  ;;  %v2120_v19 = vmul.f32 %v3378_v62, %v5108_v24 }
 0x7d1   :  { %v3380_v27 = vpop.eup %3379  ;;  %v2602_v51 = vsub.f32 %v5118_v1, %v2582_v15  ;;  %3383 = vrcp.f32 %v2646_v57 }
 0x7d2   :  { %v2136_v7 = vpack.c.bf16 %v2120_v19, %v2120_v19  ;;  %v5227_v52 = vpop.eup %3381  ;;  %v2689_v42 = vmul.f32 %v3380_v27, %v5110_v21 }
 0x7d3   :  { %v2629_v10 = vmul.f32 1.442695, %v2602_v51  ;;  %v2238_v40 = vpop.f32.mrf.mxu1 }
 0x7d4   :  { %v2276_v58 = vpack.c.bf16 %v2238_v40, %v2236_v13  ;;  %2093 = vadd.xlane.f32.xlu2 %v5227_v52  ;;  %v2168_v3 = vunpack.c.l.b16 %v2136_v7  ;;  %v2705_v6 = vpack.c.bf16 %v2689_v42, %v2689_v42 }
 0x7d5   :  { %3385 = vpow2.f32 %v2629_v10 }
 0x7d6   :  { %3095 = vmatmul.msk.bf16.vlgmr.msrb.gmra.mxu3 %vm778_vm5, %v2276_v58  ;;  %v2181_v24 = vpack.c.b16 %v2168_v3, %v2167_v47  ;;  %v2737_v21 = vunpack.c.l.b16 %v2705_v6 }
 0x7d7   :  { %v3384_v20 = vpop.eup %3383 }
 0x7d8   :  { %v2012_v61 = vpop.xlane.xlu2 %2011  ;;  %2245 = vmatmul.bf16.gmra.mxu1 %v2181_v24  ;;  %v2080_v1 = vpop.xlane.xlu1 %2079  ;;  %v2690_v59 = vmul.f32 %v3384_v20, %v5120_v43 }
 0x7d9   :  { %v2031_v31 = vsub.f32 %v5133_v50, %v2012_v61  ;;  %3387 = vrcp.f32 %v2080_v1 }
 0x7da   :  { %v2706_v13 = vpack.c.bf16 %v2690_v59, %v2690_v59 }
 0x7db   :  { %v5234_v34 = vpop.eup %3385  ;;  %v2059_v48 = vmul.f32 1.442695, %v2031_v31 }
 0x7dc   :  { %2661 = vadd.xlane.f32.xlu0 %v5234_v34  ;;  %v2738_v14 = vunpack.c.l.b16 %v2706_v13 }
 0x7dd   :  { %3389 = vpow2.f32 %v2059_v48 }
 0x7de   :  { %v2752_v53 = vpack.c.b16 %v2738_v14, %v2737_v21 }
 0x7df   :  { %v3388_v57 = vpop.eup %3387 }
 0x7e0   :  { %v2082_v62 = vpop.xlane.xlu2 %2081  ;;  %v2650_v15 = vpop.xlane.xlu1 %2649  ;;  %2812 = vmatmul.bf16.gmra.mxu0 %v2752_v53  ;;  %v2121_v50 = vmul.f32 %v3388_v57, %v5135_v49 }
 0x7e1   :  { %3391 = vrcp.f32 %v2082_v62 }
 0x7e2   :  { %v2137_v7 = vpack.c.bf16 %v2121_v50, %v2121_v50 }
 0x7e3   :  { %v5237_v43 = vpop.eup %3389 }
 0x7e4   :  { %2091 = vadd.xlane.f32.xlu1 %v5237_v43  ;;  %v2169_v47 = vunpack.c.l.b16 %v2137_v7 }
 0x7e7   :  { %v3392_v19 = vpop.eup %3391 }
 0x7e8   :  { %v2018_v46 = vpop.xlane.xlu2 %2017  ;;  %v2586_v27 = vpop.xlane.xlu1 %2585  ;;  %v2122_v51 = vmul.f32 %v3392_v19, %v5143_v16 }
 0x7e9   :  { %v2604_v10 = vsub.f32 %v5156_v56, %v2586_v27 }
 0x7ea   :  { %v2138_v40 = vpack.c.bf16 %v2122_v51, %v2122_v51  ;;  %v2034_v51 = vsub.f32 %v5153_v25, %v2018_v46 }
 0x7eb   :  { %v2633_v58 = vmul.f32 1.442695, %v2604_v10 }
 0x7ec   :  { %v2170_v3 = vunpack.c.l.b16 %v2138_v40 }
 0x7ed   :  { %3393 = vpow2.f32 %v2633_v58 }
 0x7ee   :  { %v2182_v42 = vpack.c.b16 %v2170_v3, %v2169_v47 }
 0x7f0   :  { %2250 = vmatmul.bf16.gmra.mxu1 %v2182_v42  ;;  %v2016_v24 = vpop.xlane.xlu1 %2015  ;;  %v2652_v20 = vpop.xlane.xlu2 %2651 }
 0x7f1   :  { %v2033_v61 = vsub.f32 %v5162_v29, %v2016_v24 }
 0x7f3   :  { %v2063_v49 = vmul.f32 1.442695, %v2033_v61  ;;  %v5244_v1 = vpop.eup %3393 }
 0x7f4   :  { %2665 = vadd.xlane.f32.xlu1 %v5244_v1 }
 0x7f5   :  { %3395 = vpow2.f32 %v2063_v49 }
 0x7f8   :  { %v2588_v16 = vpop.xlane.xlu2 %2587 }
 0x7f9   :  { %v2605_v56 = vsub.f32 %v5169_v35, %v2588_v16 }
 0x7fb   :  { %v5248_v59 = vpop.eup %3395  ;;  %v2635_v6 = vmul.f32 1.442695, %v2605_v56 }
 0x7fc   :  { %2095 = vadd.xlane.f32.xlu2 %v5248_v59 }
 0x7fd   :  { %3397 = vpow2.f32 %v2635_v6 }
 0x7fe   :  { %3399 = vrcp.f32 %v2650_v15  ;;  %v2086_v15 = vpop.xlane.xlu1 %2085 }
 0x803   :  { %v5251_v31 = vpop.eup %3397 }
 0x804   :  { %2667 = vadd.xlane.f32.xlu1 %v5251_v31  ;;  %v3400_v13 = vpop.eup %3399 }
 0x805   :  { %v2692_v48 = vmul.f32 %v3400_v13, %v5145_v5  ;;  %v2065_v5 = vmul.f32 1.442695, %v2034_v51 }
 0x806   :  { %v2656_v25 = vpop.xlane.xlu1 %2655 }
 0x807   :  { %v2708_v53 = vpack.c.bf16 %v2692_v48, %v2692_v48 }
 0x809   :  { %v2740_v27 = vunpack.c.l.b16 %v2708_v53 }
 0x811   :  { %v2648_v29 = vpop.xlane.xlu0 %2647 }
 0x812   :  { %3401 = vrcp.f32 %v2648_v29 }
 0x813   :  { %3403 = vrcp.f32 %v2652_v20 }
 0x818   :  { %v3402_v21 = vpop.eup %3401 }
 0x819   :  { %v2584_v14 = vpop.xlane.xlu0 %2583  ;;  %v2691_v35 = vmul.f32 %v3402_v21, %v5180_v2  ;;  %v3404_v40 = vpop.eup %3403 }
 0x81a   :  { %v2603_v62 = vsub.f32 %v5189_v54, %v2584_v14  ;;  %v2693_v2 = vmul.f32 %v3404_v40, %v5164_v44  ;;  %v3130_v40 = vld [vmem:[#allocation8 + $0x18] sm:$0xff] }
 0x81b   :  { %v2707_v57 = vpack.c.bf16 %v2691_v35, %v2691_v35  ;;  %2896 = vmatpush.bf16.msrb.mxu1 %v3130_v40 }
 0x81c   :  { %v2631_v50 = vmul.f32 1.442695, %v2603_v62  ;;  %v2709_v20 = vpack.c.bf16 %v2693_v2, %v2693_v2 }
 0x81d   :  { %v2739_v19 = vunpack.c.l.b16 %v2707_v57 }
 0x81e   :  { %3405 = vpow2.f32 %v2631_v50  ;;  %v2741_v44 = vunpack.c.l.b16 %v2709_v20 }
 0x81f   :  { %v2753_v7 = vpack.c.b16 %v2740_v27, %v2739_v19 }
 0x821   :  { %2817 = vmatmul.bf16.gmra.mxu0 %v2753_v7  ;;  %v2654_v10 = vpop.xlane.xlu0 %2653  ;;  %v2090_v14 = vpop.xlane.xlu1 %2089 }
 0x822   :  { %3407 = vrcp.f32 %v2654_v10 }
 0x823   :  { %3409 = vrcp.f32 %v2086_v15 }
 0x824   :  { %v5258_v58 = vpop.eup %3405  ;;  %3411 = vpow2.f32 %v2065_v5 }
 0x825   :  { %2663 = vadd.xlane.f32.xlu0 %v5258_v58 }
 0x826   :  { %v2658_v47 = vpop.xlane.xlu2 %2657 }
 0x827   :  { %v2241_v54 = vpop.f32.mrf.mxu1 }
 0x828   :  { %v3408_v3 = vpop.eup %3407 }
 0x829   :  { %v2084_v46 = vpop.xlane.xlu0 %2083  ;;  %v3410_v42 = vpop.eup %3409  ;;  %v2694_v24 = vmul.f32 %v3408_v3, %v5195_v0 }
 0x82a   :  { %3413 = vrcp.f32 %v2084_v46  ;;  %v5263_v61 = vpop.eup %3411  ;;  %v2124_v16 = vmul.f32 %v3410_v42, %v5171_v39 }
 0x82b   :  { %3415 = vrcp.f32 %v2658_v47  ;;  %v2710_v49 = vpack.c.bf16 %v2694_v24, %v2694_v24 }
 0x82c   :  { %3417 = vrcp.f32 %v2656_v25  ;;  %v2140_v53 = vpack.c.bf16 %v2124_v16, %v2124_v16 }
 0x82d   :  { %2097 = vadd.xlane.f32.xlu0 %v5263_v61  ;;  %v2742_v56 = vunpack.c.l.b16 %v2710_v49  ;;  %3419 = vrcp.f32 %v2090_v14 }
 0x82e   :  { %v2172_v51 = vunpack.c.l.b16 %v2140_v53 }
 0x82f   :  { %v2243_v6 = vpop.f32.mrf.mxu1  ;;  %v2754_v48 = vpack.c.b16 %v2742_v56, %v2741_v44 }
 0x830   :  { %v3414_v29 = vpop.eup %3413  ;;  %v2277_v13 = vpack.c.bf16 %v2243_v6, %v2241_v54 }
 0x831   :  { %v3416_v21 = vpop.eup %3415  ;;  %v2590_v35 = vpop.xlane.xlu0 %2589  ;;  %v2123_v0 = vmul.f32 %v3414_v29, %v5204_v45  ;;  %2822 = vmatmul.bf16.gmra.mxu0 %v2754_v48 }
 0x832   :  { %v2606_v62 = vsub.f32 %v5210_v4, %v2590_v35  ;;  %3096 = vmatmul.msk.bf16.gmra.mxu3 %vm778_vm5, %v2277_v13  ;;  %v3418_v57 = vpop.eup %3417  ;;  %v2696_v19 = vmul.f32 %v3416_v21, %v5201_v32 }
 0x833   :  { %v2139_v50 = vpack.c.bf16 %v2123_v0, %v2123_v0  ;;  %v2695_v15 = vmul.f32 %v3418_v57, %v5175_v36  ;;  %v3420_v5 = vpop.eup %3419 }
 0x834   :  { %v2637_v39 = vmul.f32 1.442695, %v2606_v62  ;;  %v2712_v10 = vpack.c.bf16 %v2696_v19, %v2696_v19  ;;  %v2126_v32 = vmul.f32 %v3420_v5, %v5197_v55 }
 0x835   :  { %v2171_v27 = vunpack.c.l.b16 %v2139_v50  ;;  %v2711_v4 = vpack.c.bf16 %v2695_v15, %v2695_v15 }
 0x836   :  { %3421 = vpow2.f32 %v2637_v39  ;;  %v2744_v54 = vunpack.c.l.b16 %v2712_v10  ;;  %v2142_v46 = vpack.c.bf16 %v2126_v32, %v2126_v32 }
 0x837   :  { %v2183_v7 = vpack.c.b16 %v2172_v51, %v2171_v27  ;;  %v2743_v47 = vunpack.c.l.b16 %v2711_v4  ;;  %v5283_v4 = vpop.f32.mrf.mxu3 }
 0x838   :  { %v2174_v49 = vunpack.c.l.b16 %v2142_v46 }
 0x839   :  { %2255 = vmatmul.bf16.gmra.mxu1 %v2183_v7  ;;  %v2088_v45 = vpop.xlane.xlu0 %2087  ;;  %v2755_v25 = vpack.c.b16 %v2744_v54, %v2743_v47 }
 0x83a   :  { %3423 = vrcp.f32 %v2088_v45 }
 0x83c   :  { %v5272_v2 = vpop.eup %3421 }
 0x83d   :  { %2669 = vadd.xlane.f32.xlu2 %v5272_v2 }
 0x83f   :  { %v2660_v24 = vpop.xlane.xlu2 %2659 }
 0x840   :  { %v3424_v3 = vpop.eup %3423  ;;  %3425 = vrcp.f32 %v2660_v24 }
 0x841   :  { %v2125_v36 = vmul.f32 %v3424_v3, %v5216_v26  ;;  %2827 = vmatmul.bf16.gmra.mxu0 %v2755_v25  ;;  %v5286_v3 = vpop.f32.mrf.mxu3 }
 0x843   :  { %v2141_v42 = vpack.c.bf16 %v2125_v36, %v2125_v36 }
 0x845   :  { %v2173_v20 = vunpack.c.l.b16 %v2141_v42 }
 0x846   :  { %v3426_v6 = vpop.eup %3425 }
 0x847   :  { %v2184_v16 = vpack.c.b16 %v2174_v49, %v2173_v20  ;;  %v2094_v44 = vpop.xlane.xlu2 %2093  ;;  %v2697_v55 = vmul.f32 %v3426_v6, %v5221_v9 }
 0x849   :  { %2260 = vmatmul.bf16.gmra.mxu1 %v2184_v16  ;;  %v2713_v21 = vpack.c.bf16 %v2697_v55, %v2697_v55  ;;  %v5290_v55 = vpop.f32.mrf.mxu3 }
 0x84b   :  { %v2745_v0 = vunpack.c.l.b16 %v2713_v21 }
 0x84d   :  { %v2808_v24 = vpop.f32.mrf.mxu0 }
 0x84f   :  { %v2662_v56 = vpop.xlane.xlu0 %2661 }
 0x850   :  { %3427 = vrcp.f32 %v2662_v56 }
 0x851   :  { %3429 = vrcp.f32 %v2094_v44 }
 0x855   :  { %v2246_v29 = vpop.f32.mrf.mxu1 }
 0x856   :  { %v3428_v13 = vpop.eup %3427 }
 0x857   :  { %v2092_v48 = vpop.xlane.xlu1 %2091  ;;  %v2698_v26 = vmul.f32 %v3428_v13, %v5234_v34  ;;  %v3430_v14 = vpop.eup %3429 }
 0x858   :  { %3431 = vrcp.f32 %v2092_v48  ;;  %v2128_v62 = vmul.f32 %v3430_v14, %v5227_v52 }
 0x859   :  { %v2714_v35 = vpack.c.bf16 %v2698_v26, %v2698_v26 }
 0x85a   :  { %v2144_v27 = vpack.c.bf16 %v2128_v62, %v2128_v62 }
 0x85b   :  { %v2746_v53 = vunpack.c.l.b16 %v2714_v35 }
 0x85c   :  { %v2176_v15 = vunpack.c.l.b16 %v2144_v27 }
 0x85d   :  { %v2248_v57 = vpop.f32.mrf.mxu1  ;;  %v2756_v50 = vpack.c.b16 %v2746_v53, %v2745_v0 }
 0x85e   :  { %v3432_v39 = vpop.eup %3431  ;;  %v2278_v19 = vpack.c.bf16 %v2248_v57, %v2246_v29 }
 0x85f   :  { %2832 = vmatmul.bf16.gmra.mxu0 %v2756_v50  ;;  %v2127_v9 = vmul.f32 %v3432_v39, %v5237_v43 }
 0x860   :  { %3097 = vmatmul.msk.bf16.gmra.mxu3 %vm778_vm5, %v2278_v19 }
 0x861   :  { %v2143_v51 = vpack.c.bf16 %v2127_v9, %v2127_v9 }
 0x863   :  { %v2175_v34 = vunpack.c.l.b16 %v2143_v51 }
 0x865   :  { %v2185_v7 = vpack.c.b16 %v2176_v15, %v2175_v34 }
 0x867   :  { %2265 = vmatmul.bf16.gmra.mxu1 %v2185_v7  ;;  %v2666_v52 = vpop.xlane.xlu1 %2665 }
 0x868   :  { %3433 = vrcp.f32 %v2666_v52 }
 0x86d   :  { %v2251_v10 = vpop.f32.mrf.mxu1 }
 0x86e   :  { %v3434_v43 = vpop.eup %3433 }
 0x86f   :  { %v2096_v40 = vpop.xlane.xlu2 %2095  ;;  %v2700_v32 = vmul.f32 %v3434_v43, %v5244_v1 }
 0x871   :  { %v2716_v46 = vpack.c.bf16 %v2700_v32, %v2700_v32 }
 0x873   :  { %v2748_v16 = vunpack.c.l.b16 %v2716_v46 }
 0x875   :  { %v2253_v45 = vpop.f32.mrf.mxu1 }
 0x876   :  { %v2279_v5 = vpack.c.bf16 %v2253_v45, %v2251_v10 }
 0x877   :  { %v2668_v1 = vpop.xlane.xlu1 %2667 }
 0x878   :  { %3098 = vmatmul.msk.bf16.gmra.mxu3 %vm778_vm5, %v2279_v5 }
 0x898   :  { %v2664_v54 = vpop.xlane.xlu0 %2663 }
 0x899   :  { %3435 = vrcp.f32 %v2664_v54 }
 0x89a   :  { %3437 = vrcp.f32 %v2096_v40 }
 0x89f   :  { %v3436_v47 = vpop.eup %3435 }
 0x8a0   :  { %v2098_v25 = vpop.xlane.xlu0 %2097  ;;  %v2699_v36 = vmul.f32 %v3436_v47, %v5258_v58  ;;  %v3438_v42 = vpop.eup %3437 }
 0x8a1   :  { %3439 = vrcp.f32 %v2098_v25  ;;  %v2129_v44 = vmul.f32 %v3438_v42, %v5248_v59  ;;  %v2810_v58 = vpop.f32.mrf.mxu0  ;;  %v5293_v59 = vpop.f32.mrf.mxu3 }
 0x8a2   :  { %v2715_v20 = vpack.c.bf16 %v2699_v36, %v2699_v36  ;;  %3441 = vrcp.f32 %v2668_v1  ;;  %v2848_v34 = vpack.c.bf16 %v2810_v58, %v2808_v24 }
 0x8a3   :  { %v2145_v13 = vpack.c.bf16 %v2129_v44, %v2129_v44 }
 0x8a4   :  { %v2747_v49 = vunpack.c.l.b16 %v2715_v20 }
 0x8a5   :  { %v2177_v26 = vunpack.c.l.b16 %v2145_v13 }
 0x8a6   :  { %v2757_v56 = vpack.c.b16 %v2748_v16, %v2747_v49 }
 0x8a7   :  { %v3440_v6 = vpop.eup %3439 }
 0x8a8   :  { %v2130_v29 = vmul.f32 %v3440_v6, %v5263_v61  ;;  %2837 = vmatmul.bf16.gmra.mxu0 %v2757_v56  ;;  %v3442_v0 = vpop.eup %3441 }
 0x8a9   :  { %v2701_v53 = vmul.f32 %v3442_v0, %v5251_v31  ;;  %v2813_v62 = vpop.f32.mrf.mxu0  ;;  %v5297_v9 = vpop.f32.mrf.mxu3 }
 0x8aa   :  { %v2146_v48 = vpack.c.bf16 %v2130_v29, %v2130_v29 }
 0x8ab   :  { %v2717_v39 = vpack.c.bf16 %v2701_v53, %v2701_v53 }
 0x8ac   :  { %v2178_v21 = vunpack.c.l.b16 %v2146_v48 }
 0x8ad   :  { %v2749_v27 = vunpack.c.l.b16 %v2717_v39 }
 0x8ae   :  { %v2186_v14 = vpack.c.b16 %v2178_v21, %v2177_v26 }
 0x8b0   :  { %v2670_v35 = vpop.xlane.xlu2 %2669  ;;  %2270 = vmatmul.bf16.gmra.mxu1 %v2186_v14 }
 0x8b1   :  { %3443 = vrcp.f32 %v2670_v35  ;;  %v2815_v10 = vpop.f32.mrf.mxu0  ;;  %v5301_v31 = vpop.f32.mrf.mxu3 }
 0x8b2   :  { %v2849_v52 = vpack.c.bf16 %v2815_v10, %v2813_v62 }
 0x8b6   :  { %v2256_v57 = vpop.f32.mrf.mxu1 }
 0x8b7   :  { %v3444_v50 = vpop.eup %3443 }
 0x8b8   :  { %v2702_v61 = vmul.f32 %v3444_v50, %v5272_v2 }
 0x8b9   :  { %v2818_v2 = vpop.f32.mrf.mxu0  ;;  %v5303_v43 = vpop.f32.mrf.mxu3 }
 0x8ba   :  { %v2718_v19 = vpack.c.bf16 %v2702_v61, %v2702_v61 }
 0x8bc   :  { %v2750_v51 = vunpack.c.l.b16 %v2718_v19 }
 0x8be   :  { %v2258_v15 = vpop.f32.mrf.mxu1  ;;  %v2758_v7 = vpack.c.b16 %v2750_v51, %v2749_v27  ;;  %v1771_v51 = vadd.f32 %v4860_v41, %v5283_v4 }
 0x8bf   :  { %v2280_v45 = vpack.c.bf16 %v2258_v15, %v2256_v57 }
 0x8c0   :  { %2842 = vmatmul.bf16.gmra.mxu0 %v2758_v7  ;;  %3115 = vmatmul.msk.bf16.vlgmr.msrb.gmra.mxu1 %vm778_vm5, %v2848_v34  ;;  %v5337_v7 = vld [vmem:[%s5413_s5] ss:$0 sm:$0xff]  ;;  %s3629_s5 = smov [#allocation11]  }
 0x8c1   :  { %3099 = vmatmul.msk.bf16.gmra.mxu3 %vm778_vm5, %v2280_v45  ;;  %v2820_v32 = vpop.f32.mrf.mxu0  ;;  %v5307_v47 = vpop.f32.mrf.mxu3  ;;  %s2994_s11 = sshll.u32 %s3629_s5, 4  ;;  %s2995_s11 = int_to_ptr.vmem [resolvable:$true] %s2994_s11 }
 0x8c2   :  { %v2850_v36 = vpack.c.bf16 %v2820_v32, %v2818_v2 }
 0x8c6   :  { %v2261_v5 = vpop.f32.mrf.mxu1 }
 0x8c9   :  { %v2823_v25 = vpop.f32.mrf.mxu0  ;;  %v5310_v46 = vpop.f32.mrf.mxu3 }
 0x8ce   :  { %v2263_v40 = vpop.f32.mrf.mxu1 }
 0x8cf   :  { %v2281_v54 = vpack.c.bf16 %v2263_v40, %v2261_v5 }
 0x8d0   :  { %3116 = vmatmul.msk.bf16.gmra.mxu1 %vm778_vm5, %v2849_v52  ;;  %v1773_v52 = vadd.f32 %v4869_v33, %v5286_v3 }
 0x8d1   :  { %3100 = vmatmul.msk.bf16.gmra.mxu3 %vm778_vm5, %v2281_v54  ;;  %v2825_v24 = vpop.f32.mrf.mxu0  ;;  %v5312_v20 = vpop.f32.mrf.mxu3 }
 0x8d2   :  { %v2851_v44 = vpack.c.bf16 %v2825_v24, %v2823_v25 }
 0x8d9   :  { %v2828_v56 = vpop.f32.mrf.mxu0  ;;  %v5316_v6 = vpop.f32.mrf.mxu3 }
 0x8e0   :  { %3117 = vmatmul.msk.bf16.gmra.mxu1 %vm778_vm5, %v2850_v36 }
 0x8e1   :  { %v2830_v1 = vpop.f32.mrf.mxu0  ;;  %v5318_v29 = vpop.f32.mrf.mxu3 }
 0x8e2   :  { %v2852_v13 = vpack.c.bf16 %v2830_v1, %v2828_v56 }
 0x8e4   :  { %v2266_v42 = vpop.f32.mrf.mxu1 }
 0x8e9   :  { %v2833_v48 = vpop.f32.mrf.mxu0  ;;  %v5321_v58 = vpop.f32.mrf.mxu3 }
 0x8ec   :  { %v2268_v49 = vpop.f32.mrf.mxu1 }
 0x8ed   :  { %v2282_v16 = vpack.c.bf16 %v2268_v49, %v2266_v42  ;;  %v1776_v42 = vadd.f32 %v4885_v38, %v5290_v55  ;;  %v1781_v38 = vadd.f32 %v4909_v12, %v5297_v9  ;;  %v1786_v12 = vadd.f32 %v4929_v8, %v5303_v43 }
 0x8ee   :  { %v1791_v8 = vadd.f32 %v4947_v23, %v5310_v46  ;;  %v1796_v23 = vadd.f32 %v4964_v17, %v5316_v6  ;;  %v1801_v6 = vadd.f32 %v4982_v37, %v5321_v58 }
 0x8ef   :  { %3101 = vmatmul.msk.bf16.gmra.mxu3 %vm778_vm5, %v2282_v16 }
 0x8f0   :  { %3118 = vmatmul.msk.bf16.gmra.mxu1 %vm778_vm5, %v2851_v44  ;;  %v1778_v44 = vadd.f32 %v4895_v28, %v5293_v59  ;;  %v1783_v28 = vadd.f32 %v4917_v22, %v5301_v31  ;;  %v1788_v22 = vadd.f32 %v4945_v63, %v5307_v47  ;;  %v1793_v63 = vadd.f32 %v4954_v11, %v5312_v20 }
 0x8f1   :  { %v2835_v26 = vpop.f32.mrf.mxu0  ;;  %v5323_v14 = vpop.f32.mrf.mxu3  ;;  %v1798_v11 = vadd.f32 %v4976_v30, %v5318_v29 }
 0x8f2   :  { %v2853_v21 = vpack.c.bf16 %v2835_v26, %v2833_v48  ;;  %v1803_v30 = vadd.f32 %v4984_v60, %v5323_v14  ;;  %v5496_v60 = vld [vmem:[#allocation35_spill] sm:$0xff] }
 0x8f9   :  { %v5326_v35 = vpop.f32.mrf.mxu3 }
 0x8fa   :  { %v1806_v37 = vadd.f32 %v4988_v18, %v5326_v35 }
 0x900   :  { %3119 = vmatmul.msk.bf16.gmra.mxu1 %vm778_vm5, %v2852_v13 }
 0x901   :  { %v5328_v0 = vpop.f32.mrf.mxu3 }
 0x902   :  { %v1808_v14 = vadd.f32 %v5496_v60, %v5328_v0 }
 0x909   :  { %v2326_v62 = vpop.f32.mrf.mxu3 }
 0x90a   :  { %v2366_v34 = vadd.f32 %v2326_v62, %v1771_v51 }
 0x910   :  { %3120 = vmatmul.msk.bf16.gmra.mxu1 %vm778_vm5, %v2853_v21 }
 0x911   :  { %v2328_v39 = vpop.f32.mrf.mxu3 }
 0x912   :  { %v2367_v40 = vadd.f32 %v2328_v39, %v1773_v52 }
 0x919   :  { %v2331_v15 = vpop.f32.mrf.mxu3 }
 0x91a   :  { %v2368_v24 = vadd.f32 %v2331_v15, %v1776_v42 }
 0x921   :  { %v2333_v25 = vpop.f32.mrf.mxu3 }
 0x922   :  { %v2369_v56 = vadd.f32 %v2333_v25, %v1778_v44 }
 0x925   :  { %v2838_v53 = vpop.f32.mrf.mxu0 }
 0x929   :  { %v2336_v3 = vpop.f32.mrf.mxu3 }
 0x92a   :  { %v2370_v55 = vadd.f32 %v2336_v3, %v1781_v38 }
 0x92d   :  { %v2271_v57 = vpop.f32.mrf.mxu1  ;;  %v2840_v50 = vpop.f32.mrf.mxu0 }
 0x92e   :  { %v2854_v61 = vpack.c.bf16 %v2840_v50, %v2838_v53 }
 0x930   :  { %3121 = vmatmul.msk.bf16.gmra.mxu1 %vm778_vm5, %v2854_v61 }
 0x931   :  { %v2338_v26 = vpop.f32.mrf.mxu3 }
 0x932   :  { %v2371_v59 = vadd.f32 %v2338_v26, %v1783_v28 }
 0x935   :  { %v2273_v19 = vpop.f32.mrf.mxu1 }
 0x936   :  { %v2283_v27 = vpack.c.bf16 %v2273_v19, %v2271_v57 }
 0x938   :  { %3102 = vmatmul.msk.bf16.gmra.mxu3 %vm778_vm5, %v2283_v27 }
 0x939   :  { %v2341_v57 = vpop.f32.mrf.mxu3 }
 0x93a   :  { %v2372_v19 = vadd.f32 %v2341_v57, %v1786_v12 }
 0x93d   :  { %v2843_v10 = vpop.f32.mrf.mxu0  ;;  %v2898_v45 = vpop.f32.mrf.mxu1 }
 0x93e   :  { %v2938_v5 = vadd.f32 %v2898_v45, %v2366_v34 }
 0x940   :  { %v2958_v2 = vadd.f32 %v5337_v7, %v2938_v5 }
 0x941   :  { %v2343_v9 = vpop.f32.mrf.mxu3 }
 0x942   :  { %2974 = vst.msk [vmem:[#allocation11] sm:$0xff] %vm120_vm0, %v2958_v2  ;;  %v2373_v15 = vadd.f32 %v2343_v9, %v1788_v22 }
 0x945   :  { %v2845_v54 = vpop.f32.mrf.mxu0  ;;  %v2900_v41 = vpop.f32.mrf.mxu1 }
 0x946   :  { %v2855_v4 = vpack.c.bf16 %v2845_v54, %v2843_v10  ;;  %v2939_v32 = vadd.f32 %v2900_v41, %v2367_v40 }
 0x948   :  { %v2959_v36 = vadd.f32 %v5337_v7, %v2939_v32  ;;  %3122 = vmatmul.msk.bf16.gmra.mxu1 %vm778_vm5, %v2855_v4 }
 0x949   :  { %v2346_v31 = vpop.f32.mrf.mxu3 }
 0x94a   :  { %2975 = vst.msk [vmem:[#allocation11 + $0x8] sm:$0xff] %vm120_vm0, %v2959_v36  ;;  %v2374_v43 = vadd.f32 %v2346_v31, %v1791_v8 }
 0x94d   :  { %v2903_v49 = vpop.f32.mrf.mxu1 }
 0x94e   :  { %v2940_v33 = vadd.f32 %v2903_v49, %v2368_v24 }
 0x950   :  { %v2960_v16 = vadd.f32 %v5337_v7, %v2940_v33 }
 0x951   :  { %v2348_v2 = vpop.f32.mrf.mxu3 }
 0x952   :  { %2976 = vst.msk [vmem:[#allocation11 + $0x10] sm:$0xff] %vm120_vm0, %v2960_v16  ;;  %v2375_v47 = vadd.f32 %v2348_v2, %v1793_v63 }
 0x955   :  { %v2905_v1 = vpop.f32.mrf.mxu1 }
 0x956   :  { %v2941_v13 = vadd.f32 %v2905_v1, %v2369_v56 }
 0x958   :  { %v2961_v48 = vadd.f32 %v5337_v7, %v2941_v13 }
 0x959   :  { %v2351_v32 = vpop.f32.mrf.mxu3 }
 0x95a   :  { %2977 = vst.msk [vmem:[#allocation11 + $0x18] sm:$0xff] %vm120_vm0, %v2961_v48  ;;  %v2376_v46 = vadd.f32 %v2351_v32, %v1796_v23 }
 0x95d   :  { %v2908_v21 = vpop.f32.mrf.mxu1 }
 0x95e   :  { %v2942_v53 = vadd.f32 %v2908_v21, %v2370_v55 }
 0x960   :  { %v2962_v62 = vadd.f32 %v5337_v7, %v2942_v53 }
 0x961   :  { %v2353_v49 = vpop.f32.mrf.mxu3 }
 0x962   :  { %2978 = vst.msk [vmem:[#allocation11 + $0x20] sm:$0xff] %vm120_vm0, %v2962_v62  ;;  %v2377_v20 = vadd.f32 %v2353_v49, %v1798_v11 }
 0x965   :  { %v2910_v50 = vpop.f32.mrf.mxu1 }
 0x966   :  { %v2943_v61 = vadd.f32 %v2910_v50, %v2371_v59 }
 0x968   :  { %v2963_v39 = vadd.f32 %v5337_v7, %v2943_v61 }
 0x96a   :  { %2979 = vst.msk [vmem:[#allocation11 + $0x28] sm:$0xff] %vm120_vm0, %v2963_v39 }
 0x96d   :  { %v2913_v27 = vpop.f32.mrf.mxu1 }
 0x96e   :  { %v2944_v51 = vadd.f32 %v2913_v27, %v2372_v19 }
 0x970   :  { %v2964_v34 = vadd.f32 %v5337_v7, %v2944_v51 }
 0x972   :  { %2980 = vst.msk [vmem:[#allocation11 + $0x30] sm:$0xff] %vm120_vm0, %v2964_v34  ;;  %v2356_v17 = vpop.f32.mrf.mxu3 }
 0x973   :  { %v2378_v44 = vadd.f32 %v2356_v17, %v1801_v6 }
 0x975   :  { %v2915_v10 = vpop.f32.mrf.mxu1 }
 0x976   :  { %v2945_v45 = vadd.f32 %v2915_v10, %v2373_v15 }
 0x978   :  { %v2965_v5 = vadd.f32 %v5337_v7, %v2945_v45 }
 0x97a   :  { %2981 = vst.msk [vmem:[#allocation11 + $0x38] sm:$0xff] %vm120_vm0, %v2965_v5  ;;  %v2358_v48 = vpop.f32.mrf.mxu3 }
 0x97b   :  { %v2379_v29 = vadd.f32 %v2358_v48, %v1803_v30 }
 0x97d   :  { %v2918_v52 = vpop.f32.mrf.mxu1 }
 0x97e   :  { %v2946_v40 = vadd.f32 %v2918_v52, %v2374_v43 }
 0x980   :  { %v2966_v54 = vadd.f32 %v5337_v7, %v2946_v40 }
 0x982   :  { %2982 = vst.msk [vmem:[#allocation11 + $0x40] sm:$0xff] %vm120_vm0, %v2966_v54 }
 0x985   :  { %v2920_v41 = vpop.f32.mrf.mxu1 }
 0x986   :  { %v2947_v4 = vadd.f32 %v2920_v41, %v2375_v47 }
 0x988   :  { %v2967_v25 = vadd.f32 %v5337_v7, %v2947_v4 }
 0x98a   :  { %2983 = vst.msk [vmem:[#allocation11 + $0x48] sm:$0xff] %vm120_vm0, %v2967_v25 }
 0x98d   :  { %v2923_v36 = vpop.f32.mrf.mxu1 }
 0x98e   :  { %v2948_v42 = vadd.f32 %v2923_v36, %v2376_v46 }
 0x990   :  { %v2968_v24 = vadd.f32 %v5337_v7, %v2948_v42 }
 0x992   :  { %2984 = vst.msk [vmem:[#allocation11 + $0x50] sm:$0xff] %vm120_vm0, %v2968_v24 }
 0x995   :  { %v2925_v33 = vpop.f32.mrf.mxu1 }
 0x996   :  { %v2949_v3 = vadd.f32 %v2925_v33, %v2377_v20 }
 0x998   :  { %v2969_v16 = vadd.f32 %v5337_v7, %v2949_v3 }
 0x99a   :  { %2985 = vst.msk [vmem:[#allocation11 + $0x58] sm:$0xff] %vm120_vm0, %v2969_v16 }
 0x9ad   :  { %v2928_v56 = vpop.f32.mrf.mxu1 }
 0x9ae   :  { %v2950_v1 = vadd.f32 %v2928_v56, %v2378_v44 }
 0x9b0   :  { %v2970_v13 = vadd.f32 %v5337_v7, %v2950_v1 }
 0x9b2   :  { %2986 = vst.msk [vmem:[#allocation11 + $0x60] sm:$0xff] %vm120_vm0, %v2970_v13 }
 0x9b5   :  { %v2930_v26 = vpop.f32.mrf.mxu1 }
 0x9b6   :  { %v2951_v38 = vadd.f32 %v2930_v26, %v2379_v29 }
 0x9b8   :  { %v2971_v55 = vadd.f32 %v5337_v7, %v2951_v38 }
 0x9ba   :  { %2987 = vst.msk [vmem:[#allocation11 + $0x68] sm:$0xff] %vm120_vm0, %v2971_v55 }
 0x9bb   :  { %v2361_v21 = vpop.f32.mrf.mxu3 }
 0x9bc   :  { %v2380_v58 = vadd.f32 %v2361_v21, %v1806_v37 }
 0x9c3   :  { %v2363_v28 = vpop.f32.mrf.mxu3 }
 0x9c4   :  { %v2381_v59 = vadd.f32 %v2363_v28, %v1808_v14 }
 0x9c5   :  { %v2933_v53 = vpop.f32.mrf.mxu1 }
 0x9c6   :  { %v2952_v62 = vadd.f32 %v2933_v53, %v2380_v58 }
 0x9c8   :  { %v2972_v57 = vadd.f32 %v5337_v7, %v2952_v62 }
 0x9ca   :  { %2988 = vst.msk [vmem:[#allocation11 + $0x70] sm:$0xff] %vm120_vm0, %v2972_v57 }
 0x9cd   :  { %v2935_v50 = vpop.f32.mrf.mxu1 }
 0x9ce   :  { %v2953_v18 = vadd.f32 %v2935_v50, %v2381_v59 }
 0x9d0   :  { %v2973_v35 = vadd.f32 %v5337_v7, %v2953_v18 }
 0x9d2   :  { %2989 = vst.msk [vmem:[#allocation11 + $0x78] sm:$0xff] %vm120_vm0, %v2973_v35 }
 0x9d3   :  { %3002 = dma.vmem_to_hbm [thread:$0]  %s2995_s11, 2048, %s2997_s13, [#allocation4], %s3618_s19, %s3618_s19, %s3619_s20  }
 0x9d4   :  { %3611 = dma.done.wait [#allocation4], 2048  }
 0x9d5   :  { %3612 = vsyncadd [#allocation4], 4294965248 }
 0x9d6   :  { %3007 = vsyncpa [#allocation3], 1 }
 0x9d7   :  { %3008 = vsyncpa [#allocation6], 1 }
 0x9d8   :  { %3009 = vsyncpa [#allocation9], 1 }
 0x9d9   :  { %3010 = vsyncpa [#allocation4], 1 }

</bundles_post_ra>
